<compile_context>
chip_gen: v7x
topology: tpu7x:2x2x1
jax: 0.10.0
libtpu: 0.0.40
codegen_flags: <defaults>
</compile_context>

<pallas_src>
import jax
import jax.numpy as jnp
from jax import lax
from jax.experimental import pallas as pl
from jax.experimental.pallas import tpu as pltpu


def _attention2_kernel(x_ref, wc_ref, b_ref, out_ref):
    """Per grid step: B batch volumes -> (B, K) softmax attention weights.

    x_ref  : (B, D, H, W)  input volumes (caller dtype; accumulated in f32)
    wc_ref : (45, K)       combined per-tap conv weights, pre-scaled by 1/(D*H*W)
    b_ref  : (1, K)        summed conv biases
    out_ref: (B, K)        softmax output
    """
    x = x_ref[...].astype(jnp.float32)          # (B, D, H, W)
    B, D, H, W = x.shape
    K = out_ref.shape[1]

    # Box sums S(od, oh, ow) = sum of x over
    #   d in [max(0,od), D+min(0,od)), h in [max(0,oh), H+min(0,oh)), w likewise,
    # computed hierarchically: one full reduction along W, then cheap
    # boundary-column / boundary-row / boundary-plane corrections.

    # --- W stage: window sums along W for ow in {-1, 0, +1} ---------------
    pw_full = jnp.sum(x, axis=-1)               # (B, D, H)   ow = 0
    pw = (
        pw_full - x[..., W - 1],                # ow = -1 : cols [0, W-1)
        pw_full,                                # ow =  0 : cols [0, W)
        pw_full - x[..., 0],                    # ow = +1 : cols [1, W)
    )

    # --- H stage: window sums along H for oh in {-1, 0, +1} ---------------
    q = {}
    for iw in range(3):
        p = pw[iw]                              # (B, D, H)
        qf = jnp.sum(p, axis=-1)                # (B, D)      oh = 0
        q[(1, iw)] = qf
        q[(0, iw)] = qf - p[:, :, H - 1]        # oh = -1
        q[(2, iw)] = qf - p[:, :, 0]            # oh = +1

    # --- D stage: window sums along D for od in {-2, ..., +2} -------------
    s = {}
    for (ih, iw), qv in q.items():              # qv: (B, D)
        rf = jnp.sum(qv, axis=-1, keepdims=True)        # (B, 1)  od = 0
        r_m1 = rf - qv[:, D - 1:D]                      # od = -1
        r_m2 = r_m1 - qv[:, D - 2:D - 1]                # od = -2
        r_p1 = rf - qv[:, 0:1]                          # od = +1
        r_p2 = r_p1 - qv[:, 1:2]                        # od = +2
        s[(0, ih, iw)] = r_m2
        s[(1, ih, iw)] = r_m1
        s[(2, ih, iw)] = rf
        s[(3, ih, iw)] = r_p1
        s[(4, ih, iw)] = r_p2

    # --- tiny (45 -> K) contraction + bias ---------------------------------
    # logits[b, k] = bias[k] + sum_t S[b, t] * Wc[t, k]   (Wc already holds 1/V)
    logits = jnp.zeros((B, K), jnp.float32) + b_ref[...]
    for idd in range(5):
        for ih in range(3):
            for iw in range(3):
                t = idd * 9 + ih * 3 + iw
                logits = logits + s[(idd, ih, iw)] * wc_ref[t:t + 1, :]

    # --- softmax over K -----------------------------------------------------
    m = jnp.max(logits, axis=-1, keepdims=True)
    e = jnp.exp(logits - m)
    out_ref[...] = (e / jnp.sum(e, axis=-1, keepdims=True)).astype(out_ref.dtype)


def _pick_batch_block(n, max_b=8):
    """Largest divisor of n that is <= max_b, preferring >= 2 grid steps so the
    'parallel' batch axis can shard across both TensorCores on v7x."""
    divisors = [b for b in range(1, min(n, max_b) + 1) if n % b == 0]
    for b in reversed(divisors):
        if n // b >= 2:
            return b
    return divisors[-1]


def attention2_forward(x, w1, b1, w2, b2, w3, b3):
    """x: (N, 1, D, H, W).  Weights in PyTorch OIDHW layout.  Returns (N, K) f32."""
    N, C, D, H, W = x.shape
    assert C == 1, "Attention2 uses Conv3d with in_channels=1"
    assert D >= 2, "depth >= 2 required by the boundary-correction scheme"
    K = w1.shape[0]

    # Free relayout only (no extra HBM pass): drop the singleton channel dim and
    # keep the caller's dtype on the wire (bf16 inputs halve DMA bytes).
    x4 = x.reshape(N, D, H, W)

    # Combined (45, K) tap-weight slab.  Tap (od, oh, ow) with od in [-2,2],
    # oh/ow in [-1,1]; flat index t = (od+2)*9 + (oh+1)*3 + (ow+1).
    wc = w3.reshape(K, 45).astype(jnp.float32).T                    # 5x3x3 hits all 45 taps
    wc = wc.at[9:36].add(w2.reshape(K, 27).astype(jnp.float32).T)   # 3x3x3 -> od in [-1,1]
    wc = wc.at[22].add(w1.reshape(K).astype(jnp.float32))           # 1x1x1 -> tap (0,0,0)
    wc = wc * (1.0 / float(D * H * W))                              # fold the global mean
    bsum = (b1 + b2 + b3).reshape(1, K).astype(jnp.float32)

    B = _pick_batch_block(N)
    # TODO(synk): for very large volumes (a (B,D,H,W) block approaching the VMEM
    # budget, esp. v7x's 64 MiB), add an 'arbitrary' grid axis over D and
    # accumulate the box sums in a small VMEM scratch instead of one big block.
    return pl.pallas_call(
        _attention2_kernel,
        out_shape=jax.ShapeDtypeStruct((N, K), jnp.float32),
        grid=(N // B,),
        in_specs=[
            pl.BlockSpec((B, D, H, W), lambda n: (n, 0, 0, 0)),  # B input volumes
            pl.BlockSpec((45, K), lambda n: (0, 0)),             # combined tap weights
            pl.BlockSpec((1, K), lambda n: (0, 0)),              # summed biases
        ],
        out_specs=pl.BlockSpec((B, K), lambda n: (n, 0)),
        compiler_params=pltpu.CompilerParams(dimension_semantics=("parallel",)),
    )(x4, wc, bsum)


def _reference(x, w1, b1, w2, b2, w3, b3):
    dn = ("NCDHW", "OIDHW", "NCDHW")

    def conv(w, b, pad):
        y = lax.conv_general_dilated(x.astype(jnp.float32), w.astype(jnp.float32),
                                     (1, 1, 1), pad, dimension_numbers=dn)
        return y + b.reshape(1, -1, 1, 1, 1)

    y1 = conv(w1, b1, [(0, 0), (0, 0), (0, 0)])
    y2 = conv(w2, b2, [(1, 1), (1, 1), (1, 1)])
    y3 = conv(w3, b3, [(2, 2), (1, 1), (1, 1)])
    xa = (y1.mean(axis=(2, 3, 4)) + y2.mean(axis=(2, 3, 4))
          + y3.mean(axis=(2, 3, 4)))
    return jax.nn.softmax(xa, axis=-1)


if __name__ == "__main__":
    N, K = 16, 4
    D, H, W = 4, 8, 16

    key = jax.random.PRNGKey(0)
    kx, k1, k2, k3, kb1, kb2, kb3 = jax.random.split(key, 7)
    x = jax.random.normal(kx, (N, 1, D, H, W), jnp.float32)
    # Deterministic synthetic parameters (PyTorch Conv3d OIDHW shapes).
    w1 = jax.random.normal(k1, (K, 1, 1, 1, 1), jnp.float32) * 0.30
    w2 = jax.random.normal(k2, (K, 1, 3, 3, 3), jnp.float32) * 0.10
    w3 = jax.random.normal(k3, (K, 1, 5, 3, 3), jnp.float32) * 0.05
    b1 = jax.random.normal(kb1, (K,), jnp.float32) * 0.10
    b2 = jax.random.normal(kb2, (K,), jnp.float32) * 0.10
    b3 = jax.random.normal(kb3, (K,), jnp.float32) * 0.10

    out = attention2_forward(x, w1, b1, w2, b2, w3, b3)
    out = jax.block_until_ready(out)

    ref = _reference(x, w1, b1, w2, b2, w3, b3)
    assert out.shape == (N, K) and out.dtype == jnp.float32
    if not jnp.allclose(out, ref, atol=1e-5, rtol=1e-4):
        raise AssertionError(f"mismatch:\nkernel={out}\nref={ref}")
    print("KERNEL_OK")
</pallas_src>

<mosaic_0001>
module attributes {stable_mosaic.version = 11 : i64} {
  func.func @_attention2_kernel(%arg0: i32, %arg1: memref<8x4x8x16xf32, #tpu.memory_space<vmem>>, %arg2: memref<45x4xf32, #tpu.memory_space<vmem>>, %arg3: memref<1x4xf32, #tpu.memory_space<vmem>>, %arg4: memref<8x4xf32, #tpu.memory_space<vmem>>) attributes {dimension_semantics = [#tpu.dimension_semantics<parallel>], iteration_bounds = array<i64: 2>, scalar_prefetch = 0 : i64, scratch_operands = 0 : i64, tpu.core_type = #tpu.core_type<tc>, window_params = [{transform_indices = @transform_0, window_bounds = array<i64: 8, 4, 8, 16>}, {pipeline_mode = #tpu.pipeline_mode<synchronous>, transform_indices = @transform_1, window_bounds = array<i64: 45, 4>}, {pipeline_mode = #tpu.pipeline_mode<synchronous>, transform_indices = @transform_2, window_bounds = array<i64: 1, 4>}, {transform_indices = @transform_3, window_bounds = array<i64: 8, 4>}]} {
    %c0 = arith.constant 0 : index
    %c0_0 = arith.constant 0 : index
    %c0_1 = arith.constant 0 : index
    %c0_2 = arith.constant 0 : index
    %0 = vector.load %arg1[%c0, %c0_0, %c0_1, %c0_2] : memref<8x4x8x16xf32, #tpu.memory_space<vmem>>, vector<8x4x8x16xf32>
    %cst = arith.constant dense<0.000000e+00> : vector<8x4x8xf32>
    %1 = vector.multi_reduction <add>, %0, %cst [3] : vector<8x4x8x16xf32> to vector<8x4x8xf32>
    %2 = vector.extract_strided_slice %0 {offsets = [0, 0, 0, 15], sizes = [8, 4, 8, 1], strides = [1, 1, 1, 1]} : vector<8x4x8x16xf32> to vector<8x4x8x1xf32>
    %3 = vector.shape_cast %2 : vector<8x4x8x1xf32> to vector<8x4x8xf32>
    %4 = arith.subf %1, %3 : vector<8x4x8xf32>
    %5 = vector.extract_strided_slice %0 {offsets = [0, 0, 0, 0], sizes = [8, 4, 8, 1], strides = [1, 1, 1, 1]} : vector<8x4x8x16xf32> to vector<8x4x8x1xf32>
    %6 = vector.shape_cast %5 : vector<8x4x8x1xf32> to vector<8x4x8xf32>
    %7 = arith.subf %1, %6 : vector<8x4x8xf32>
    %cst_3 = arith.constant dense<0.000000e+00> : vector<8x4xf32>
    %8 = vector.multi_reduction <add>, %4, %cst_3 [2] : vector<8x4x8xf32> to vector<8x4xf32>
    %9 = vector.extract_strided_slice %4 {offsets = [0, 0, 7], sizes = [8, 4, 1], strides = [1, 1, 1]} : vector<8x4x8xf32> to vector<8x4x1xf32>
    %10 = vector.shape_cast %9 : vector<8x4x1xf32> to vector<8x4xf32>
    %11 = arith.subf %8, %10 : vector<8x4xf32>
    %12 = vector.extract_strided_slice %4 {offsets = [0, 0, 0], sizes = [8, 4, 1], strides = [1, 1, 1]} : vector<8x4x8xf32> to vector<8x4x1xf32>
    %13 = vector.shape_cast %12 : vector<8x4x1xf32> to vector<8x4xf32>
    %14 = arith.subf %8, %13 : vector<8x4xf32>
    %cst_4 = arith.constant dense<0.000000e+00> : vector<8x4xf32>
    %15 = vector.multi_reduction <add>, %1, %cst_4 [2] : vector<8x4x8xf32> to vector<8x4xf32>
    %16 = vector.extract_strided_slice %1 {offsets = [0, 0, 7], sizes = [8, 4, 1], strides = [1, 1, 1]} : vector<8x4x8xf32> to vector<8x4x1xf32>
    %17 = vector.shape_cast %16 : vector<8x4x1xf32> to vector<8x4xf32>
    %18 = arith.subf %15, %17 : vector<8x4xf32>
    %19 = vector.extract_strided_slice %1 {offsets = [0, 0, 0], sizes = [8, 4, 1], strides = [1, 1, 1]} : vector<8x4x8xf32> to vector<8x4x1xf32>
    %20 = vector.shape_cast %19 : vector<8x4x1xf32> to vector<8x4xf32>
    %21 = arith.subf %15, %20 : vector<8x4xf32>
    %cst_5 = arith.constant dense<0.000000e+00> : vector<8x4xf32>
    %22 = vector.multi_reduction <add>, %7, %cst_5 [2] : vector<8x4x8xf32> to vector<8x4xf32>
    %23 = vector.extract_strided_slice %7 {offsets = [0, 0, 7], sizes = [8, 4, 1], strides = [1, 1, 1]} : vector<8x4x8xf32> to vector<8x4x1xf32>
    %24 = vector.shape_cast %23 : vector<8x4x1xf32> to vector<8x4xf32>
    %25 = arith.subf %22, %24 : vector<8x4xf32>
    %26 = vector.extract_strided_slice %7 {offsets = [0, 0, 0], sizes = [8, 4, 1], strides = [1, 1, 1]} : vector<8x4x8xf32> to vector<8x4x1xf32>
    %27 = vector.shape_cast %26 : vector<8x4x1xf32> to vector<8x4xf32>
    %28 = arith.subf %22, %27 : vector<8x4xf32>
    %cst_6 = arith.constant dense<0.000000e+00> : vector<8xf32>
    %29 = vector.multi_reduction <add>, %8, %cst_6 [1] : vector<8x4xf32> to vector<8xf32>
    %30 = vector.shape_cast %29 : vector<8xf32> to vector<8x1xf32>
    %31 = vector.extract_strided_slice %8 {offsets = [0, 3], sizes = [8, 1], strides = [1, 1]} : vector<8x4xf32> to vector<8x1xf32>
    %32 = arith.subf %30, %31 : vector<8x1xf32>
    %33 = vector.extract_strided_slice %8 {offsets = [0, 2], sizes = [8, 1], strides = [1, 1]} : vector<8x4xf32> to vector<8x1xf32>
    %34 = arith.subf %32, %33 : vector<8x1xf32>
    %35 = vector.extract_strided_slice %8 {offsets = [0, 0], sizes = [8, 1], strides = [1, 1]} : vector<8x4xf32> to vector<8x1xf32>
    %36 = arith.subf %30, %35 : vector<8x1xf32>
    %37 = vector.extract_strided_slice %8 {offsets = [0, 1], sizes = [8, 1], strides = [1, 1]} : vector<8x4xf32> to vector<8x1xf32>
    %38 = arith.subf %36, %37 : vector<8x1xf32>
    %cst_7 = arith.constant dense<0.000000e+00> : vector<8xf32>
    %39 = vector.multi_reduction <add>, %11, %cst_7 [1] : vector<8x4xf32> to vector<8xf32>
    %40 = vector.shape_cast %39 : vector<8xf32> to vector<8x1xf32>
    %41 = vector.extract_strided_slice %11 {offsets = [0, 3], sizes = [8, 1], strides = [1, 1]} : vector<8x4xf32> to vector<8x1xf32>
    %42 = arith.subf %40, %41 : vector<8x1xf32>
    %43 = vector.extract_strided_slice %11 {offsets = [0, 2], sizes = [8, 1], strides = [1, 1]} : vector<8x4xf32> to vector<8x1xf32>
    %44 = arith.subf %42, %43 : vector<8x1xf32>
    %45 = vector.extract_strided_slice %11 {offsets = [0, 0], sizes = [8, 1], strides = [1, 1]} : vector<8x4xf32> to vector<8x1xf32>
    %46 = arith.subf %40, %45 : vector<8x1xf32>
    %47 = vector.extract_strided_slice %11 {offsets = [0, 1], sizes = [8, 1], strides = [1, 1]} : vector<8x4xf32> to vector<8x1xf32>
    %48 = arith.subf %46, %47 : vector<8x1xf32>
    %cst_8 = arith.constant dense<0.000000e+00> : vector<8xf32>
    %49 = vector.multi_reduction <add>, %14, %cst_8 [1] : vector<8x4xf32> to vector<8xf32>
    %50 = vector.shape_cast %49 : vector<8xf32> to vector<8x1xf32>
    %51 = vector.extract_strided_slice %14 {offsets = [0, 3], sizes = [8, 1], strides = [1, 1]} : vector<8x4xf32> to vector<8x1xf32>
    %52 = arith.subf %50, %51 : vector<8x1xf32>
    %53 = vector.extract_strided_slice %14 {offsets = [0, 2], sizes = [8, 1], strides = [1, 1]} : vector<8x4xf32> to vector<8x1xf32>
    %54 = arith.subf %52, %53 : vector<8x1xf32>
    %55 = vector.extract_strided_slice %14 {offsets = [0, 0], sizes = [8, 1], strides = [1, 1]} : vector<8x4xf32> to vector<8x1xf32>
    %56 = arith.subf %50, %55 : vector<8x1xf32>
    %57 = vector.extract_strided_slice %14 {offsets = [0, 1], sizes = [8, 1], strides = [1, 1]} : vector<8x4xf32> to vector<8x1xf32>
    %58 = arith.subf %56, %57 : vector<8x1xf32>
    %cst_9 = arith.constant dense<0.000000e+00> : vector<8xf32>
    %59 = vector.multi_reduction <add>, %15, %cst_9 [1] : vector<8x4xf32> to vector<8xf32>
    %60 = vector.shape_cast %59 : vector<8xf32> to vector<8x1xf32>
    %61 = vector.extract_strided_slice %15 {offsets = [0, 3], sizes = [8, 1], strides = [1, 1]} : vector<8x4xf32> to vector<8x1xf32>
    %62 = arith.subf %60, %61 : vector<8x1xf32>
    %63 = vector.extract_strided_slice %15 {offsets = [0, 2], sizes = [8, 1], strides = [1, 1]} : vector<8x4xf32> to vector<8x1xf32>
    %64 = arith.subf %62, %63 : vector<8x1xf32>
    %65 = vector.extract_strided_slice %15 {offsets = [0, 0], sizes = [8, 1], strides = [1, 1]} : vector<8x4xf32> to vector<8x1xf32>
    %66 = arith.subf %60, %65 : vector<8x1xf32>
    %67 = vector.extract_strided_slice %15 {offsets = [0, 1], sizes = [8, 1], strides = [1, 1]} : vector<8x4xf32> to vector<8x1xf32>
    %68 = arith.subf %66, %67 : vector<8x1xf32>
    %cst_10 = arith.constant dense<0.000000e+00> : vector<8xf32>
    %69 = vector.multi_reduction <add>, %18, %cst_10 [1] : vector<8x4xf32> to vector<8xf32>
    %70 = vector.shape_cast %69 : vector<8xf32> to vector<8x1xf32>
    %71 = vector.extract_strided_slice %18 {offsets = [0, 3], sizes = [8, 1], strides = [1, 1]} : vector<8x4xf32> to vector<8x1xf32>
    %72 = arith.subf %70, %71 : vector<8x1xf32>
    %73 = vector.extract_strided_slice %18 {offsets = [0, 2], sizes = [8, 1], strides = [1, 1]} : vector<8x4xf32> to vector<8x1xf32>
    %74 = arith.subf %72, %73 : vector<8x1xf32>
    %75 = vector.extract_strided_slice %18 {offsets = [0, 0], sizes = [8, 1], strides = [1, 1]} : vector<8x4xf32> to vector<8x1xf32>
    %76 = arith.subf %70, %75 : vector<8x1xf32>
    %77 = vector.extract_strided_slice %18 {offsets = [0, 1], sizes = [8, 1], strides = [1, 1]} : vector<8x4xf32> to vector<8x1xf32>
    %78 = arith.subf %76, %77 : vector<8x1xf32>
    %cst_11 = arith.constant dense<0.000000e+00> : vector<8xf32>
    %79 = vector.multi_reduction <add>, %21, %cst_11 [1] : vector<8x4xf32> to vector<8xf32>
    %80 = vector.shape_cast %79 : vector<8xf32> to vector<8x1xf32>
    %81 = vector.extract_strided_slice %21 {offsets = [0, 3], sizes = [8, 1], strides = [1, 1]} : vector<8x4xf32> to vector<8x1xf32>
    %82 = arith.subf %80, %81 : vector<8x1xf32>
    %83 = vector.extract_strided_slice %21 {offsets = [0, 2], sizes = [8, 1], strides = [1, 1]} : vector<8x4xf32> to vector<8x1xf32>
    %84 = arith.subf %82, %83 : vector<8x1xf32>
    %85 = vector.extract_strided_slice %21 {offsets = [0, 0], sizes = [8, 1], strides = [1, 1]} : vector<8x4xf32> to vector<8x1xf32>
    %86 = arith.subf %80, %85 : vector<8x1xf32>
    %87 = vector.extract_strided_slice %21 {offsets = [0, 1], sizes = [8, 1], strides = [1, 1]} : vector<8x4xf32> to vector<8x1xf32>
    %88 = arith.subf %86, %87 : vector<8x1xf32>
    %cst_12 = arith.constant dense<0.000000e+00> : vector<8xf32>
    %89 = vector.multi_reduction <add>, %22, %cst_12 [1] : vector<8x4xf32> to vector<8xf32>
    %90 = vector.shape_cast %89 : vector<8xf32> to vector<8x1xf32>
    %91 = vector.extract_strided_slice %22 {offsets = [0, 3], sizes = [8, 1], strides = [1, 1]} : vector<8x4xf32> to vector<8x1xf32>
    %92 = arith.subf %90, %91 : vector<8x1xf32>
    %93 = vector.extract_strided_slice %22 {offsets = [0, 2], sizes = [8, 1], strides = [1, 1]} : vector<8x4xf32> to vector<8x1xf32>
    %94 = arith.subf %92, %93 : vector<8x1xf32>
    %95 = vector.extract_strided_slice %22 {offsets = [0, 0], sizes = [8, 1], strides = [1, 1]} : vector<8x4xf32> to vector<8x1xf32>
    %96 = arith.subf %90, %95 : vector<8x1xf32>
    %97 = vector.extract_strided_slice %22 {offsets = [0, 1], sizes = [8, 1], strides = [1, 1]} : vector<8x4xf32> to vector<8x1xf32>
    %98 = arith.subf %96, %97 : vector<8x1xf32>
    %cst_13 = arith.constant dense<0.000000e+00> : vector<8xf32>
    %99 = vector.multi_reduction <add>, %25, %cst_13 [1] : vector<8x4xf32> to vector<8xf32>
    %100 = vector.shape_cast %99 : vector<8xf32> to vector<8x1xf32>
    %101 = vector.extract_strided_slice %25 {offsets = [0, 3], sizes = [8, 1], strides = [1, 1]} : vector<8x4xf32> to vector<8x1xf32>
    %102 = arith.subf %100, %101 : vector<8x1xf32>
    %103 = vector.extract_strided_slice %25 {offsets = [0, 2], sizes = [8, 1], strides = [1, 1]} : vector<8x4xf32> to vector<8x1xf32>
    %104 = arith.subf %102, %103 : vector<8x1xf32>
    %105 = vector.extract_strided_slice %25 {offsets = [0, 0], sizes = [8, 1], strides = [1, 1]} : vector<8x4xf32> to vector<8x1xf32>
    %106 = arith.subf %100, %105 : vector<8x1xf32>
    %107 = vector.extract_strided_slice %25 {offsets = [0, 1], sizes = [8, 1], strides = [1, 1]} : vector<8x4xf32> to vector<8x1xf32>
    %108 = arith.subf %106, %107 : vector<8x1xf32>
    %cst_14 = arith.constant dense<0.000000e+00> : vector<8xf32>
    %109 = vector.multi_reduction <add>, %28, %cst_14 [1] : vector<8x4xf32> to vector<8xf32>
    %110 = vector.shape_cast %109 : vector<8xf32> to vector<8x1xf32>
    %111 = vector.extract_strided_slice %28 {offsets = [0, 3], sizes = [8, 1], strides = [1, 1]} : vector<8x4xf32> to vector<8x1xf32>
    %112 = arith.subf %110, %111 : vector<8x1xf32>
    %113 = vector.extract_strided_slice %28 {offsets = [0, 2], sizes = [8, 1], strides = [1, 1]} : vector<8x4xf32> to vector<8x1xf32>
    %114 = arith.subf %112, %113 : vector<8x1xf32>
    %115 = vector.extract_strided_slice %28 {offsets = [0, 0], sizes = [8, 1], strides = [1, 1]} : vector<8x4xf32> to vector<8x1xf32>
    %116 = arith.subf %110, %115 : vector<8x1xf32>
    %117 = vector.extract_strided_slice %28 {offsets = [0, 1], sizes = [8, 1], strides = [1, 1]} : vector<8x4xf32> to vector<8x1xf32>
    %118 = arith.subf %116, %117 : vector<8x1xf32>
    %cst_15 = arith.constant 0.000000e+00 : f32
    %119 = vector.broadcast %cst_15 : f32 to vector<8x4xf32>
    %c0_16 = arith.constant 0 : index
    %c0_17 = arith.constant 0 : index
    %120 = vector.load %arg3[%c0_16, %c0_17] : memref<1x4xf32, #tpu.memory_space<vmem>>, vector<1x4xf32>
    %121 = vector.broadcast %120 : vector<1x4xf32> to vector<8x4xf32>
    %122 = arith.addf %119, %121 : vector<8x4xf32>
    %c0_18 = arith.constant 0 : index
    %c0_19 = arith.constant 0 : index
    %123 = vector.load %arg2[%c0_18, %c0_19] : memref<45x4xf32, #tpu.memory_space<vmem>>, vector<1x4xf32>
    %124 = vector.broadcast %44 : vector<8x1xf32> to vector<8x4xf32>
    %125 = vector.broadcast %123 : vector<1x4xf32> to vector<8x4xf32>
    %126 = arith.mulf %124, %125 : vector<8x4xf32>
    %127 = arith.addf %122, %126 : vector<8x4xf32>
    %c1 = arith.constant 1 : index
    %c0_20 = arith.constant 0 : index
    %128 = vector.load %arg2[%c1, %c0_20] : memref<45x4xf32, #tpu.memory_space<vmem>>, vector<1x4xf32>
    %129 = vector.broadcast %74 : vector<8x1xf32> to vector<8x4xf32>
    %130 = vector.broadcast %128 : vector<1x4xf32> to vector<8x4xf32>
    %131 = arith.mulf %129, %130 : vector<8x4xf32>
    %132 = arith.addf %127, %131 : vector<8x4xf32>
    %c2 = arith.constant 2 : index
    %c0_21 = arith.constant 0 : index
    %133 = vector.load %arg2[%c2, %c0_21] : memref<45x4xf32, #tpu.memory_space<vmem>>, vector<1x4xf32>
    %134 = vector.broadcast %104 : vector<8x1xf32> to vector<8x4xf32>
    %135 = vector.broadcast %133 : vector<1x4xf32> to vector<8x4xf32>
    %136 = arith.mulf %134, %135 : vector<8x4xf32>
    %137 = arith.addf %132, %136 : vector<8x4xf32>
    %c3 = arith.constant 3 : index
    %c0_22 = arith.constant 0 : index
    %138 = vector.load %arg2[%c3, %c0_22] : memref<45x4xf32, #tpu.memory_space<vmem>>, vector<1x4xf32>
    %139 = vector.broadcast %34 : vector<8x1xf32> to vector<8x4xf32>
    %140 = vector.broadcast %138 : vector<1x4xf32> to vector<8x4xf32>
    %141 = arith.mulf %139, %140 : vector<8x4xf32>
    %142 = arith.addf %137, %141 : vector<8x4xf32>
    %c4 = arith.constant 4 : index
    %c0_23 = arith.constant 0 : index
    %143 = vector.load %arg2[%c4, %c0_23] : memref<45x4xf32, #tpu.memory_space<vmem>>, vector<1x4xf32>
    %144 = vector.broadcast %64 : vector<8x1xf32> to vector<8x4xf32>
    %145 = vector.broadcast %143 : vector<1x4xf32> to vector<8x4xf32>
    %146 = arith.mulf %144, %145 : vector<8x4xf32>
    %147 = arith.addf %142, %146 : vector<8x4xf32>
    %c5 = arith.constant 5 : index
    %c0_24 = arith.constant 0 : index
    %148 = vector.load %arg2[%c5, %c0_24] : memref<45x4xf32, #tpu.memory_space<vmem>>, vector<1x4xf32>
    %149 = vector.broadcast %94 : vector<8x1xf32> to vector<8x4xf32>
    %150 = vector.broadcast %148 : vector<1x4xf32> to vector<8x4xf32>
    %151 = arith.mulf %149, %150 : vector<8x4xf32>
    %152 = arith.addf %147, %151 : vector<8x4xf32>
    %c6 = arith.constant 6 : index
    %c0_25 = arith.constant 0 : index
    %153 = vector.load %arg2[%c6, %c0_25] : memref<45x4xf32, #tpu.memory_space<vmem>>, vector<1x4xf32>
    %154 = vector.broadcast %54 : vector<8x1xf32> to vector<8x4xf32>
    %155 = vector.broadcast %153 : vector<1x4xf32> to vector<8x4xf32>
    %156 = arith.mulf %154, %155 : vector<8x4xf32>
    %157 = arith.addf %152, %156 : vector<8x4xf32>
    %c7 = arith.constant 7 : index
    %c0_26 = arith.constant 0 : index
    %158 = vector.load %arg2[%c7, %c0_26] : memref<45x4xf32, #tpu.memory_space<vmem>>, vector<1x4xf32>
    %159 = vector.broadcast %84 : vector<8x1xf32> to vector<8x4xf32>
    %160 = vector.broadcast %158 : vector<1x4xf32> to vector<8x4xf32>
    %161 = arith.mulf %159, %160 : vector<8x4xf32>
    %162 = arith.addf %157, %161 : vector<8x4xf32>
    %c8 = arith.constant 8 : index
    %c0_27 = arith.constant 0 : index
    %163 = vector.load %arg2[%c8, %c0_27] : memref<45x4xf32, #tpu.memory_space<vmem>>, vector<1x4xf32>
    %164 = vector.broadcast %114 : vector<8x1xf32> to vector<8x4xf32>
    %165 = vector.broadcast %163 : vector<1x4xf32> to vector<8x4xf32>
    %166 = arith.mulf %164, %165 : vector<8x4xf32>
    %167 = arith.addf %162, %166 : vector<8x4xf32>
    %c9 = arith.constant 9 : index
    %c0_28 = arith.constant 0 : index
    %168 = vector.load %arg2[%c9, %c0_28] : memref<45x4xf32, #tpu.memory_space<vmem>>, vector<1x4xf32>
    %169 = vector.broadcast %42 : vector<8x1xf32> to vector<8x4xf32>
    %170 = vector.broadcast %168 : vector<1x4xf32> to vector<8x4xf32>
    %171 = arith.mulf %169, %170 : vector<8x4xf32>
    %172 = arith.addf %167, %171 : vector<8x4xf32>
    %c10 = arith.constant 10 : index
    %c0_29 = arith.constant 0 : index
    %173 = vector.load %arg2[%c10, %c0_29] : memref<45x4xf32, #tpu.memory_space<vmem>>, vector<1x4xf32>
    %174 = vector.broadcast %72 : vector<8x1xf32> to vector<8x4xf32>
    %175 = vector.broadcast %173 : vector<1x4xf32> to vector<8x4xf32>
    %176 = arith.mulf %174, %175 : vector<8x4xf32>
    %177 = arith.addf %172, %176 : vector<8x4xf32>
    %c11 = arith.constant 11 : index
    %c0_30 = arith.constant 0 : index
    %178 = vector.load %arg2[%c11, %c0_30] : memref<45x4xf32, #tpu.memory_space<vmem>>, vector<1x4xf32>
    %179 = vector.broadcast %102 : vector<8x1xf32> to vector<8x4xf32>
    %180 = vector.broadcast %178 : vector<1x4xf32> to vector<8x4xf32>
    %181 = arith.mulf %179, %180 : vector<8x4xf32>
    %182 = arith.addf %177, %181 : vector<8x4xf32>
    %c12 = arith.constant 12 : index
    %c0_31 = arith.constant 0 : index
    %183 = vector.load %arg2[%c12, %c0_31] : memref<45x4xf32, #tpu.memory_space<vmem>>, vector<1x4xf32>
    %184 = vector.broadcast %32 : vector<8x1xf32> to vector<8x4xf32>
    %185 = vector.broadcast %183 : vector<1x4xf32> to vector<8x4xf32>
    %186 = arith.mulf %184, %185 : vector<8x4xf32>
    %187 = arith.addf %182, %186 : vector<8x4xf32>
    %c13 = arith.constant 13 : index
    %c0_32 = arith.constant 0 : index
    %188 = vector.load %arg2[%c13, %c0_32] : memref<45x4xf32, #tpu.memory_space<vmem>>, vector<1x4xf32>
    %189 = vector.broadcast %62 : vector<8x1xf32> to vector<8x4xf32>
    %190 = vector.broadcast %188 : vector<1x4xf32> to vector<8x4xf32>
    %191 = arith.mulf %189, %190 : vector<8x4xf32>
    %192 = arith.addf %187, %191 : vector<8x4xf32>
    %c14 = arith.constant 14 : index
    %c0_33 = arith.constant 0 : index
    %193 = vector.load %arg2[%c14, %c0_33] : memref<45x4xf32, #tpu.memory_space<vmem>>, vector<1x4xf32>
    %194 = vector.broadcast %92 : vector<8x1xf32> to vector<8x4xf32>
    %195 = vector.broadcast %193 : vector<1x4xf32> to vector<8x4xf32>
    %196 = arith.mulf %194, %195 : vector<8x4xf32>
    %197 = arith.addf %192, %196 : vector<8x4xf32>
    %c15 = arith.constant 15 : index
    %c0_34 = arith.constant 0 : index
    %198 = vector.load %arg2[%c15, %c0_34] : memref<45x4xf32, #tpu.memory_space<vmem>>, vector<1x4xf32>
    %199 = vector.broadcast %52 : vector<8x1xf32> to vector<8x4xf32>
    %200 = vector.broadcast %198 : vector<1x4xf32> to vector<8x4xf32>
    %201 = arith.mulf %199, %200 : vector<8x4xf32>
    %202 = arith.addf %197, %201 : vector<8x4xf32>
    %c16 = arith.constant 16 : index
    %c0_35 = arith.constant 0 : index
    %203 = vector.load %arg2[%c16, %c0_35] : memref<45x4xf32, #tpu.memory_space<vmem>>, vector<1x4xf32>
    %204 = vector.broadcast %82 : vector<8x1xf32> to vector<8x4xf32>
    %205 = vector.broadcast %203 : vector<1x4xf32> to vector<8x4xf32>
    %206 = arith.mulf %204, %205 : vector<8x4xf32>
    %207 = arith.addf %202, %206 : vector<8x4xf32>
    %c17 = arith.constant 17 : index
    %c0_36 = arith.constant 0 : index
    %208 = vector.load %arg2[%c17, %c0_36] : memref<45x4xf32, #tpu.memory_space<vmem>>, vector<1x4xf32>
    %209 = vector.broadcast %112 : vector<8x1xf32> to vector<8x4xf32>
    %210 = vector.broadcast %208 : vector<1x4xf32> to vector<8x4xf32>
    %211 = arith.mulf %209, %210 : vector<8x4xf32>
    %212 = arith.addf %207, %211 : vector<8x4xf32>
    %c18 = arith.constant 18 : index
    %c0_37 = arith.constant 0 : index
    %213 = vector.load %arg2[%c18, %c0_37] : memref<45x4xf32, #tpu.memory_space<vmem>>, vector<1x4xf32>
    %214 = vector.broadcast %40 : vector<8x1xf32> to vector<8x4xf32>
    %215 = vector.broadcast %213 : vector<1x4xf32> to vector<8x4xf32>
    %216 = arith.mulf %214, %215 : vector<8x4xf32>
    %217 = arith.addf %212, %216 : vector<8x4xf32>
    %c19 = arith.constant 19 : index
    %c0_38 = arith.constant 0 : index
    %218 = vector.load %arg2[%c19, %c0_38] : memref<45x4xf32, #tpu.memory_space<vmem>>, vector<1x4xf32>
    %219 = vector.broadcast %70 : vector<8x1xf32> to vector<8x4xf32>
    %220 = vector.broadcast %218 : vector<1x4xf32> to vector<8x4xf32>
    %221 = arith.mulf %219, %220 : vector<8x4xf32>
    %222 = arith.addf %217, %221 : vector<8x4xf32>
    %c20 = arith.constant 20 : index
    %c0_39 = arith.constant 0 : index
    %223 = vector.load %arg2[%c20, %c0_39] : memref<45x4xf32, #tpu.memory_space<vmem>>, vector<1x4xf32>
    %224 = vector.broadcast %100 : vector<8x1xf32> to vector<8x4xf32>
    %225 = vector.broadcast %223 : vector<1x4xf32> to vector<8x4xf32>
    %226 = arith.mulf %224, %225 : vector<8x4xf32>
    %227 = arith.addf %222, %226 : vector<8x4xf32>
    %c21 = arith.constant 21 : index
    %c0_40 = arith.constant 0 : index
    %228 = vector.load %arg2[%c21, %c0_40] : memref<45x4xf32, #tpu.memory_space<vmem>>, vector<1x4xf32>
    %229 = vector.broadcast %30 : vector<8x1xf32> to vector<8x4xf32>
    %230 = vector.broadcast %228 : vector<1x4xf32> to vector<8x4xf32>
    %231 = arith.mulf %229, %230 : vector<8x4xf32>
    %232 = arith.addf %227, %231 : vector<8x4xf32>
    %c22 = arith.constant 22 : index
    %c0_41 = arith.constant 0 : index
    %233 = vector.load %arg2[%c22, %c0_41] : memref<45x4xf32, #tpu.memory_space<vmem>>, vector<1x4xf32>
    %234 = vector.broadcast %60 : vector<8x1xf32> to vector<8x4xf32>
    %235 = vector.broadcast %233 : vector<1x4xf32> to vector<8x4xf32>
    %236 = arith.mulf %234, %235 : vector<8x4xf32>
    %237 = arith.addf %232, %236 : vector<8x4xf32>
    %c23 = arith.constant 23 : index
    %c0_42 = arith.constant 0 : index
    %238 = vector.load %arg2[%c23, %c0_42] : memref<45x4xf32, #tpu.memory_space<vmem>>, vector<1x4xf32>
    %239 = vector.broadcast %90 : vector<8x1xf32> to vector<8x4xf32>
    %240 = vector.broadcast %238 : vector<1x4xf32> to vector<8x4xf32>
    %241 = arith.mulf %239, %240 : vector<8x4xf32>
    %242 = arith.addf %237, %241 : vector<8x4xf32>
    %c24 = arith.constant 24 : index
    %c0_43 = arith.constant 0 : index
    %243 = vector.load %arg2[%c24, %c0_43] : memref<45x4xf32, #tpu.memory_space<vmem>>, vector<1x4xf32>
    %244 = vector.broadcast %50 : vector<8x1xf32> to vector<8x4xf32>
    %245 = vector.broadcast %243 : vector<1x4xf32> to vector<8x4xf32>
    %246 = arith.mulf %244, %245 : vector<8x4xf32>
    %247 = arith.addf %242, %246 : vector<8x4xf32>
    %c25 = arith.constant 25 : index
    %c0_44 = arith.constant 0 : index
    %248 = vector.load %arg2[%c25, %c0_44] : memref<45x4xf32, #tpu.memory_space<vmem>>, vector<1x4xf32>
    %249 = vector.broadcast %80 : vector<8x1xf32> to vector<8x4xf32>
    %250 = vector.broadcast %248 : vector<1x4xf32> to vector<8x4xf32>
    %251 = arith.mulf %249, %250 : vector<8x4xf32>
    %252 = arith.addf %247, %251 : vector<8x4xf32>
    %c26 = arith.constant 26 : index
    %c0_45 = arith.constant 0 : index
    %253 = vector.load %arg2[%c26, %c0_45] : memref<45x4xf32, #tpu.memory_space<vmem>>, vector<1x4xf32>
    %254 = vector.broadcast %110 : vector<8x1xf32> to vector<8x4xf32>
    %255 = vector.broadcast %253 : vector<1x4xf32> to vector<8x4xf32>
    %256 = arith.mulf %254, %255 : vector<8x4xf32>
    %257 = arith.addf %252, %256 : vector<8x4xf32>
    %c27 = arith.constant 27 : index
    %c0_46 = arith.constant 0 : index
    %258 = vector.load %arg2[%c27, %c0_46] : memref<45x4xf32, #tpu.memory_space<vmem>>, vector<1x4xf32>
    %259 = vector.broadcast %46 : vector<8x1xf32> to vector<8x4xf32>
    %260 = vector.broadcast %258 : vector<1x4xf32> to vector<8x4xf32>
    %261 = arith.mulf %259, %260 : vector<8x4xf32>
    %262 = arith.addf %257, %261 : vector<8x4xf32>
    %c28 = arith.constant 28 : index
    %c0_47 = arith.constant 0 : index
    %263 = vector.load %arg2[%c28, %c0_47] : memref<45x4xf32, #tpu.memory_space<vmem>>, vector<1x4xf32>
    %264 = vector.broadcast %76 : vector<8x1xf32> to vector<8x4xf32>
    %265 = vector.broadcast %263 : vector<1x4xf32> to vector<8x4xf32>
    %266 = arith.mulf %264, %265 : vector<8x4xf32>
    %267 = arith.addf %262, %266 : vector<8x4xf32>
    %c29 = arith.constant 29 : index
    %c0_48 = arith.constant 0 : index
    %268 = vector.load %arg2[%c29, %c0_48] : memref<45x4xf32, #tpu.memory_space<vmem>>, vector<1x4xf32>
    %269 = vector.broadcast %106 : vector<8x1xf32> to vector<8x4xf32>
    %270 = vector.broadcast %268 : vector<1x4xf32> to vector<8x4xf32>
    %271 = arith.mulf %269, %270 : vector<8x4xf32>
    %272 = arith.addf %267, %271 : vector<8x4xf32>
    %c30 = arith.constant 30 : index
    %c0_49 = arith.constant 0 : index
    %273 = vector.load %arg2[%c30, %c0_49] : memref<45x4xf32, #tpu.memory_space<vmem>>, vector<1x4xf32>
    %274 = vector.broadcast %36 : vector<8x1xf32> to vector<8x4xf32>
    %275 = vector.broadcast %273 : vector<1x4xf32> to vector<8x4xf32>
    %276 = arith.mulf %274, %275 : vector<8x4xf32>
    %277 = arith.addf %272, %276 : vector<8x4xf32>
    %c31 = arith.constant 31 : index
    %c0_50 = arith.constant 0 : index
    %278 = vector.load %arg2[%c31, %c0_50] : memref<45x4xf32, #tpu.memory_space<vmem>>, vector<1x4xf32>
    %279 = vector.broadcast %66 : vector<8x1xf32> to vector<8x4xf32>
    %280 = vector.broadcast %278 : vector<1x4xf32> to vector<8x4xf32>
    %281 = arith.mulf %279, %280 : vector<8x4xf32>
    %282 = arith.addf %277, %281 : vector<8x4xf32>
    %c32 = arith.constant 32 : index
    %c0_51 = arith.constant 0 : index
    %283 = vector.load %arg2[%c32, %c0_51] : memref<45x4xf32, #tpu.memory_space<vmem>>, vector<1x4xf32>
    %284 = vector.broadcast %96 : vector<8x1xf32> to vector<8x4xf32>
    %285 = vector.broadcast %283 : vector<1x4xf32> to vector<8x4xf32>
    %286 = arith.mulf %284, %285 : vector<8x4xf32>
    %287 = arith.addf %282, %286 : vector<8x4xf32>
    %c33 = arith.constant 33 : index
    %c0_52 = arith.constant 0 : index
    %288 = vector.load %arg2[%c33, %c0_52] : memref<45x4xf32, #tpu.memory_space<vmem>>, vector<1x4xf32>
    %289 = vector.broadcast %56 : vector<8x1xf32> to vector<8x4xf32>
    %290 = vector.broadcast %288 : vector<1x4xf32> to vector<8x4xf32>
    %291 = arith.mulf %289, %290 : vector<8x4xf32>
    %292 = arith.addf %287, %291 : vector<8x4xf32>
    %c34 = arith.constant 34 : index
    %c0_53 = arith.constant 0 : index
    %293 = vector.load %arg2[%c34, %c0_53] : memref<45x4xf32, #tpu.memory_space<vmem>>, vector<1x4xf32>
    %294 = vector.broadcast %86 : vector<8x1xf32> to vector<8x4xf32>
    %295 = vector.broadcast %293 : vector<1x4xf32> to vector<8x4xf32>
    %296 = arith.mulf %294, %295 : vector<8x4xf32>
    %297 = arith.addf %292, %296 : vector<8x4xf32>
    %c35 = arith.constant 35 : index
    %c0_54 = arith.constant 0 : index
    %298 = vector.load %arg2[%c35, %c0_54] : memref<45x4xf32, #tpu.memory_space<vmem>>, vector<1x4xf32>
    %299 = vector.broadcast %116 : vector<8x1xf32> to vector<8x4xf32>
    %300 = vector.broadcast %298 : vector<1x4xf32> to vector<8x4xf32>
    %301 = arith.mulf %299, %300 : vector<8x4xf32>
    %302 = arith.addf %297, %301 : vector<8x4xf32>
    %c36 = arith.constant 36 : index
    %c0_55 = arith.constant 0 : index
    %303 = vector.load %arg2[%c36, %c0_55] : memref<45x4xf32, #tpu.memory_space<vmem>>, vector<1x4xf32>
    %304 = vector.broadcast %48 : vector<8x1xf32> to vector<8x4xf32>
    %305 = vector.broadcast %303 : vector<1x4xf32> to vector<8x4xf32>
    %306 = arith.mulf %304, %305 : vector<8x4xf32>
    %307 = arith.addf %302, %306 : vector<8x4xf32>
    %c37 = arith.constant 37 : index
    %c0_56 = arith.constant 0 : index
    %308 = vector.load %arg2[%c37, %c0_56] : memref<45x4xf32, #tpu.memory_space<vmem>>, vector<1x4xf32>
    %309 = vector.broadcast %78 : vector<8x1xf32> to vector<8x4xf32>
    %310 = vector.broadcast %308 : vector<1x4xf32> to vector<8x4xf32>
    %311 = arith.mulf %309, %310 : vector<8x4xf32>
    %312 = arith.addf %307, %311 : vector<8x4xf32>
    %c38 = arith.constant 38 : index
    %c0_57 = arith.constant 0 : index
    %313 = vector.load %arg2[%c38, %c0_57] : memref<45x4xf32, #tpu.memory_space<vmem>>, vector<1x4xf32>
    %314 = vector.broadcast %108 : vector<8x1xf32> to vector<8x4xf32>
    %315 = vector.broadcast %313 : vector<1x4xf32> to vector<8x4xf32>
    %316 = arith.mulf %314, %315 : vector<8x4xf32>
    %317 = arith.addf %312, %316 : vector<8x4xf32>
    %c39 = arith.constant 39 : index
    %c0_58 = arith.constant 0 : index
    %318 = vector.load %arg2[%c39, %c0_58] : memref<45x4xf32, #tpu.memory_space<vmem>>, vector<1x4xf32>
    %319 = vector.broadcast %38 : vector<8x1xf32> to vector<8x4xf32>
    %320 = vector.broadcast %318 : vector<1x4xf32> to vector<8x4xf32>
    %321 = arith.mulf %319, %320 : vector<8x4xf32>
    %322 = arith.addf %317, %321 : vector<8x4xf32>
    %c40 = arith.constant 40 : index
    %c0_59 = arith.constant 0 : index
    %323 = vector.load %arg2[%c40, %c0_59] : memref<45x4xf32, #tpu.memory_space<vmem>>, vector<1x4xf32>
    %324 = vector.broadcast %68 : vector<8x1xf32> to vector<8x4xf32>
    %325 = vector.broadcast %323 : vector<1x4xf32> to vector<8x4xf32>
    %326 = arith.mulf %324, %325 : vector<8x4xf32>
    %327 = arith.addf %322, %326 : vector<8x4xf32>
    %c41 = arith.constant 41 : index
    %c0_60 = arith.constant 0 : index
    %328 = vector.load %arg2[%c41, %c0_60] : memref<45x4xf32, #tpu.memory_space<vmem>>, vector<1x4xf32>
    %329 = vector.broadcast %98 : vector<8x1xf32> to vector<8x4xf32>
    %330 = vector.broadcast %328 : vector<1x4xf32> to vector<8x4xf32>
    %331 = arith.mulf %329, %330 : vector<8x4xf32>
    %332 = arith.addf %327, %331 : vector<8x4xf32>
    %c42 = arith.constant 42 : index
    %c0_61 = arith.constant 0 : index
    %333 = vector.load %arg2[%c42, %c0_61] : memref<45x4xf32, #tpu.memory_space<vmem>>, vector<1x4xf32>
    %334 = vector.broadcast %58 : vector<8x1xf32> to vector<8x4xf32>
    %335 = vector.broadcast %333 : vector<1x4xf32> to vector<8x4xf32>
    %336 = arith.mulf %334, %335 : vector<8x4xf32>
    %337 = arith.addf %332, %336 : vector<8x4xf32>
    %c43 = arith.constant 43 : index
    %c0_62 = arith.constant 0 : index
    %338 = vector.load %arg2[%c43, %c0_62] : memref<45x4xf32, #tpu.memory_space<vmem>>, vector<1x4xf32>
    %339 = vector.broadcast %88 : vector<8x1xf32> to vector<8x4xf32>
    %340 = vector.broadcast %338 : vector<1x4xf32> to vector<8x4xf32>
    %341 = arith.mulf %339, %340 : vector<8x4xf32>
    %342 = arith.addf %337, %341 : vector<8x4xf32>
    %c44 = arith.constant 44 : index
    %c0_63 = arith.constant 0 : index
    %343 = vector.load %arg2[%c44, %c0_63] : memref<45x4xf32, #tpu.memory_space<vmem>>, vector<1x4xf32>
    %344 = vector.broadcast %118 : vector<8x1xf32> to vector<8x4xf32>
    %345 = vector.broadcast %343 : vector<1x4xf32> to vector<8x4xf32>
    %346 = arith.mulf %344, %345 : vector<8x4xf32>
    %347 = arith.addf %342, %346 : vector<8x4xf32>
    %cst_64 = arith.constant dense<0xFF800000> : vector<8xf32>
    %348 = vector.multi_reduction <maximumf>, %347, %cst_64 [1] : vector<8x4xf32> to vector<8xf32>
    %349 = vector.shape_cast %348 : vector<8xf32> to vector<8x1xf32>
    %350 = vector.broadcast %349 : vector<8x1xf32> to vector<8x4xf32>
    %351 = arith.subf %347, %350 : vector<8x4xf32>
    %352 = math.exp %351 : vector<8x4xf32>
    %cst_65 = arith.constant dense<0.000000e+00> : vector<8xf32>
    %353 = vector.multi_reduction <add>, %352, %cst_65 [1] : vector<8x4xf32> to vector<8xf32>
    %354 = vector.shape_cast %353 : vector<8xf32> to vector<8x1xf32>
    %355 = vector.broadcast %354 : vector<8x1xf32> to vector<8x4xf32>
    %356 = arith.divf %352, %355 : vector<8x4xf32>
    %c0_66 = arith.constant 0 : index
    %c0_67 = arith.constant 0 : index
    %357 = vector.load %arg4[%c0_66, %c0_67] : memref<8x4xf32, #tpu.memory_space<vmem>>, vector<8x4xf32>
    tpu.vector_store %arg4[%c0_66, %c0_67], %356 {strides = array<i32>} : memref<8x4xf32, #tpu.memory_space<vmem>>, vector<8x4xf32>,
    return
  }
  func.func @transform_0(%arg0: i32) -> (i32, i32, i32, i32) {
    %c0_i32 = arith.constant 0 : i32
    %c0_i32_0 = arith.constant 0 : i32
    %c0_i32_1 = arith.constant 0 : i32
    %c0_i32_2 = arith.constant 0 : i32
    return %arg0, %c0_i32, %c0_i32_0, %c0_i32_1 : i32, i32, i32, i32
  }
  func.func @transform_1(%arg0: i32) -> (i32, i32) {
    %c0_i32 = arith.constant 0 : i32
    %c0_i32_0 = arith.constant 0 : i32
    %c0_i32_1 = arith.constant 0 : i32
    return %c0_i32, %c0_i32_0 : i32, i32
  }
  func.func @transform_2(%arg0: i32) -> (i32, i32) {
    %c0_i32 = arith.constant 0 : i32
    %c0_i32_0 = arith.constant 0 : i32
    %c0_i32_1 = arith.constant 0 : i32
    return %c0_i32, %c0_i32_0 : i32, i32
  }
  func.func @transform_3(%arg0: i32) -> (i32, i32) {
    %c0_i32 = arith.constant 0 : i32
    %c0_i32_0 = arith.constant 0 : i32
    return %arg0, %c0_i32 : i32, i32
  }
}

</mosaic_0001>

<bundles_post_ra>
// kernel: tpu_custom_call.1
= control target key start
LH: loop header
LB: loop body
LE: loop exit
PB: predicated region body
PF: predicated region fallthrough
CT: control target
= control target key end

     0   :  { %8 = vsyncpa [#allocation3], 0  ;;  %s5754_s0 = inlined_call_operand.hbm [shape: f32[16,4,8,16], index: 0, kind: input, shape index: {}]   ;;  %s5755_s1 = inlined_call_operand.vmem [shape: f32[45,4], index: 1, kind: input, shape index: {}]   ;;  %s5756_s2 = inlined_call_operand.vmem [shape: f32[1,4], index: 2, kind: input, shape index: {}]   ;;  %s5757_s3 = inlined_call_operand.vmem [shape: f32[16,4], index: 3, kind: output, shape index: {}]  }
   0x1   :  { %10 = vsyncpa [#allocation3 + $0x1], 0  ;;  %s3470_s12 = smov 0   ;;  %s3472_s13 = smov 0  }
   0x2   :  { %s3474_s14 = smov 0   ;;  %s3476_s15 = smov 0  }
   0x3 LB: > { %s3489_s16 = sadd.s32 4294967295, %s3442_s15   ;;  %s3492_s17 = sadd.s32 1, %s3442_s15   ;;  %s3442_s15 = sphi %s3476_s15, %s6186_s15   ;;  %s3438_s14 = sphi %s3474_s14, %s6185_s14   ;;  %s3434_s13 = sphi %s3472_s13, %s6184_s13   ;;  %s3430_s12 = sphi %s3470_s12, %s6183_s12  }
   0x4   : > { %s20_s18 = ssub.s32 %s3442_s15, %s3492_s17  ;;  %s23_s19 = sadd.s32 1, %s3438_s14 }
   0x5   : > { %p21_p0 = scmp.eq.s32.totalorder %s20_s18, 0  ;;  %p30_p1 = scmp.ne.s32.totalorder %s3438_s14, %s3434_s13 }
   0x6   : > { %p31_p2 = scmp.eq.s32.totalorder %s3442_s15, 0  ;;  %p36_p3 = scmp.ne.s32.totalorder %s3434_s13, %s3430_s12 }
   0x7   : > { %s3502_s20 = scalar_select %p21_p0, %s3438_s14, %s23_s19  }
   0x8   : > { %p32_p4 = por %p31_p2, %p30_p1  ;;  %p37_p5 = scmp.eq.s32.totalorder %s3489_s16, 0 }
   0x9   : > { %p3332_p6 = scmp.lt.s32.totalorder %s3442_s15, 2  ;;  %s134_s22 = sand.u32 1, %s3438_s14  }
   0xa   : > { %p3506_p7 = por %p37_p5, %p36_p3  ;;  %s3269_s23 = sshll.u32 %s134_s22, 8 }
   0xb   : > { %s3325_s24 = sshll.u32 %s3442_s15, 12  ;;  %s138_s28 = scalar_lea.vmem [#allocation2], %s3269_s23 }
   0xc   : > { %s3515_s27 = scalar_lea.hbm %s5754_s0, %s3325_s24  ;;  %s146_s29 = sshll.u32 %s138_s28, 4  ;;  %s3517_s29 = int_to_ptr.vmem [resolvable:$true] %s146_s29 }
   0xd   : > { %p3519_p8 = pnand %p3332_p6, %p32_p4  ;;  %s3524_s4 = scalar_lea.sflag [#allocation3], %s134_s22 }
   0xe   : > { %s3378_s5 = scalar_lea.hbm %s3515_s27, 4096  ;;  %s3383_s8 = scalar_lea.hbm %s5754_s0, 8192 }
   0xf   : > { %p3379_p10 = scmp.ne.s32.totalorder %s3515_s27, %s3378_s5  ;;  %p3380_p11 = pneg %p3519_p8 }
  0x10   : > { %p3384_p0 = scmp.lt.u32.totalorder %s3515_s27, %s5754_s0  ;;  %p3385_p1 = scmp.lt.u32.totalorder %s3383_s8, %s3378_s5 }
  0x11   : > { %p3381_p12 = pnand %p3380_p11, %p3379_p10  ;;  %p3387_p3 = scmp.lt.u32.totalorder %s3378_s5, %s3515_s27 }
  0x12   : > { %p3386_p2 = por %p3385_p1, %p3384_p0 }
  0x13   : > { %p3382_p13 = pneg %p3381_p12 }
  0x14   : > { %p3388_p4 = por %p3387_p3, %p3386_p2 }
  0x16   : > { %p3389_p5 = pnand %p3388_p4, %p3382_p13 }
  0x18   : > { %3392 = shalt.err (!%p3389_p5)
}
  0x19   : > { %s3393_s11 = scalar_lea.vmem %s3517_s29, 4096  ;;  %s3444_s12 = smov [#allocation2]  }
  0x1a   : > { %p3394_p6 = scmp.ne.s32.totalorder %s3517_s29, %s3393_s11  ;;  %s3398_s18 = sshll.u32 %s3444_s12, 4  ;;  %s3399_s18 = int_to_ptr.vmem [resolvable:$false] %s3398_s18 }
  0x1b   : > { %s3400_s19 = scalar_lea.vmem %s3399_s18, 8192  ;;  %p3401_p9 = scmp.lt.s32.totalorder %s3517_s29, %s3399_s18 }
  0x1c   : > { %p3396_p10 = pnand %p3394_p6, %p3380_p11  ;;  %p3402_p0 = scmp.lt.s32.totalorder %s3400_s19, %s3393_s11 }
  0x1e   : > { %p3397_p12 = pneg %p3396_p10  ;;  %p3403_p1 = por %p3402_p0, %p3401_p9 }
  0x20   : > { %p3404_p2 = pnand %p3403_p1, %p3397_p12 }
  0x22   : > { %3407 = shalt.err (!%p3404_p2)
}
  0x23   : > { %s3445_s22 = smov 128   ;;  %s3446_s23 = smov 8  }
  0x24   : > { %3331 = dma.hbm_to_vmem [thread:$0]  (!%p3519_p8), %s3515_s27, 4096, %s3517_s29, %s3524_s4, %s3445_s22, %s3445_s22, %s3446_s23  }
  0x25   : > { %p154_p11 = scmp.lt.s32.totalorder %s3442_s15, 3  ;;  %p5935_p13 = scmp.ge.s32.totalorder %s3442_s15, 1 }
  0x27   : > { %p155_p3 = pnand %p5935_p13, %p154_p11 }
  0x29   : > { %158 = sbr.rel (%p155_p3) target bundleno = 1616 (0x650), region = 32 }
  0x30   : > { %s160_s24 = sand.u32 1, %s3434_s13  }
  0x31   : > { %s3274_s25 = sshll.u32 %s160_s24, 8  ;;  %s161_s26 = scalar_lea.sflag [#allocation3], %s160_s24 }
  0x32   : > { %s3556_s28 = scalar_lea.vmem [#allocation2], %s3274_s25 }
  0x33   : > { %3425 = dma.done.wait (%p3506_p7), %s161_s26, 4096  }
  0x34   : > { %3427 = vsyncadd (%p3506_p7), %s161_s26, 4294963200  ;;  %vm223_vm0 = vcmask 130048   ;;  %v3563_v0 = vld [vmem:[%s3556_s28 + $0x10] sm:$0xff]  ;;  %v3566_v1 = vld [vmem:[%s3556_s28] sm:$0xff]  ;;  %v3447_v22 = vmov 15   ;;  %vm610_vm1 = vcmask 1041409  }
  0x35   : > { %v3569_v2 = vld [vmem:[%s3556_s28 + $0x18] sm:$0xff]  ;;  %v230_v3 = vsel %vm223_vm0, %v3563_v0, 0.0  ;;  %v224_v4 = vsel %vm223_vm0, %v3566_v1, 0.0  ;;  %v3576_v5 = vld [vmem:[%s3556_s28 + $0x8] sm:$0xff]  ;;  %v3586_v9 = vld [vmem:[%s3556_s28 + $0x20] sm:$0xff]  ;;  %3370 = vset.pattern.permute.xlu0 %v3447_v22  ;;  %3371 = vset.pattern.permute.xlu1 %v3447_v22  ;;  %vm612_vm2 = vcmask 1042434  }
  0x36   : > { %231 = vadd.xlane.f32.xlu1 %v230_v3  ;;  %225 = vadd.xlane.f32.xlu0 %v224_v4  ;;  %v233_v6 = vsel %vm223_vm0, %v3569_v2, 0.0  ;;  %v227_v7 = vsel %vm223_vm0, %v3576_v5, 0.0  ;;  %v3583_v8 = vld [vmem:[%s3556_s28 + $0x28] sm:$0xff]  ;;  %v236_v11 = vsel %vm223_vm0, %v3586_v9, 0.0  ;;  %v3593_v12 = vld [vmem:[%s3556_s28 + $0x38] sm:$0xff]  ;;  %v3596_v13 = vld [vmem:[%s3556_s28 + $0x30] sm:$0xff] }
  0x37   : > { %v239_v10 = vsel %vm223_vm0, %v3583_v8, 0.0  ;;  %v245_v14 = vsel %vm223_vm0, %v3593_v12, 0.0  ;;  %v242_v15 = vsel %vm223_vm0, %v3596_v13, 0.0  ;;  %v3603_v16 = vld [vmem:[%s3556_s28 + $0x48] sm:$0xff]  ;;  %v3606_v17 = vld [vmem:[%s3556_s28 + $0x40] sm:$0xff]  ;;  %v3613_v20 = vld [vmem:[%s3556_s28 + $0x58] sm:$0xff] }
  0x38   : > { %v251_v18 = vsel %vm223_vm0, %v3603_v16, 0.0  ;;  %v248_v19 = vsel %vm223_vm0, %v3606_v17, 0.0  ;;  %v3616_v21 = vld [vmem:[%s3556_s28 + $0x50] sm:$0xff]  ;;  %v257_v23 = vsel %vm223_vm0, %v3613_v20, 0.0  ;;  %v3623_v25 = vld [vmem:[%s3556_s28 + $0x68] sm:$0xff]  ;;  %v3626_v26 = vld [vmem:[%s3556_s28 + $0x60] sm:$0xff] }
  0x39   : > { %v254_v24 = vsel %vm223_vm0, %v3616_v21, 0.0  ;;  %v263_v27 = vsel %vm223_vm0, %v3623_v25, 0.0  ;;  %v260_v28 = vsel %vm223_vm0, %v3626_v26, 0.0  ;;  %v3633_v29 = vld [vmem:[%s3556_s28 + $0x78] sm:$0xff]  ;;  %v3636_v30 = vld [vmem:[%s3556_s28 + $0x70] sm:$0xff]  ;;  %v3643_v33 = vld [vmem:[%s3556_s28 + $0x88] sm:$0xff] }
  0x3a   : > { %234 = vadd.xlane.f32.xlu1 %v233_v6  ;;  %228 = vadd.xlane.f32.xlu0 %v227_v7  ;;  %v269_v31 = vsel %vm223_vm0, %v3633_v29, 0.0  ;;  %v266_v32 = vsel %vm223_vm0, %v3636_v30, 0.0  ;;  %v3646_v34 = vld [vmem:[%s3556_s28 + $0x80] sm:$0xff]  ;;  %v275_v35 = vsel %vm223_vm0, %v3643_v33, 0.0  ;;  %v3653_v37 = vld [vmem:[%s3556_s28 + $0x98] sm:$0xff]  ;;  %v3656_v38 = vld [vmem:[%s3556_s28 + $0x90] sm:$0xff] }
  0x3b   : > { %v272_v36 = vsel %vm223_vm0, %v3646_v34, 0.0  ;;  %v281_v39 = vsel %vm223_vm0, %v3653_v37, 0.0  ;;  %v278_v40 = vsel %vm223_vm0, %v3656_v38, 0.0  ;;  %v3663_v41 = vld [vmem:[%s3556_s28 + $0xa8] sm:$0xff]  ;;  %v3666_v42 = vld [vmem:[%s3556_s28 + $0xa0] sm:$0xff]  ;;  %v3673_v45 = vld [vmem:[%s3556_s28 + $0xb8] sm:$0xff] }
  0x3c   : > { %v287_v43 = vsel %vm223_vm0, %v3663_v41, 0.0  ;;  %v284_v44 = vsel %vm223_vm0, %v3666_v42, 0.0  ;;  %v3676_v46 = vld [vmem:[%s3556_s28 + $0xb0] sm:$0xff]  ;;  %v293_v47 = vsel %vm223_vm0, %v3673_v45, 0.0  ;;  %v3683_v49 = vld [vmem:[%s3556_s28 + $0xc8] sm:$0xff]  ;;  %v3686_v50 = vld [vmem:[%s3556_s28 + $0xc0] sm:$0xff] }
  0x3d   : > { %v290_v48 = vsel %vm223_vm0, %v3676_v46, 0.0  ;;  %v299_v51 = vsel %vm223_vm0, %v3683_v49, 0.0  ;;  %v296_v52 = vsel %vm223_vm0, %v3686_v50, 0.0  ;;  %v3693_v53 = vld [vmem:[%s3556_s28 + $0xd8] sm:$0xff]  ;;  %v3696_v54 = vld [vmem:[%s3556_s28 + $0xd0] sm:$0xff]  ;;  %v3703_v57 = vld [vmem:[%s3556_s28 + $0xe8] sm:$0xff] }
  0x3e   : > { %240 = vadd.xlane.f32.xlu1 %v239_v10  ;;  %237 = vadd.xlane.f32.xlu0 %v236_v11  ;;  %v305_v55 = vsel %vm223_vm0, %v3693_v53, 0.0  ;;  %v302_v56 = vsel %vm223_vm0, %v3696_v54, 0.0  ;;  %v3706_v58 = vld [vmem:[%s3556_s28 + $0xe0] sm:$0xff]  ;;  %v311_v59 = vsel %vm223_vm0, %v3703_v57, 0.0  ;;  %v3713_v61 = vld [vmem:[%s3556_s28 + $0xf8] sm:$0xff]  ;;  %v3716_v62 = vld [vmem:[%s3556_s28 + $0xf0] sm:$0xff] }
  0x3f   : > { %v308_v60 = vsel %vm223_vm0, %v3706_v58, 0.0  ;;  %v317_v63 = vsel %vm223_vm0, %v3713_v61, 0.0  ;;  %v314_v3 = vsel %vm223_vm0, %v3716_v62, 0.0  ;;  %vm614_vm3 = vcmask 1043459   ;;  %s3448_s15 = smov 113   ;;  %p187_p7 = scmp.lt.s32.totalorder %s3489_s16, 1 }
  0x40   : > { %vm645_vm4 = vcmask 60416   ;;  %vm1545_vm5 = vcmask 1044484   ;;  %vm1549_vm6 = vcmask 1046534   ;;  %vm1547_vm7 = vcmask 1045509  }
  0x41   : > { %vm1551_vm8 = vcmask 1047559   ;;  %vm1554_vm9 = vcmask 31744   ;;  %s6188_s16 = smov (!%p187_p7, %s3489_s16), 1 }
  0x42   : > { %246 = vadd.xlane.f32.xlu1 %v245_v14  ;;  %243 = vadd.xlane.f32.xlu0 %v242_v15  ;;  %s3275_s4 = sshll.u32 %s6188_s16, 3 }
  0x43   : > { %s190_s7 = scalar_lea.vmem %s5757_s3, %s3275_s4 }
  0x46   : > { %252 = vadd.xlane.f32.xlu1 %v251_v18  ;;  %249 = vadd.xlane.f32.xlu0 %v248_v19 }
  0x4a   : > { %258 = vadd.xlane.f32.xlu1 %v257_v23  ;;  %255 = vadd.xlane.f32.xlu0 %v254_v24 }
  0x4e   : > { %264 = vadd.xlane.f32.xlu1 %v263_v27  ;;  %261 = vadd.xlane.f32.xlu0 %v260_v28 }
  0x52   : > { %270 = vadd.xlane.f32.xlu1 %v269_v31  ;;  %267 = vadd.xlane.f32.xlu0 %v266_v32 }
  0x56   : > { %276 = vadd.xlane.f32.xlu1 %v275_v35  ;;  %273 = vadd.xlane.f32.xlu0 %v272_v36 }
  0x5a   : > { %282 = vadd.xlane.f32.xlu1 %v281_v39  ;;  %279 = vadd.xlane.f32.xlu0 %v278_v40 }
  0x5e   : > { %288 = vadd.xlane.f32.xlu1 %v287_v43  ;;  %285 = vadd.xlane.f32.xlu0 %v284_v44 }
  0x62   : > { %294 = vadd.xlane.f32.xlu1 %v293_v47  ;;  %291 = vadd.xlane.f32.xlu0 %v290_v48 }
  0x66   : > { %300 = vadd.xlane.f32.xlu1 %v299_v51  ;;  %297 = vadd.xlane.f32.xlu0 %v296_v52 }
  0x6a   : > { %306 = vadd.xlane.f32.xlu1 %v305_v55  ;;  %303 = vadd.xlane.f32.xlu0 %v302_v56 }
  0x6e   : > { %312 = vadd.xlane.f32.xlu1 %v311_v59  ;;  %309 = vadd.xlane.f32.xlu0 %v308_v60 }
  0x72   : > { %318 = vadd.xlane.f32.xlu1 %v317_v63  ;;  %315 = vadd.xlane.f32.xlu0 %v314_v3 }
  0xc3   : > { %v3722_v4 = vpop.xlane.xlu1 %231  ;;  %v3724_v6 = vpop.xlane.xlu0 %225 }
  0xc4   : > { %v3728_v7 = vsub.f32 %v3724_v6, %v3566_v1  ;;  %v3746_v1 = vsub.f32 %v3722_v4, %v3563_v0 }
  0xc6   : > { %385 = vperm.xlu0 %3370, %v3728_v7  }
  0xc7   : > { %v3731_v10 = vpop.xlane.xlu1 %234  ;;  %v3733_v11 = vpop.xlane.xlu0 %228 }
  0xc8   : > { %5936 = vst [vmem:[#allocation5_spill] sm:$0xff] %v3731_v10  ;;  %v3737_v14 = vsub.f32 %v3733_v11, %v3576_v5  ;;  %v3755_v5 = vsub.f32 %v3731_v10, %v3569_v2 }
  0xca   : > { %388 = vperm.xlu1 %3371, %v3737_v14  }
  0xcb   : > { %v3740_v15 = vpop.xlane.xlu1 %240  ;;  %v3742_v18 = vpop.xlane.xlu0 %237 }
  0xcc   : > { %v3762_v24 = vsub.f32 %v3742_v18, %v3586_v9  ;;  %v3782_v9 = vsub.f32 %v3740_v15, %v3583_v8 }
  0xce   : > { %391 = vperm.xlu1 %3371, %v3746_v1   ;;  %5943 = vst [vmem:[#allocation12_spill] sm:$0xff] %v3782_v9 }
  0xcf   : > { %v3749_v19 = vpop.xlane.xlu1 %246  ;;  %v3751_v22 = vpop.xlane.xlu0 %243 }
  0xd0   : > { %5937 = vst [vmem:[#allocation6_spill] sm:$0xff] %v3749_v19  ;;  %5938 = vst [vmem:[#allocation7_spill] sm:$0xff] %v3751_v22 }
  0xd2   : > { %394 = vperm.xlu1 %3371, %v3755_v5  }
  0xd3   : > { %v3758_v23 = vpop.xlane.xlu1 %252  ;;  %v3764_v0 = vpop.xlane.xlu0 %249 }
  0xd4   : > { %5939 = vst [vmem:[#allocation8_spill] sm:$0xff] %v3758_v23  ;;  %5940 = vst [vmem:[#allocation9_spill] sm:$0xff] %v3764_v0  ;;  %v3768_v27 = vsub.f32 %v3758_v23, %v3603_v16  ;;  %v3818_v40 = vsub.f32 %v3764_v0, %v3606_v17 }
  0xd6   : > { %412 = vperm.xlu0 %3370, %v3768_v27   ;;  %397 = vperm.xlu1 %3371, %v3762_v24  }
  0xd7   : > { %v3772_v2 = vpop.xlane.xlu1 %258  ;;  %v3774_v28 = vpop.xlane.xlu0 %255 }
  0xd8   : > { %5941 = vst [vmem:[#allocation10_spill] sm:$0xff] %v3772_v2  ;;  %5942 = vst [vmem:[#allocation11_spill] sm:$0xff] %v3774_v28  ;;  %v3778_v31 = vsub.f32 %v3772_v2, %v3613_v20  ;;  %v3796_v20 = vsub.f32 %v3751_v22, %v3596_v13  ;;  %v3838_v17 = vsub.f32 %v3774_v28, %v3616_v21 }
  0xda   : > { %418 = vperm.xlu0 %3370, %v3778_v31   ;;  %400 = vperm.xlu1 %3371, %v3782_v9   ;;  %5945 = vst [vmem:[#allocation14_spill] sm:$0xff] %v3796_v20 }
  0xdb   : > { %v3786_v16 = vpop.xlane.xlu1 %264  ;;  %v3788_v32 = vpop.xlane.xlu0 %261 }
  0xdc   : > { %5944 = vst [vmem:[#allocation13_spill] sm:$0xff] %v3788_v32  ;;  %v3792_v35 = vsub.f32 %v3786_v16, %v3623_v25  ;;  %v3810_v25 = vsub.f32 %v3749_v19, %v3593_v12  ;;  %v3846_v48 = vsub.f32 %v3788_v32, %v3626_v26 }
  0xde   : > { %424 = vperm.xlu0 %3370, %v3792_v35   ;;  %403 = vperm.xlu1 %3371, %v3796_v20   ;;  %5948 = vst [vmem:[#allocation17_spill] sm:$0xff] %v3810_v25 }
  0xdf   : > { %v3800_v8 = vpop.xlane.xlu1 %270  ;;  %v3802_v36 = vpop.xlane.xlu0 %267 }
  0xe0   : > { %5946 = vst [vmem:[#allocation15_spill] sm:$0xff] %v3800_v8  ;;  %5947 = vst [vmem:[#allocation16_spill] sm:$0xff] %v3802_v36  ;;  %v3806_v39 = vsub.f32 %v3800_v8, %v3633_v29  ;;  %v3866_v26 = vsub.f32 %v3802_v36, %v3636_v30  ;;  %v675_v36 = vrot.slane %v3755_v5, 4 }
  0xe2   : > { %430 = vperm.xlu0 %3370, %v3806_v39   ;;  %406 = vperm.xlu1 %3371, %v3810_v25  }
  0xe3   : > { %v3814_v13 = vpop.xlane.xlu1 %276  ;;  %v3820_v43 = vpop.xlane.xlu0 %273 }
  0xe4   : > { %5949 = vst [vmem:[#allocation18_spill] sm:$0xff] %v3814_v13  ;;  %5950 = vst [vmem:[#allocation19_spill] sm:$0xff] %v3820_v43  ;;  %v3824_v29 = vsub.f32 %v3814_v13, %v3643_v33  ;;  %v3874_v56 = vsub.f32 %v3820_v43, %v3646_v34 }
  0xe6   : > { %436 = vperm.xlu0 %3370, %v3824_v29   ;;  %409 = vperm.xlu1 %3371, %v3818_v40  }
  0xe7   : > { %v3828_v12 = vpop.xlane.xlu1 %282  ;;  %v3830_v44 = vpop.xlane.xlu0 %279 }
  0xe8   : > { %5951 = vst [vmem:[#allocation20_spill] sm:$0xff] %v3828_v12  ;;  %5952 = vst [vmem:[#allocation21_spill] sm:$0xff] %v3830_v44  ;;  %v3834_v47 = vsub.f32 %v3828_v12, %v3653_v37  ;;  %v3894_v34 = vsub.f32 %v3830_v44, %v3656_v38  ;;  %v670_v38 = vrot.slane %v3728_v7, 7 }
  0xea   : > { %442 = vperm.xlu0 %3370, %v3834_v47   ;;  %415 = vperm.xlu1 %3371, %v3838_v17  }
  0xeb   : > { %v3842_v33 = vpop.xlane.xlu1 %288  ;;  %v3848_v51 = vpop.xlane.xlu0 %285 }
  0xec   : > { %5953 = vst [vmem:[#allocation22_spill] sm:$0xff] %v3842_v33  ;;  %5954 = vst [vmem:[#allocation23_spill] sm:$0xff] %v3848_v51  ;;  %v3852_v37 = vsub.f32 %v3842_v33, %v3663_v41  ;;  %v3902_v3 = vsub.f32 %v3848_v51, %v3666_v42  ;;  %v691_v51 = vrot.slane %v3846_v48, 7  ;;  %v692_v33 = vrot.slane %v3792_v35, 6 }
  0xee   : > { %448 = vperm.xlu0 %3370, %v3852_v37   ;;  %421 = vperm.xlu1 %3371, %v3846_v48   ;;  %v706_v32 = vrot.slane %v3852_v37, 6 }
  0xef   : > { %v3856_v21 = vpop.xlane.xlu1 %294  ;;  %v3858_v52 = vpop.xlane.xlu0 %291 }
  0xf0   : > { %5955 = vst [vmem:[#allocation24_spill] sm:$0xff] %v3856_v21  ;;  %5956 = vst [vmem:[#allocation25_spill] sm:$0xff] %v3858_v52  ;;  %v3862_v55 = vsub.f32 %v3856_v21, %v3673_v45 }
  0xf2   : > { %454 = vperm.xlu0 %3370, %v3862_v55   ;;  %427 = vperm.xlu1 %3371, %v3866_v26  }
  0xf3   : > { %v3870_v41 = vpop.xlane.xlu1 %300  ;;  %v3876_v59 = vpop.xlane.xlu0 %297 }
  0xf4   : > { %5957 = vst [vmem:[#allocation26_spill] sm:$0xff] %v3870_v41  ;;  %5958 = vst [vmem:[#allocation27_spill] sm:$0xff] %v3876_v59  ;;  %v3880_v45 = vsub.f32 %v3870_v41, %v3683_v49  ;;  %v671_v41 = vrot.slane %v3737_v14, 6 }
  0xf6   : > { %460 = vperm.xlu0 %3370, %v3880_v45   ;;  %433 = vperm.xlu1 %3371, %v3874_v56   ;;  %v672_v42 = vsel %vm610_vm1, %v671_v41, %v670_v38 }
  0xf7   : > { %v3884_v30 = vpop.xlane.xlu1 %306  ;;  %v3886_v60 = vpop.xlane.xlu0 %303 }
  0xf8   : > { %5959 = vst [vmem:[#allocation28_spill] sm:$0xff] %v3884_v30  ;;  %5960 = vst [vmem:[#allocation29_spill] sm:$0xff] %v3886_v60  ;;  %v3890_v63 = vsub.f32 %v3884_v30, %v3693_v53  ;;  %v673_v30 = vrot.slane %v3746_v1, 5 }
  0xfa   : > { %466 = vperm.xlu0 %3370, %v3890_v63   ;;  %439 = vperm.xlu1 %3371, %v3894_v34   ;;  %v674_v38 = vsel %vm612_vm2, %v673_v30, %v672_v42  ;;  %v696_v42 = vrot.slane %v3806_v39, 4 }
  0xfb   : > { %v3898_v49 = vpop.xlane.xlu1 %312  ;;  %v3905_v21 = vpop.xlane.xlu0 %309  ;;  %v3951_v30 = vsel %vm614_vm3, %v675_v36, %v674_v38 }
  0xfc   : > { %5961 = vst [vmem:[#allocation30_spill] sm:$0xff] %v3898_v49  ;;  %5962 = vst [vmem:[#allocation31_spill] sm:$0xff] %v3905_v21  ;;  %v3909_v53 = vsub.f32 %v3898_v49, %v3703_v57  ;;  %v3926_v49 = vsub.f32 %v3858_v52, %v3676_v46  ;;  %v3933_v41 = vsub.f32 %v3905_v21, %v3706_v58  ;;  %v705_v52 = vrot.slane %v3902_v3, 7 }
  0xfd   : > { %v3941_v46 = vsub.f32 %v3876_v59, %v3686_v50  ;;  %5965 = vst [vmem:[#allocation34_spill] sm:$0xff] %v3951_v30  ;;  %v710_v59 = vrot.slane %v3862_v55, 4 }
  0xfe   : > { %472 = vperm.xlu0 %3370, %v3909_v53   ;;  %445 = vperm.xlu1 %3371, %v3902_v3   ;;  %v719_v21 = vrot.slane %v3933_v41, 7  ;;  %v720_v50 = vrot.slane %v3909_v53, 6 }
  0xff   : > { %v3915_v8 = vpop.xlane.xlu1 %318  ;;  %v3929_v10 = vpop.xlane.xlu0 %315 }
 0x100   : > { %5963 = vst [vmem:[#allocation32_spill] sm:$0xff] %v3915_v8  ;;  %v3922_v57 = vsub.f32 %v3915_v8, %v3713_v61  ;;  %5964 = vst [vmem:[#allocation33_spill] sm:$0xff] %v3929_v10  ;;  %v694_v61 = vrot.slane %v3866_v26, 5  ;;  %v693_v8 = vsel %vm610_vm1, %v692_v33, %v691_v51  ;;  %v3948_v58 = vsub.f32 %v3929_v10, %v3716_v62 }
 0x101   : > { %v708_v51 = vrot.slane %v3926_v49, 5  ;;  %v707_v62 = vsel %vm610_vm1, %v706_v32, %v705_v52  ;;  %v3968_v10 = vsub.f32 %v3886_v60, %v3696_v54  ;;  %v764_v52 = vrot.slane %v3782_v9, 7 }
 0x102   : > { %478 = vperm.xlu0 %3370, %v3922_v57   ;;  %451 = vperm.xlu1 %3371, %v3926_v49   ;;  %v695_v33 = vsel %vm612_vm2, %v694_v61, %v693_v8  ;;  %v722_v36 = vrot.slane %v3948_v58, 5  ;;  %v724_v32 = vrot.slane %v3922_v57, 4  ;;  %v677_v54 = vrot.slane %v3762_v24, 7 }
 0x103   : > { %v3964_v38 = vsel %vm614_vm3, %v696_v42, %v695_v33  ;;  %v709_v8 = vsel %vm612_vm2, %v708_v51, %v707_v62  ;;  %v678_v42 = vrot.slane %v3782_v9, 6  ;;  %v680_v51 = vrot.slane %v3796_v20, 5 }
 0x104   : > { %5966 = vst [vmem:[#allocation35_spill] sm:$0xff] %v3964_v38  ;;  %v3982_v33 = vsel %vm614_vm3, %v710_v59, %v709_v8  ;;  %v776_v62 = vrot.slane %v3792_v35, 7  ;;  %v685_v8 = vrot.slane %v3768_v27, 6 }
 0x105   : > { %5967 = vst [vmem:[#allocation36_spill] sm:$0xff] %v3982_v33  ;;  %v679_v59 = vsel %vm610_vm1, %v678_v42, %v677_v54  ;;  %v687_v54 = vrot.slane %v3838_v17, 5 }
 0x106   : > { %726 = vrot.lane.b32.xlu0 %v3951_v30, %s3448_s15  ;;  %457 = vperm.xlu1 %3371, %v3941_v46   ;;  %v721_v30 = vsel %vm610_vm1, %v720_v50, %v719_v21  ;;  %v766_v21 = vrot.slane %v3796_v20, 6  ;;  %v777_v42 = vsel %vm610_vm1, %v776_v62, %v3846_v48  ;;  %v788_v20 = vrot.slane %v3852_v37, 7 }
 0x107   : > { %v723_v61 = vsel %vm612_vm2, %v722_v36, %v721_v30  ;;  %v765_v30 = vsel %vm610_vm1, %v764_v52, %v3762_v24  ;;  %v684_v36 = vrot.slane %v3818_v40, 7  ;;  %v681_v52 = vsel %vm612_vm2, %v680_v51, %v679_v59 }
 0x108   : > { %v3989_v50 = vsel %vm614_vm3, %v724_v32, %v723_v61  ;;  %v682_v32 = vrot.slane %v3810_v25, 4  ;;  %v767_v61 = vsel %vm612_vm2, %v766_v21, %v765_v30  ;;  %v780_v30 = vrot.slane %v3806_v39, 5 }
 0x109   : > { %5968 = vst [vmem:[#allocation37_spill] sm:$0xff] %v3989_v50  ;;  %v686_v9 = vsel %vm610_vm1, %v685_v8, %v684_v36  ;;  %v689_v62 = vrot.slane %v3778_v31, 4  ;;  %v790_v36 = vrot.slane %v3926_v49, 6  ;;  %v701_v8 = vrot.slane %v3894_v34, 5 }
 0x10a   : > { %732 = vrot.lane.b32.xlu0 %v3964_v38, %s3448_s15  ;;  %463 = vperm.xlu1 %3371, %v3968_v10   ;;  %v778_v38 = vrot.slane %v3866_v26, 6  ;;  %v4018_v51 = vsel %vm614_vm3, %v682_v32, %v681_v52  ;;  %v789_v32 = vsel %vm610_vm1, %v788_v20, %v3902_v3  ;;  %v703_v20 = vrot.slane %v3834_v47, 4 }
 0x10b   : > { %5970 = vst [vmem:[#allocation39_spill] sm:$0xff] %v4018_v51 }
 0x10c   : > { %v779_v59 = vsel %vm612_vm2, %v778_v38, %v777_v42  ;;  %v713_v38 = vrot.slane %v3880_v45, 6 }
 0x10d   : > { %v4036_v42 = vsel %vm614_vm3, %v780_v30, %v779_v59  ;;  %v715_v30 = vrot.slane %v3968_v10, 5 }
 0x10e   : > { %736 = vrot.lane.b32.xlu0 %v3982_v33, %s3448_s15  ;;  %469 = vperm.xlu1 %3371, %v3933_v41   ;;  %v768_v33 = vrot.slane %v3810_v25, 5  ;;  %v699_v25 = vrot.slane %v3824_v29, 6  ;;  %5971 = vst [vmem:[#allocation40_spill] sm:$0xff] %v4036_v42 }
 0x110   : > { %v4014_v21 = vsel %vm614_vm3, %v768_v33, %v767_v61  ;;  %v688_v33 = vsel %vm612_vm2, %v687_v54, %v686_v9  ;;  %v800_v61 = vrot.slane %v3909_v53, 7  ;;  %v791_v54 = vsel %vm612_vm2, %v790_v36, %v789_v32 }
 0x111   : > { %5969 = vst [vmem:[#allocation38_spill] sm:$0xff] %v4014_v21  ;;  %v4040_v9 = vsel %vm614_vm3, %v689_v62, %v688_v33  ;;  %v758_v33 = vrot.slane %v3737_v14, 7  ;;  %v804_v36 = vrot.slane %v3922_v57, 5 }
 0x112   : > { %740 = vrot.lane.b32.xlu0 %v3989_v50, %s3448_s15  ;;  %475 = vperm.xlu1 %3371, %v3948_v58   ;;  %v698_v50 = vrot.slane %v3874_v56, 7  ;;  %5972 = vst [vmem:[#allocation41_spill] sm:$0xff] %v4040_v9  ;;  %v801_v62 = vsel %vm610_vm1, %v800_v61, %v3933_v41 }
 0x113   : > { %v759_v61 = vsel %vm610_vm1, %v758_v33, %v3728_v7 }
 0x114   : > { %v700_v52 = vsel %vm610_vm1, %v699_v25, %v698_v50  ;;  %v802_v25 = vrot.slane %v3948_v58, 6 }
 0x115   : > { %v702_v50 = vsel %vm612_vm2, %v701_v8, %v700_v52  ;;  %v717_v8 = vrot.slane %v3890_v63, 4 }
 0x116   : > { %808 = vrot.lane.b32.xlu0 %v4014_v21, %s3448_s15  ;;  %728 = vrot.lane.b32.xlu1 %v4018_v51, %s3448_s15  ;;  %v712_v21 = vrot.slane %v3941_v46, 7  ;;  %v792_v51 = vrot.slane %v3862_v55, 5  ;;  %v4060_v32 = vsel %vm614_vm3, %v703_v20, %v702_v50  ;;  %v803_v52 = vsel %vm612_vm2, %v802_v25, %v801_v62 }
 0x117   : > { %5974 = vst [vmem:[#allocation43_spill] sm:$0xff] %v4060_v32  ;;  %v4074_v20 = vsel %vm614_vm3, %v804_v36, %v803_v52  ;;  %v762_v25 = vrot.slane %v3755_v5, 5  ;;  %v774_v36 = vrot.slane %v3778_v31, 5  ;;  %v784_v52 = vrot.slane %v3894_v34, 6 }
 0x118   : > { %v714_v59 = vsel %vm610_vm1, %v713_v38, %v712_v21  ;;  %v770_v38 = vrot.slane %v3768_v27, 7  ;;  %5975 = vst [vmem:[#allocation44_spill] sm:$0xff] %v4074_v20 }
 0x119   : > { %v716_v21 = vsel %vm612_vm2, %v715_v30, %v714_v59  ;;  %v772_v30 = vrot.slane %v3838_v17, 6  ;;  %v782_v59 = vrot.slane %v3824_v29, 7 }
 0x11a   : > { %812 = vrot.lane.b32.xlu0 %v4036_v42, %s3448_s15  ;;  %730 = vrot.lane.b32.xlu1 %v4040_v9, %s3448_s15  ;;  %v4056_v42 = vsel %vm614_vm3, %v792_v51, %v791_v54  ;;  %v760_v51 = vrot.slane %v3746_v1, 6  ;;  %v4077_v54 = vsel %vm614_vm3, %v717_v8, %v716_v21  ;;  %v771_v62 = vsel %vm610_vm1, %v770_v38, %v3818_v40 }
 0x11b   : > { %5973 = vst [vmem:[#allocation42_spill] sm:$0xff] %v4056_v42  ;;  %5976 = vst [vmem:[#allocation45_spill] sm:$0xff] %v4077_v54  ;;  %v773_v8 = vsel %vm612_vm2, %v772_v30, %v771_v62  ;;  %v3449_v21 = vmov 0   ;;  %v480_v38 = vlaneseq  ;;  %v796_v62 = vrot.slane %v3968_v10, 6 }
 0x11c   : > { %v761_v50 = vsel %vm612_vm2, %v760_v51, %v759_v61  ;;  %3372 = vset.pattern.permute.xlu0 %v3449_v21  ;;  %v783_v51 = vsel %vm610_vm1, %v782_v59, %v3874_v56  ;;  %v794_v61 = vrot.slane %v3880_v45, 7  ;;  %3373 = vset.pattern.permute.xlu1 %v3449_v21 }
 0x11d   : > { %v4090_v33 = vsel %vm614_vm3, %v762_v25, %v761_v50  ;;  %v4101_v25 = vsel %vm614_vm3, %v774_v36, %v773_v8  ;;  %v786_v50 = vrot.slane %v3834_v47, 5  ;;  %v785_v30 = vsel %vm612_vm2, %v784_v52, %v783_v51 }
 0x11e   : > { %816 = vrot.lane.b32.xlu0 %v4056_v42, %s3448_s15  ;;  %734 = vrot.lane.b32.xlu1 %v4060_v32, %s3448_s15  ;;  %5977 = vst [vmem:[#allocation46_spill] sm:$0xff] %v4090_v33  ;;  %5978 = vst [vmem:[#allocation47_spill] sm:$0xff] %v4101_v25  ;;  %v481_v59 = vand.u32 127, %v480_v38  ;;  %v798_v36 = vrot.slane %v3890_v63, 5 }
 0x11f   : > { %v4111_v21 = vsel %vm614_vm3, %v786_v50, %v785_v30 }
 0x120   : > { %5979 = vst [vmem:[#allocation48_spill] sm:$0xff] %v4111_v21 }
 0x122   : > { %820 = vrot.lane.b32.xlu0 %v4074_v20, %s3448_s15  ;;  %738 = vrot.lane.b32.xlu1 %v4077_v54, %s3448_s15  ;;  %v795_v20 = vsel %vm610_vm1, %v794_v61, %v3941_v46  ;;  %v483_v54 = vshrl.u32 %v480_v38, 7 }
 0x123   : > { %v797_v8 = vsel %vm612_vm2, %v796_v62, %v795_v20 }
 0x124   : > { %v4117_v42 = vsub.s32 %v481_v59, %v483_v54  ;;  %v4120_v52 = vsel %vm614_vm3, %v798_v36, %v797_v8 }
 0x125   : > { %5980 = vst [vmem:[#allocation49_spill] sm:$0xff] %v4120_v52 }
 0x126   : > { %806 = vrot.lane.b32.xlu1 %v4090_v33, %s3448_s15  ;;  %v893_v51 = vrot.slane %v3740_v15, %v4117_v42  ;;  %v889_v61 = vrot.slane %v3742_v18, %v4117_v42  ;;  %v897_v38 = vrot.slane %v3751_v22, %v4117_v42  ;;  %v909_v20 = vrot.slane %v3758_v23, %v4117_v42  ;;  %v5985_v33 = vld [vmem:[#allocation23_spill] sm:$0xff] }
 0x127   : > { %v905_v54 = vrot.slane %v3764_v0, %v4117_v42  ;;  %v901_v30 = vrot.slane %v3749_v19, %v4117_v42  ;;  %v913_v59 = vrot.slane %v3774_v28, %v4117_v42  ;;  %v941_v36 = vrot.slane %v3814_v13, %v4117_v42 }
 0x128   : > { %v1001_v50 = vsel %vm610_vm1, %v893_v51, %v889_v61  ;;  %v937_v8 = vrot.slane %v3820_v43, %v4117_v42  ;;  %v917_v51 = vrot.slane %v3772_v2, %v4117_v42 }
 0x129   : > { %v1002_v62 = vsel %vm612_vm2, %v897_v38, %v1001_v50  ;;  %v945_v38 = vrot.slane %v3830_v44, %v4117_v42 }
 0x12a   : > { %810 = vrot.lane.b32.xlu1 %v4101_v25, %s3448_s15  ;;  %v1010_v50 = vsel %vm610_vm1, %v941_v36, %v937_v8  ;;  %v881_v36 = vrot.slane %v3722_v4, %v4117_v42  ;;  %v925_v8 = vrot.slane %v3786_v16, %v4117_v42 }
 0x12e   : > { %814 = vrot.lane.b32.xlu1 %v4111_v21, %s3448_s15  ;;  %v1003_v21 = vsel %vm614_vm3, %v901_v30, %v1002_v62 }
 0x12f   : > { %v1033_v32 = vsel %vm645_vm4, %v1003_v21, 0.0 }
 0x132   : > { %818 = vrot.lane.b32.xlu1 %v4120_v52, %s3448_s15  ;;  %v1004_v52 = vsel %vm610_vm1, %v909_v20, %v905_v54  ;;  %v949_v20 = vrot.slane %v3828_v12, %v4117_v42  ;;  %v1011_v54 = vsel %vm612_vm2, %v945_v38, %v1010_v50  ;;  %v5982_v50 = vld [vmem:[#allocation5_spill] sm:$0xff]  ;;  %v953_v12 = vrot.slane %v5985_v33, %v4117_v42 }
 0x133   : > { %v1005_v61 = vsel %vm612_vm2, %v913_v59, %v1004_v52  ;;  %v877_v59 = vrot.slane %v3733_v11, %v4117_v42 }
 0x134   : > { %v1006_v25 = vsel %vm614_vm3, %v917_v51, %v1005_v61  ;;  %v1012_v52 = vsel %vm614_vm3, %v949_v20, %v1011_v54  ;;  %v885_v20 = vrot.slane %v5982_v50, %v4117_v42 }
 0x135   : > { %v1036_v30 = vsel %vm645_vm4, %v1006_v25, 0.0  ;;  %v1042_v62 = vsel %vm645_vm4, %v1012_v52, 0.0  ;;  %v5981_v25 = vld [vmem:[#allocation13_spill] sm:$0xff] }
 0x136   : > { %v921_v51 = vrot.slane %v5981_v25, %v4117_v42 }
 0x138   : > { %v1007_v43 = vsel %vm610_vm1, %v925_v8, %v921_v51  ;;  %v5988_v51 = vld [vmem:[#allocation24_spill] sm:$0xff] }
 0x141   : > { %1034 = vadd.xlane.f32.xlu0 %v1033_v32  ;;  %v873_v32 = vrot.slane %v3724_v6, %v4117_v42 }
 0x143   : > { %v998_v61 = vsel %vm610_vm1, %v877_v59, %v873_v32  ;;  %v5986_v32 = vld [vmem:[#allocation15_spill] sm:$0xff] }
 0x144   : > { %v999_v54 = vsel %vm612_vm2, %v881_v36, %v998_v61  ;;  %v933_v2 = vrot.slane %v5986_v32, %v4117_v42  ;;  %v5987_v61 = vld [vmem:[#allocation25_spill] sm:$0xff] }
 0x145   : > { %1037 = vadd.xlane.f32.xlu0 %v1036_v30  ;;  %v5983_v30 = vld [vmem:[#allocation16_spill] sm:$0xff]  ;;  %v386_v44 = vpop.permute.xlu0 %385  ;;  %v1000_v59 = vsel %vm614_vm3, %v885_v20, %v999_v54  ;;  %v961_v28 = vrot.slane %v5987_v61, %v4117_v42  ;;  %v965_v20 = vrot.slane %v5988_v51, %v4117_v42 }
 0x146   : > { %v929_v52 = vrot.slane %v5983_v30, %v4117_v42  ;;  %v1030_v33 = vsel %vm645_vm4, %v1000_v59, 0.0 }
 0x148   : > { %v1008_v36 = vsel %vm612_vm2, %v929_v52, %v1007_v43 }
 0x149   : > { %1043 = vadd.xlane.f32.xlu0 %v1042_v62  ;;  %v389_v21 = vpop.permute.xlu1 %388  ;;  %v5984_v62 = vld [vmem:[#allocation22_spill] sm:$0xff]  ;;  %v1009_v8 = vsel %vm614_vm3, %v933_v2, %v1008_v36 }
 0x14a   : > { %v957_v9 = vrot.slane %v5984_v62, %v4117_v42  ;;  %v489_v23 = vrot.slane %v389_v21, %v4117_v42  ;;  %v1039_v22 = vsel %vm645_vm4, %v1009_v8, 0.0 }
 0x14c   : > { %v1013_v62 = vsel %vm610_vm1, %v957_v9, %v953_v12  ;;  %v485_v12 = vrot.slane %v386_v44, %v4117_v42 }
 0x14d   : > { %v392_v38 = vpop.permute.xlu1 %391  ;;  %v1014_v54 = vsel %vm612_vm2, %v961_v28, %v1013_v62 }
 0x14e   : > { %v493_v52 = vrot.slane %v392_v38, %v4117_v42  ;;  %v1015_v2 = vsel %vm614_vm3, %v965_v20, %v1014_v54  ;;  %v611_v59 = vsel %vm610_vm1, %v489_v23, %v485_v12 }
 0x14f   : > { %v1045_v28 = vsel %vm645_vm4, %v1015_v2, 0.0 }
 0x150   : > { %v613_v21 = vsel %vm612_vm2, %v493_v52, %v611_v59 }
 0x151   : > { %v395_v13 = vpop.permute.xlu1 %394 }
 0x152   : > { %v497_v9 = vrot.slane %v395_v13, %v4117_v42 }
 0x154   : > { %v615_v62 = vsel %vm614_vm3, %v497_v9, %v613_v21 }
 0x155   : > { %v413_v19 = vpop.permute.xlu0 %412  ;;  %v398_v0 = vpop.permute.xlu1 %397  ;;  %v646_v20 = vsel %vm645_vm4, %v615_v62, 0.0 }
 0x156   : > { %1031 = vadd.xlane.f32.xlu1 %v1030_v33  ;;  %v501_v13 = vrot.slane %v398_v0, %v4117_v42  ;;  %v521_v59 = vrot.slane %v413_v19, %v4117_v42 }
 0x159   : > { %v419_v43 = vpop.permute.xlu0 %418  ;;  %v401_v61 = vpop.permute.xlu1 %400 }
 0x15a   : > { %1040 = vadd.xlane.f32.xlu1 %v1039_v22  ;;  %v505_v38 = vrot.slane %v401_v61, %v4117_v42  ;;  %v529_v21 = vrot.slane %v419_v43, %v4117_v42 }
 0x15c   : > { %v616_v54 = vsel %vm610_vm1, %v505_v38, %v501_v13 }
 0x15d   : > { %v425_v33 = vpop.permute.xlu0 %424  ;;  %v404_v36 = vpop.permute.xlu1 %403 }
 0x15e   : > { %1046 = vadd.xlane.f32.xlu1 %v1045_v28  ;;  %v509_v44 = vrot.slane %v404_v36, %v4117_v42  ;;  %v537_v19 = vrot.slane %v425_v33, %v4117_v42 }
 0x160   : > { %v617_v52 = vsel %vm612_vm2, %v509_v44, %v616_v54 }
 0x161   : > { %v431_v22 = vpop.permute.xlu0 %430  ;;  %v407_v8 = vpop.permute.xlu1 %406 }
 0x162   : > { %v513_v23 = vrot.slane %v407_v8, %v4117_v42  ;;  %647 = vadd.xlane.f32.xlu1 %v646_v20  ;;  %v545_v43 = vrot.slane %v431_v22, %v4117_v42 }
 0x164   : > { %v618_v61 = vsel %vm614_vm3, %v513_v23, %v617_v52 }
 0x165   : > { %v410_v12 = vpop.permute.xlu1 %409  ;;  %v649_v9 = vsel %vm645_vm4, %v618_v61, 0.0  ;;  %v437_v2 = vpop.permute.xlu0 %436 }
 0x166   : > { %650 = vadd.xlane.f32.xlu0 %v649_v9  ;;  %v517_v0 = vrot.slane %v410_v12, %v4117_v42  ;;  %v553_v33 = vrot.slane %v437_v2, %v4117_v42 }
 0x168   : > { %v619_v38 = vsel %vm610_vm1, %v521_v59, %v517_v0 }
 0x169   : > { %v416_v36 = vpop.permute.xlu1 %415  ;;  %v443_v62 = vpop.permute.xlu0 %442 }
 0x16a   : > { %v525_v28 = vrot.slane %v416_v36, %v4117_v42  ;;  %v561_v22 = vrot.slane %v443_v62, %v4117_v42 }
 0x16c   : > { %v620_v44 = vsel %vm612_vm2, %v525_v28, %v619_v38 }
 0x16d   : > { %v422_v13 = vpop.permute.xlu1 %421  ;;  %v621_v8 = vsel %vm614_vm3, %v529_v21, %v620_v44  ;;  %v449_v52 = vpop.permute.xlu0 %448 }
 0x16e   : > { %v652_v20 = vsel %vm645_vm4, %v621_v8, 0.0  ;;  %v533_v23 = vrot.slane %v422_v13, %v4117_v42  ;;  %v569_v2 = vrot.slane %v449_v52, %v4117_v42 }
 0x16f   : > { %653 = vadd.xlane.f32.xlu0 %v652_v20 }
 0x170   : > { %v622_v12 = vsel %vm610_vm1, %v537_v19, %v533_v23 }
 0x171   : > { %v428_v54 = vpop.permute.xlu1 %427  ;;  %v455_v21 = vpop.permute.xlu0 %454 }
 0x172   : > { %v541_v61 = vrot.slane %v428_v54, %v4117_v42  ;;  %v577_v62 = vrot.slane %v455_v21, %v4117_v42  ;;  %v977_v21 = vrot.slane %v3886_v60, %v4117_v42 }
 0x174   : > { %v623_v9 = vsel %vm612_vm2, %v541_v61, %v622_v12 }
 0x175   : > { %v434_v0 = vpop.permute.xlu1 %433  ;;  %v624_v59 = vsel %vm614_vm3, %v545_v43, %v623_v9  ;;  %v461_v19 = vpop.permute.xlu0 %460 }
 0x176   : > { %v655_v36 = vsel %vm645_vm4, %v624_v59, 0.0  ;;  %v549_v28 = vrot.slane %v434_v0, %v4117_v42 }
 0x177   : > { %656 = vadd.xlane.f32.xlu1 %v655_v36  ;;  %v5989_v36 = vld [vmem:[#allocation26_spill] sm:$0xff] }
 0x178   : > { %v625_v13 = vsel %vm610_vm1, %v553_v33, %v549_v28  ;;  %v973_v28 = vrot.slane %v5989_v36, %v4117_v42  ;;  %v5990_v33 = vld [vmem:[#allocation27_spill] sm:$0xff] }
 0x179   : > { %v440_v38 = vpop.permute.xlu1 %439  ;;  %v467_v0 = vpop.permute.xlu0 %466 }
 0x17a   : > { %v557_v44 = vrot.slane %v440_v38, %v4117_v42  ;;  %v969_v38 = vrot.slane %v5990_v33, %v4117_v42 }
 0x17c   : > { %v626_v8 = vsel %vm612_vm2, %v557_v44, %v625_v13 }
 0x17d   : > { %v446_v20 = vpop.permute.xlu1 %445  ;;  %v627_v23 = vsel %vm614_vm3, %v561_v22, %v626_v8  ;;  %v585_v8 = vrot.slane %v461_v19, %v4117_v42 }
 0x17e   : > { %v658_v54 = vsel %vm645_vm4, %v627_v23, 0.0  ;;  %v565_v61 = vrot.slane %v446_v20, %v4117_v42  ;;  %v1016_v23 = vsel %vm610_vm1, %v973_v28, %v969_v38 }
 0x17f   : > { %659 = vadd.xlane.f32.xlu0 %v658_v54  ;;  %v473_v54 = vpop.permute.xlu0 %472 }
 0x180   : > { %v628_v9 = vsel %vm610_vm1, %v569_v2, %v565_v61  ;;  %v593_v2 = vrot.slane %v467_v0, %v4117_v42 }
 0x181   : > { %v452_v43 = vpop.permute.xlu1 %451 }
 0x182   : > { %v573_v12 = vrot.slane %v452_v43, %v4117_v42 }
 0x184   : > { %v629_v59 = vsel %vm612_vm2, %v573_v12, %v628_v9  ;;  %v5991_v12 = vld [vmem:[#allocation28_spill] sm:$0xff] }
 0x185   : > { %v458_v44 = vpop.permute.xlu1 %457  ;;  %v630_v22 = vsel %vm614_vm3, %v577_v62, %v629_v59  ;;  %v981_v62 = vrot.slane %v5991_v12, %v4117_v42  ;;  %v1017_v59 = vsel %vm612_vm2, %v977_v21, %v1016_v23  ;;  %v479_v21 = vpop.permute.xlu0 %478  ;;  %v601_v23 = vrot.slane %v473_v54, %v4117_v42 }
 0x186   : > { %v661_v52 = vsel %vm645_vm4, %v630_v22, 0.0  ;;  %v581_v13 = vrot.slane %v458_v44, %v4117_v42  ;;  %v5992_v44 = vld [vmem:[#allocation30_spill] sm:$0xff]  ;;  %v5993_v22 = vld [vmem:[#allocation31_spill] sm:$0xff] }
 0x187   : > { %662 = vadd.xlane.f32.xlu1 %v661_v52  ;;  %v989_v19 = vrot.slane %v5992_v44, %v4117_v42  ;;  %v985_v28 = vrot.slane %v5993_v22, %v4117_v42 }
 0x188   : > { %v631_v43 = vsel %vm610_vm1, %v585_v8, %v581_v13  ;;  %v1018_v8 = vsel %vm614_vm3, %v981_v62, %v1017_v59  ;;  %v5995_v62 = vld [vmem:[#allocation32_spill] sm:$0xff] }
 0x189   : > { %v464_v20 = vpop.permute.xlu1 %463  ;;  %v1019_v51 = vsel %vm610_vm1, %v989_v19, %v985_v28  ;;  %v997_v59 = vrot.slane %v5995_v62, %v4117_v42 }
 0x18a   : > { %v589_v61 = vrot.slane %v464_v20, %v4117_v42  ;;  %v5994_v20 = vld [vmem:[#allocation33_spill] sm:$0xff] }
 0x18c   : > { %v632_v9 = vsel %vm612_vm2, %v589_v61, %v631_v43  ;;  %v993_v61 = vrot.slane %v5994_v20, %v4117_v42 }
 0x18d   : > { %v470_v38 = vpop.permute.xlu1 %469  ;;  %v633_v52 = vsel %vm614_vm3, %v593_v2, %v632_v9  ;;  %v1048_v2 = vsel %vm645_vm4, %v1018_v8, 0.0  ;;  %v609_v9 = vrot.slane %v479_v21, %v4117_v42 }
 0x18e   : > { %v664_v0 = vsel %vm645_vm4, %v633_v52, 0.0  ;;  %v597_v13 = vrot.slane %v470_v38, %v4117_v42 }
 0x18f   : > { %665 = vadd.xlane.f32.xlu0 %v664_v0  ;;  %v1020_v0 = vsel %vm612_vm2, %v993_v61, %v1019_v51 }
 0x190   : > { %v634_v38 = vsel %vm610_vm1, %v601_v23, %v597_v13  ;;  %v1021_v28 = vsel %vm614_vm3, %v997_v59, %v1020_v0 }
 0x191   : > { %v476_v43 = vpop.permute.xlu1 %475  ;;  %v1051_v8 = vsel %vm645_vm4, %v1021_v28, 0.0 }
 0x192   : > { %v605_v50 = vrot.slane %v476_v43, %v4117_v42 }
 0x193   : > { %1049 = vadd.xlane.f32.xlu0 %v1048_v2 }
 0x194   : > { %v635_v52 = vsel %vm612_vm2, %v605_v50, %v634_v38  ;;  %v5996_v50 = vld [vmem:[#allocation12_spill] sm:$0xff] }
 0x195   : > { %v636_v54 = vsel %vm614_vm3, %v609_v9, %v635_v52 }
 0x196   : > { %v667_v19 = vsel %vm645_vm4, %v636_v54, 0.0 }
 0x197   : > { %668 = vadd.xlane.f32.xlu1 %v667_v19 }
 0x19b   : > { %1052 = vadd.xlane.f32.xlu1 %v1051_v8 }
 0x1a9   : > { %1191 = vperm.xlu0 %3372, %v3728_v7   ;;  %v5997_v7 = vld [vmem:[#allocation14_spill] sm:$0xff] }
 0x1ac   : > { %1194 = vperm.xlu1 %3373, %v3737_v14   ;;  %v5998_v14 = vld [vmem:[#allocation17_spill] sm:$0xff] }
 0x1ad   : > { %1218 = vperm.xlu0 %3372, %v3768_v27  }
 0x1b0   : > { %1197 = vperm.xlu1 %3373, %v3746_v1   ;;  %v4307_v1 = vpop.permute.xlu0 %726 }
 0x1b1   : > { %1224 = vperm.xlu0 %3372, %v3778_v31  }
 0x1b4   : > { %1200 = vperm.xlu1 %3373, %v3755_v5   ;;  %v4309_v5 = vpop.permute.xlu1 %728 }
 0x1b5   : > { %1230 = vperm.xlu0 %3372, %v3792_v35  }
 0x1b8   : > { %1203 = vperm.xlu1 %3373, %v3762_v24   ;;  %v4314_v24 = vpop.permute.xlu0 %732  ;;  %v4316_v27 = vpop.permute.xlu1 %730 }
 0x1b9   : > { %1236 = vperm.xlu0 %3372, %v3806_v39  }
 0x1bc   : > { %1206 = vperm.xlu1 %3373, %v5996_v50   ;;  %v4319_v31 = vpop.permute.xlu0 %736  ;;  %v4321_v35 = vpop.permute.xlu1 %734 }
 0x1bd   : > { %1242 = vperm.xlu0 %3372, %v3824_v29  }
 0x1c0   : > { %1209 = vperm.xlu1 %3373, %v5997_v7   ;;  %v4325_v39 = vpop.permute.xlu0 %740 }
 0x1c1   : > { %1248 = vperm.xlu0 %3372, %v3834_v47  }
 0x1c4   : > { %1212 = vperm.xlu1 %3373, %v5998_v14   ;;  %v4330_v29 = vpop.permute.xlu0 %808 }
 0x1c5   : > { %1254 = vperm.xlu0 %3372, %v3852_v37  }
 0x1c8   : > { %1215 = vperm.xlu1 %3373, %v3818_v40   ;;  %v4327_v40 = vpop.permute.xlu1 %738 }
 0x1c9   : > { %1260 = vperm.xlu0 %3372, %v3862_v55  }
 0x1cc   : > { %1221 = vperm.xlu1 %3373, %v3838_v17   ;;  %v4332_v47 = vpop.permute.xlu1 %806  ;;  %v4336_v17 = vpop.permute.xlu0 %812 }
 0x1cd   : > { %1266 = vperm.xlu0 %3372, %v3880_v45  }
 0x1d0   : > { %1227 = vperm.xlu1 %3373, %v3846_v48   ;;  %v4338_v48 = vpop.permute.xlu1 %810  ;;  %v4340_v37 = vpop.permute.xlu0 %816 }
 0x1d1   : > { %1272 = vperm.xlu0 %3372, %v3890_v63   ;;  %5999 = vst [vmem:[#allocation13_spill] sm:$0xff] %v4340_v37 }
 0x1d4   : > { %1233 = vperm.xlu1 %3373, %v3866_v26   ;;  %v4342_v55 = vpop.permute.xlu1 %814  ;;  %v4344_v26 = vpop.permute.xlu0 %820 }
 0x1d5   : > { %1278 = vperm.xlu0 %3372, %v3909_v53   ;;  %6000 = vst [vmem:[#allocation16_spill] sm:$0xff] %v4342_v55  ;;  %6001 = vst [vmem:[#allocation15_spill] sm:$0xff] %v4344_v26 }
 0x1d8   : > { %1239 = vperm.xlu1 %3373, %v3874_v56   ;;  %v4346_v56 = vpop.permute.xlu1 %818 }
 0x1d9   : > { %1284 = vperm.xlu0 %3372, %v3922_v57   ;;  %6002 = vst [vmem:[#allocation12_spill] sm:$0xff] %v4346_v56 }
 0x1dc   : > { %1245 = vperm.xlu1 %3373, %v3894_v34  }
 0x1e0   : > { %1251 = vperm.xlu1 %3373, %v3902_v3  }
 0x1e3   : > { %v4350_v45 = vpop.xlane.xlu1 %1031 }
 0x1e4   : > { %1257 = vperm.xlu1 %3373, %v3926_v49  }
 0x1e7   : > { %v4354_v34 = vpop.xlane.xlu1 %1040 }
 0x1e8   : > { %1263 = vperm.xlu1 %3373, %v3941_v46  }
 0x1eb   : > { %v4358_v3 = vpop.xlane.xlu1 %1046 }
 0x1ec   : > { %1269 = vperm.xlu1 %3373, %v3968_v10   ;;  %v4348_v10 = vpop.xlane.xlu0 %1034  ;;  %6004 = vst [vmem:[#allocation17_spill] sm:$0xff] %v4358_v3 }
 0x1ef   : > { %v4362_v57 = vpop.xlane.xlu1 %647 }
 0x1f0   : > { %1275 = vperm.xlu1 %3373, %v3933_v41   ;;  %v4352_v63 = vpop.xlane.xlu0 %1037  ;;  %6006 = vst [vmem:[#allocation51_spill] sm:$0xff] %v4362_v57 }
 0x1f4   : > { %1281 = vperm.xlu1 %3373, %v3948_v58   ;;  %v4356_v49 = vpop.xlane.xlu0 %1043 }
 0x1f5   : > { %6003 = vst [vmem:[#allocation14_spill] sm:$0xff] %v4356_v49 }
 0x1f8   : > { %v4360_v53 = vpop.xlane.xlu0 %650 }
 0x1f9   : > { %6005 = vst [vmem:[#allocation50_spill] sm:$0xff] %v4360_v53 }
 0x1fc   : > { %v4364_v41 = vpop.xlane.xlu0 %653 }
 0x1fd   : > { %6007 = vst [vmem:[#allocation52_spill] sm:$0xff] %v4364_v41 }
 0x204   : > { %v4366_v46 = vpop.xlane.xlu1 %656 }
 0x205   : > { %6008 = vst [vmem:[#allocation53_spill] sm:$0xff] %v4366_v46 }
 0x20c   : > { %v4368_v58 = vpop.xlane.xlu0 %659 }
 0x214   : > { %v4370_v51 = vpop.xlane.xlu1 %662 }
 0x21c   : > { %v4372_v13 = vpop.xlane.xlu0 %665 }
 0x220   : > { %v4376_v21 = vpop.xlane.xlu0 %1049 }
 0x221   : > { %6010 = vst [vmem:[#allocation55_spill] sm:$0xff] %v4376_v21 }
 0x224   : > { %v4374_v61 = vpop.xlane.xlu1 %668 }
 0x225   : > { %6009 = vst [vmem:[#allocation54_spill] sm:$0xff] %v4374_v61 }
 0x228   : > { %v4378_v23 = vpop.xlane.xlu1 %1052  ;;  %v1192_v43 = vpop.permute.xlu0 %1191 }
 0x229   : > { %6011 = vst [vmem:[#allocation56_spill] sm:$0xff] %v4378_v23  ;;  %v1289_v0 = vrot.slane %v1192_v43, %v4117_v42 }
 0x22c   : > { %v1195_v2 = vpop.permute.xlu1 %1194  ;;  %v1219_v59 = vpop.permute.xlu0 %1218 }
 0x22d   : > { %v1293_v38 = vrot.slane %v1195_v2, %v4117_v42 }
 0x22f   : > { %v1414_v19 = vsel %vm610_vm1, %v1293_v38, %v1289_v0 }
 0x230   : > { %v1198_v9 = vpop.permute.xlu1 %1197  ;;  %v1225_v50 = vpop.permute.xlu0 %1224 }
 0x231   : > { %v1297_v52 = vrot.slane %v1198_v9, %v4117_v42 }
 0x233   : > { %v1415_v8 = vsel %vm612_vm2, %v1297_v52, %v1414_v19 }
 0x234   : > { %v1201_v54 = vpop.permute.xlu1 %1200  ;;  %v1231_v56 = vpop.permute.xlu0 %1230 }
 0x235   : > { %v1301_v28 = vrot.slane %v1201_v54, %v4117_v42 }
 0x237   : > { %v1416_v7 = vsel %vm614_vm3, %v1301_v28, %v1415_v8 }
 0x238   : > { %v1204_v14 = vpop.permute.xlu1 %1203  ;;  %v1446_v26 = vsel %vm645_vm4, %v1416_v7, 0.0  ;;  %v1237_v0 = vpop.permute.xlu0 %1236 }
 0x239   : > { %1447 = vadd.xlane.f32.xlu1 %v1446_v26  ;;  %v1305_v38 = vrot.slane %v1204_v14, %v4117_v42 }
 0x23c   : > { %v1207_v2 = vpop.permute.xlu1 %1206  ;;  %v1243_v55 = vpop.permute.xlu0 %1242 }
 0x23d   : > { %v1309_v9 = vrot.slane %v1207_v2, %v4117_v42 }
 0x23f   : > { %v1417_v52 = vsel %vm610_vm1, %v1309_v9, %v1305_v38  ;;  %v1333_v9 = vrot.slane %v1225_v50, %v4117_v42  ;;  %v1349_v50 = vrot.slane %v1237_v0, %v4117_v42 }
 0x240   : > { %v1210_v37 = vpop.permute.xlu1 %1209 }
 0x241   : > { %v1313_v43 = vrot.slane %v1210_v37, %v4117_v42  ;;  %v1325_v37 = vrot.slane %v1219_v59, %v4117_v42  ;;  %v1341_v59 = vrot.slane %v1231_v56, %v4117_v42  ;;  %v1357_v56 = vrot.slane %v1243_v55, %v4117_v42 }
 0x243   : > { %v1418_v28 = vsel %vm612_vm2, %v1313_v43, %v1417_v52 }
 0x244   : > { %v1213_v54 = vpop.permute.xlu1 %1212 }
 0x245   : > { %v1317_v19 = vrot.slane %v1213_v54, %v4117_v42  ;;  %v1249_v54 = vpop.permute.xlu0 %1248 }
 0x246   : > { %v1365_v0 = vrot.slane %v1249_v54, %v4117_v42 }
 0x247   : > { %v1419_v8 = vsel %vm614_vm3, %v1317_v19, %v1418_v28 }
 0x248   : > { %v1216_v26 = vpop.permute.xlu1 %1215  ;;  %v1449_v7 = vsel %vm645_vm4, %v1419_v8, 0.0 }
 0x249   : > { %1450 = vadd.xlane.f32.xlu0 %v1449_v7  ;;  %v1321_v2 = vrot.slane %v1216_v26, %v4117_v42  ;;  %v1255_v7 = vpop.permute.xlu0 %1254 }
 0x24a   : > { %v1373_v55 = vrot.slane %v1255_v7, %v4117_v42  ;;  %v1521_v7 = vrot.slane %v4364_v41, %v4117_v42 }
 0x24b   : > { %v1420_v38 = vsel %vm610_vm1, %v1325_v37, %v1321_v2 }
 0x24c   : > { %v1222_v14 = vpop.permute.xlu1 %1221 }
 0x24d   : > { %v1329_v3 = vrot.slane %v1222_v14, %v4117_v42 }
 0x24f   : > { %v1421_v43 = vsel %vm612_vm2, %v1329_v3, %v1420_v38 }
 0x250   : > { %v1228_v52 = vpop.permute.xlu1 %1227  ;;  %v1422_v19 = vsel %vm614_vm3, %v1333_v9, %v1421_v43 }
 0x251   : > { %v1452_v28 = vsel %vm645_vm4, %v1422_v19, 0.0  ;;  %v1337_v8 = vrot.slane %v1228_v52, %v4117_v42  ;;  %v1261_v52 = vpop.permute.xlu0 %1260 }
 0x252   : > { %1453 = vadd.xlane.f32.xlu0 %v1452_v28  ;;  %v1381_v54 = vrot.slane %v1261_v52, %v4117_v42 }
 0x253   : > { %v1423_v2 = vsel %vm610_vm1, %v1341_v59, %v1337_v8 }
 0x254   : > { %v1234_v26 = vpop.permute.xlu1 %1233 }
 0x255   : > { %v1345_v14 = vrot.slane %v1234_v26, %v4117_v42 }
 0x257   : > { %v1424_v3 = vsel %vm612_vm2, %v1345_v14, %v1423_v2 }
 0x258   : > { %v1240_v37 = vpop.permute.xlu1 %1239  ;;  %v1425_v9 = vsel %vm614_vm3, %v1349_v50, %v1424_v3  ;;  %v1267_v50 = vpop.permute.xlu0 %1266 }
 0x259   : > { %v1455_v38 = vsel %vm645_vm4, %v1425_v9, 0.0  ;;  %v1353_v43 = vrot.slane %v1240_v37, %v4117_v42 }
 0x25a   : > { %1456 = vadd.xlane.f32.xlu0 %v1455_v38 }
 0x25b   : > { %v1426_v8 = vsel %vm610_vm1, %v1357_v56, %v1353_v43 }
 0x25c   : > { %v1246_v19 = vpop.permute.xlu1 %1245  ;;  %v1273_v43 = vpop.permute.xlu0 %1272 }
 0x25d   : > { %v1361_v28 = vrot.slane %v1246_v19, %v4117_v42  ;;  %v1517_v19 = vrot.slane %v4360_v53, %v4117_v42 }
 0x25f   : > { %v1427_v59 = vsel %vm612_vm2, %v1361_v28, %v1426_v8 }
 0x260   : > { %v1252_v26 = vpop.permute.xlu1 %1251  ;;  %v1428_v14 = vsel %vm614_vm3, %v1365_v0, %v1427_v59  ;;  %v1513_v59 = vrot.slane %v4362_v57, %v4117_v42 }
 0x261   : > { %v1458_v2 = vsel %vm645_vm4, %v1428_v14, 0.0  ;;  %v1369_v3 = vrot.slane %v1252_v26, %v4117_v42  ;;  %v1525_v26 = vrot.slane %v4366_v46, %v4117_v42  ;;  %v1529_v14 = vrot.slane %v4368_v58, %v4117_v42 }
 0x262   : > { %1459 = vadd.xlane.f32.xlu1 %v1458_v2  ;;  %v1389_v2 = vrot.slane %v1267_v50, %v4117_v42 }
 0x263   : > { %v1429_v38 = vsel %vm610_vm1, %v1373_v55, %v1369_v3  ;;  %v1533_v55 = vrot.slane %v4370_v51, %v4117_v42 }
 0x264   : > { %v1258_v37 = vpop.permute.xlu1 %1257 }
 0x265   : > { %v1377_v9 = vrot.slane %v1258_v37, %v4117_v42  ;;  %v1542_v37 = vsel %vm610_vm1, %v1517_v19, %v1513_v59 }
 0x267   : > { %v1430_v56 = vsel %vm612_vm2, %v1377_v9, %v1429_v38  ;;  %v1279_v9 = vpop.permute.xlu0 %1278  ;;  %v1537_v38 = vrot.slane %v4372_v13, %v4117_v42 }
 0x268   : > { %v1264_v28 = vpop.permute.xlu1 %1263  ;;  %v1431_v0 = vsel %vm614_vm3, %v1381_v54, %v1430_v56  ;;  %v1543_v56 = vsel %vm612_vm2, %v1521_v7, %v1542_v37 }
 0x269   : > { %v1461_v8 = vsel %vm645_vm4, %v1431_v0, 0.0  ;;  %v1385_v52 = vrot.slane %v1264_v28, %v4117_v42  ;;  %v1397_v28 = vrot.slane %v1273_v43, %v4117_v42  ;;  %v1541_v0 = vrot.slane %v4374_v61, %v4117_v42 }
 0x26a   : > { %1462 = vadd.xlane.f32.xlu0 %v1461_v8  ;;  %v1544_v8 = vsel %vm614_vm3, %v1525_v26, %v1543_v56 }
 0x26b   : > { %v1432_v50 = vsel %vm610_vm1, %v1389_v2, %v1385_v52  ;;  %v1546_v59 = vsel %vm1545_vm5, %v1529_v14, %v1544_v8  ;;  %v1285_v37 = vpop.permute.xlu0 %1284  ;;  %v1405_v14 = vrot.slane %v1279_v9, %v4117_v42  ;;  %v4470_v9 = vsub.f32 %v4360_v53, %v4309_v5 }
 0x26c   : > { %v1270_v3 = vpop.permute.xlu1 %1269  ;;  %v1548_v7 = vsel %vm1547_vm7, %v1533_v55, %v1546_v59  ;;  %v1413_v55 = vrot.slane %v1285_v37, %v4117_v42  ;;  %v4475_v8 = vsub.f32 %v4364_v41, %v4316_v27  ;;  %v4484_v59 = vsub.f32 %v4362_v57, %v4307_v1 }
 0x26d   : > { %v1393_v54 = vrot.slane %v1270_v3, %v4117_v42  ;;  %v1550_v52 = vsel %vm1549_vm6, %v1537_v38, %v1548_v7  ;;  %6012 = vst [vmem:[#allocation57_spill] sm:$0xff] %v4470_v9  ;;  %v1075_v5 = vrot.slane %v5981_v25, 7  ;;  %v4492_v27 = vsub.f32 %v4370_v51, %v4319_v31 }
 0x26e   : > { %v1552_v26 = vsel %vm1551_vm8, %v1541_v0, %v1550_v52  ;;  %6013 = vst [vmem:[#allocation58_spill] sm:$0xff] %v4475_v8  ;;  %6015 = vst [vmem:[#allocation60_spill] sm:$0xff] %v4484_v59  ;;  %v1078_v7 = vrot.slane %v5983_v30, 5  ;;  %v1096_v52 = vrot.slane %v5990_v33, 7  ;;  %v4507_v31 = vsub.f32 %v4374_v61, %v4325_v39 }
 0x26f   : > { %v1433_v19 = vsel %vm612_vm2, %v1393_v54, %v1432_v50  ;;  %6016 = vst [vmem:[#allocation61_spill] sm:$0xff] %v4492_v27  ;;  %v4513_v37 = vsub.f32 %v4372_v13, %v4327_v40  ;;  %v1101_v39 = vrot.slane %v5991_v12, 4 }
 0x270   : > { %v1276_v3 = vpop.permute.xlu1 %1275  ;;  %v1434_v49 = vsel %vm614_vm3, %v1397_v28, %v1433_v19  ;;  %v1555_v28 = vsel %vm1554_vm9, %v1552_v26, 0.0  ;;  %v4480_v19 = vsub.f32 %v4366_v46, %v4314_v24  ;;  %v4497_v24 = vsub.f32 %v4368_v58, %v4321_v35  ;;  %6018 = vst [vmem:[#allocation63_spill] sm:$0xff] %v4507_v31 }
 0x271   : > { %v1464_v43 = vsel %vm645_vm4, %v1434_v49, 0.0  ;;  %v1401_v2 = vrot.slane %v1276_v3, %v4117_v42  ;;  %v1076_v3 = vrot.slane %v3786_v16, 6  ;;  %v1099_v35 = vrot.slane %v3886_v60, 5  ;;  %6019 = vst [vmem:[#allocation64_spill] sm:$0xff] %v4513_v37 }
 0x272   : > { %1465 = vadd.xlane.f32.xlu1 %v1464_v43  ;;  %6014 = vst [vmem:[#allocation59_spill] sm:$0xff] %v4480_v19  ;;  %6017 = vst [vmem:[#allocation62_spill] sm:$0xff] %v4497_v24  ;;  %v1097_v43 = vrot.slane %v5989_v36, 6 }
 0x273   : > { %v1435_v49 = vsel %vm610_vm1, %v1405_v14, %v1401_v2  ;;  %v1077_v1 = vsel %vm610_vm1, %v1076_v3, %v1075_v5  ;;  %v1080_v2 = vrot.slane %v5986_v32, 4  ;;  %v1104_v14 = vrot.slane %v5992_v44, 6 }
 0x274   : > { %v1282_v54 = vpop.permute.xlu1 %1281  ;;  %v1079_v26 = vsel %vm612_vm2, %v1078_v7, %v1077_v1  ;;  %v1055_v5 = vrot.slane %v3733_v11, 6 }
 0x275   : > { %v1409_v56 = vrot.slane %v1282_v54, %v4117_v42  ;;  %v1098_v54 = vsel %vm610_vm1, %v1097_v43, %v1096_v52  ;;  %v1054_v43 = vrot.slane %v3724_v6, 7  ;;  %v1057_v52 = vrot.slane %v3722_v4, 5 }
 0x276   : > { %1556 = vadd.xlane.f32.xlu1 %v1555_v28  ;;  %v4523_v28 = vsub.f32 %v4362_v57, %v4332_v47  ;;  %v1100_v40 = vsel %vm612_vm2, %v1099_v35, %v1098_v54  ;;  %v4537_v47 = vsub.f32 %v4360_v53, %v4330_v29  ;;  %v4551_v29 = vsub.f32 %v4364_v41, %v4338_v48  ;;  %v6046_v57 = vld [vmem:[#allocation14_spill] sm:$0xff] }
 0x277   : > { %v1436_v38 = vsel %vm612_vm2, %v1409_v56, %v1435_v49  ;;  %v1103_v56 = vrot.slane %v5993_v22, 7  ;;  %v1106_v49 = vrot.slane %v5994_v20, 5  ;;  %v1102_v3 = vsel %vm614_vm3, %v1101_v39, %v1100_v40  ;;  %v6051_v53 = vld [vmem:[#allocation46_spill] sm:$0xff] }
 0x278   : > { %v1437_v50 = vsel %vm614_vm3, %v1413_v55, %v1436_v38  ;;  %6020 = vst [vmem:[#allocation65_spill] sm:$0xff] %v4523_v28  ;;  %v1081_v55 = vsel %vm614_vm3, %v1080_v2, %v1079_v26  ;;  %6022 = vst [vmem:[#allocation67_spill] sm:$0xff] %v4537_v47  ;;  %v4543_v1 = vsub.f32 %v4376_v21, %v1102_v3  ;;  %v1062_v35 = vrot.slane %v3740_v15, 6 }
 0x279   : > { %v1467_v0 = vsel %vm645_vm4, %v1437_v50, 0.0  ;;  %v4529_v38 = vsub.f32 %v4354_v34, %v1081_v55  ;;  %v1105_v50 = vsel %vm610_vm1, %v1104_v14, %v1103_v56  ;;  %6024 = vst [vmem:[#allocation69_spill] sm:$0xff] %v4551_v29  ;;  %v1056_v26 = vsel %vm610_vm1, %v1055_v5, %v1054_v43  ;;  %v6026_v56 = vld [vmem:[#allocation5_spill] sm:$0xff]  ;;  %v6027_v55 = vld [vmem:[#allocation7_spill] sm:$0xff]  ;;  %v6031_v43 = vld [vmem:[#allocation6_spill] sm:$0xff] }
 0x27a   : > { %1468 = vadd.xlane.f32.xlu0 %v1467_v0  ;;  %v1108_v0 = vrot.slane %v5995_v62, 4  ;;  %v1107_v7 = vsel %vm612_vm2, %v1106_v49, %v1105_v50  ;;  %6023 = vst [vmem:[#allocation68_spill] sm:$0xff] %v4543_v1  ;;  %v1061_v14 = vrot.slane %v3742_v18, 7  ;;  %v1059_v39 = vrot.slane %v6026_v56, 4  ;;  %v6030_v5 = vld [vmem:[#allocation9_spill] sm:$0xff] }
 0x27b   : > { %6021 = vst [vmem:[#allocation66_spill] sm:$0xff] %v4529_v38  ;;  %v1064_v48 = vrot.slane %v6027_v55, 5  ;;  %v4566_v40 = vsub.f32 %v4366_v46, %v4336_v17  ;;  %v1058_v49 = vsel %vm612_vm2, %v1057_v52, %v1056_v26  ;;  %v6034_v26 = vld [vmem:[#allocation10_spill] sm:$0xff] }
 0x27c   : > { %v1109_v2 = vsel %vm614_vm3, %v1108_v0, %v1107_v7  ;;  %v1063_v50 = vsel %vm610_vm1, %v1062_v35, %v1061_v14  ;;  %v6029_v0 = vld [vmem:[#allocation8_spill] sm:$0xff]  ;;  %v1068_v7 = vrot.slane %v6030_v5, 7  ;;  %v1073_v35 = vrot.slane %v6034_v26, 4 }
 0x27d   : > { %v4558_v54 = vsub.f32 %v4378_v23, %v1109_v2  ;;  %6028 = vst [vmem:[#allocation5_spill] sm:$0xff] %v4566_v40  ;;  %v1069_v3 = vrot.slane %v6029_v0, 6  ;;  %v1066_v2 = vrot.slane %v6031_v43, 4 }
 0x27f   : > { %6025 = vst [vmem:[#allocation70_spill] sm:$0xff] %v4558_v54  ;;  %v1070_v52 = vsel %vm610_vm1, %v1069_v3, %v1068_v7  ;;  %v6038_v3 = vld [vmem:[#allocation18_spill] sm:$0xff] }
 0x280   : > { %v6039_v7 = vld [vmem:[#allocation22_spill] sm:$0xff] }
 0x287   : > { %1634 = vperm.xlu1 %3373, %v4470_v9   ;;  %v6048_v9 = vld [vmem:[#allocation17_spill] sm:$0xff] }
 0x28b   : > { %1637 = vperm.xlu1 %3373, %v4475_v8  }
 0x28f   : > { %1640 = vperm.xlu1 %3373, %v4480_v19  }
 0x290   : > { %1631 = vperm.xlu0 %3372, %v4484_v59  }
 0x293   : > { %1646 = vperm.xlu1 %3373, %v4492_v27  }
 0x294   : > { %1643 = vperm.xlu0 %3372, %v4497_v24  }
 0x297   : > { %1652 = vperm.xlu1 %3373, %v4507_v31   ;;  %v6044_v31 = vld [vmem:[#allocation20_spill] sm:$0xff] }
 0x298   : > { %1649 = vperm.xlu0 %3372, %v4513_v37   ;;  %v1087_v37 = vrot.slane %v6044_v31, 4  ;;  %v6054_v31 = vld [vmem:[#allocation47_spill] sm:$0xff] }
 0x29b   : > { %1770 = vperm.xlu1 %3373, %v4523_v28   ;;  %v1060_v28 = vsel %vm614_vm3, %v1059_v39, %v1058_v49  ;;  %v6037_v49 = vld [vmem:[#allocation34_spill] sm:$0xff] }
 0x29c   : > { %2033 = vperm.xlu0 %3372, %v4529_v38   ;;  %v4578_v17 = vsub.f32 %v4350_v45, %v1060_v28 }
 0x29e   : > { %6033 = vst [vmem:[#allocation7_spill] sm:$0xff] %v4578_v17 }
 0x29f   : > { %1773 = vperm.xlu1 %3373, %v4537_v47   ;;  %v6032_v47 = vld [vmem:[#allocation11_spill] sm:$0xff] }
 0x2a0   : > { %2042 = vperm.xlu0 %3372, %v4543_v1  }
 0x2a3   : > { %1776 = vperm.xlu1 %3373, %v4551_v29   ;;  %v1065_v29 = vsel %vm612_vm2, %v1064_v48, %v1063_v50 }
 0x2a4   : > { %2045 = vperm.xlu0 %3372, %v4558_v54   ;;  %v1071_v54 = vrot.slane %v6032_v47, 5  ;;  %v1067_v14 = vsel %vm614_vm3, %v1066_v2, %v1065_v29  ;;  %v1083_v29 = vrot.slane %v6038_v3, 6  ;;  %v6040_v2 = vld [vmem:[#allocation19_spill] sm:$0xff] }
 0x2a5   : > { %v4586_v1 = vsub.f32 %v4348_v10, %v1067_v14  ;;  %v6041_v14 = vld [vmem:[#allocation23_spill] sm:$0xff] }
 0x2a6   : > { %v1089_v38 = vrot.slane %v6041_v14, 7 }
 0x2a7   : > { %1779 = vperm.xlu1 %3373, %v4566_v40   ;;  %v1072_v40 = vsel %vm612_vm2, %v1071_v54, %v1070_v52  ;;  %6035 = vst [vmem:[#allocation8_spill] sm:$0xff] %v4586_v1  ;;  %v1090_v54 = vrot.slane %v6039_v7, 6  ;;  %v1082_v52 = vrot.slane %v6040_v2, 7 }
 0x2a8   : > { %v1074_v39 = vsel %vm614_vm3, %v1073_v35, %v1072_v40  ;;  %v6043_v40 = vld [vmem:[#allocation25_spill] sm:$0xff] }
 0x2a9   : > { %v4591_v28 = vsub.f32 %v4352_v63, %v1074_v39  ;;  %v1092_v35 = vrot.slane %v6043_v40, 5  ;;  %v1084_v39 = vsel %vm610_vm1, %v1083_v29, %v1082_v52 }
 0x2ab   : > { %2024 = vperm.xlu1 %3373, %v4578_v17   ;;  %6036 = vst [vmem:[#allocation9_spill] sm:$0xff] %v4591_v28 }
 0x2af   : > { %2027 = vperm.xlu1 %3373, %v4586_v1   ;;  %v6042_v1 = vld [vmem:[#allocation21_spill] sm:$0xff] }
 0x2b0   : > { %v1085_v17 = vrot.slane %v6042_v1, 5 }
 0x2b2   : > { %v1086_v19 = vsel %vm612_vm2, %v1085_v17, %v1084_v39 }
 0x2b3   : > { %2030 = vperm.xlu1 %3373, %v4591_v28   ;;  %v1091_v28 = vsel %vm610_vm1, %v1090_v54, %v1089_v38  ;;  %v1088_v8 = vsel %vm614_vm3, %v1087_v37, %v1086_v19  ;;  %v6050_v54 = vld [vmem:[#allocation39_spill] sm:$0xff] }
 0x2b4   : > { %v1093_v27 = vsel %vm612_vm2, %v1092_v35, %v1091_v28  ;;  %v4610_v41 = vsub.f32 %v6046_v57, %v1088_v8  ;;  %v6052_v35 = vld [vmem:[#allocation38_spill] sm:$0xff] }
 0x2b6   : > { %6047 = vst [vmem:[#allocation6_spill] sm:$0xff] %v4610_v41 }
 0x2c6   : > { %v1448_v48 = vpop.xlane.xlu1 %1447 }
 0x2c7   : > { %v1478_v50 = vsub.f32 %v1448_v48, %v6037_v49  ;;  %v6045_v49 = vld [vmem:[#allocation24_spill] sm:$0xff]  ;;  %v2304_v38 = vrot.slane %v1448_v48, %v4117_v42  ;;  %v4618_v23 = vsub.f32 %v1448_v48, %v6051_v53  ;;  %v2360_v61 = vrot.slane %v1448_v48, 2 }
 0x2c8   : > { %v1094_v46 = vrot.slane %v6045_v49, 4  ;;  %v2392_v53 = vrot.slane %v1448_v48, 1  ;;  %v2344_v22 = vrot.slane %v1448_v48, 3 }
 0x2c9   : > { %2417 = vperm.xlu1 %3373, %v1478_v50   ;;  %v2531_v17 = vrot.slane %v1478_v50, 1  ;;  %v2483_v19 = vrot.slane %v1478_v50, 3  ;;  %v2622_v20 = vrot.slane %v4618_v23, 3  ;;  %v2638_v33 = vrot.slane %v4618_v23, 2 }
 0x2ca   : > { %v1095_v59 = vsel %vm614_vm3, %v1094_v46, %v1093_v27  ;;  %v2499_v46 = vrot.slane %v1478_v50, 2 }
 0x2cb   : > { %v4613_v29 = vsub.f32 %v6048_v9, %v1095_v59 }
 0x2cd   : > { %6049 = vst [vmem:[#allocation11_spill] sm:$0xff] %v4613_v29 }
 0x2d6   : > { %v1451_v24 = vpop.xlane.xlu0 %1450 }
 0x2d7   : > { %v1479_v52 = vsub.f32 %v1451_v24, %v6050_v54  ;;  %v2361_v28 = vrot.slane %v1451_v24, 1  ;;  %v4621_v39 = vsub.f32 %v1451_v24, %v6052_v35  ;;  %v2308_v21 = vrot.slane %v1451_v24, %v4117_v42 }
 0x2d8   : > { %v2345_v54 = vrot.slane %v1451_v24, 2  ;;  %v2376_v62 = vrot.slane %v1451_v24, 7 }
 0x2d9   : > { %2420 = vperm.xlu1 %3373, %v1479_v52   ;;  %v2484_v8 = vrot.slane %v1479_v52, 2  ;;  %v2500_v27 = vrot.slane %v1479_v52, 1  ;;  %v2515_v37 = vrot.slane %v1479_v52, 7  ;;  %v2532_v59 = vsel %vm610_vm1, %v1479_v52, %v2531_v17 }
 0x2da   : > { %v2623_v12 = vrot.slane %v4621_v39, 2  ;;  %v2393_v52 = vsel %vm610_vm1, %v1451_v24, %v2392_v53  ;;  %v2362_v17 = vsel %vm610_vm1, %v2361_v28, %v2360_v61  ;;  %v2639_v60 = vrot.slane %v4621_v39, 1  ;;  %v6053_v28 = vld [vmem:[#allocation41_spill] sm:$0xff] }
 0x2db   : > { %v2485_v57 = vsel %vm610_vm1, %v2484_v8, %v2483_v19  ;;  %v2501_v9 = vsel %vm610_vm1, %v2500_v27, %v2499_v46  ;;  %v2516_v35 = vsel %vm610_vm1, %v2515_v37, %v1478_v50  ;;  %v2670_v19 = vrot.slane %v4618_v23, 1 }
 0x2dc   : > { %v2333_v50 = vsel %vm610_vm1, %v2308_v21, %v2304_v38  ;;  %v2346_v8 = vsel %vm610_vm1, %v2345_v54, %v2344_v22  ;;  %v2377_v27 = vsel %vm610_vm1, %v2376_v62, %v1448_v48  ;;  %v2654_v37 = vrot.slane %v4621_v39, 7 }
 0x2dd   : > { %2036 = vperm.xlu1 %3373, %v4610_v41   ;;  %v2624_v21 = vsel %vm610_vm1, %v2623_v12, %v2622_v20  ;;  %v2640_v38 = vsel %vm610_vm1, %v2639_v60, %v2638_v33 }
 0x2de   : > { %v2655_v60 = vsel %vm610_vm1, %v2654_v37, %v4618_v23 }
 0x2df   : > { %v1454_v46 = vpop.xlane.xlu0 %1453 }
 0x2e0   : > { %v2312_v44 = vrot.slane %v1454_v46, %v4117_v42  ;;  %v2347_v24 = vrot.slane %v1454_v46, 1  ;;  %v2363_v53 = vsel %vm612_vm2, %v1454_v46, %v2362_v17  ;;  %v2378_v41 = vrot.slane %v1454_v46, 6 }
 0x2e1   : > { %v2394_v61 = vrot.slane %v1454_v46, 7  ;;  %v1480_v49 = vsub.f32 %v1454_v46, %v6053_v28  ;;  %v4644_v14 = vsub.f32 %v1454_v46, %v6054_v31  ;;  %v2671_v46 = vsel %vm610_vm1, %v4621_v39, %v2670_v19 }
 0x2e2   : > { %v2334_v22 = vsel %vm612_vm2, %v2312_v44, %v2333_v50  ;;  %v2348_v62 = vsel %vm612_vm2, %v2347_v24, %v2346_v8  ;;  %v2379_v48 = vsel %vm612_vm2, %v2378_v41, %v2377_v27  ;;  %v1126_v50 = vrot.slane %v3733_v11, 7 }
 0x2e3   : > { %2423 = vperm.xlu1 %3373, %v1480_v49   ;;  %v2395_v54 = vsel %vm612_vm2, %v2394_v61, %v2393_v52  ;;  %v2486_v17 = vrot.slane %v1480_v49, 1  ;;  %v2502_v36 = vsel %vm612_vm2, %v1480_v49, %v2501_v9  ;;  %v2517_v28 = vrot.slane %v1480_v49, 6 }
 0x2e4   : > { %v2533_v2 = vrot.slane %v1480_v49, 7  ;;  %v2625_v31 = vrot.slane %v4644_v14, 1  ;;  %v2641_v12 = vsel %vm612_vm2, %v4644_v14, %v2640_v38  ;;  %v2656_v44 = vrot.slane %v4644_v14, 6 }
 0x2e5   : > { %v2487_v20 = vsel %vm612_vm2, %v2486_v17, %v2485_v57  ;;  %v2518_v41 = vsel %vm612_vm2, %v2517_v28, %v2516_v35  ;;  %v2672_v33 = vrot.slane %v4644_v14, 7 }
 0x2e6   : > { %v2534_v9 = vsel %vm612_vm2, %v2533_v2, %v2532_v59  ;;  %v2626_v49 = vsel %vm612_vm2, %v2625_v31, %v2624_v21  ;;  %v2657_v52 = vsel %vm612_vm2, %v2656_v44, %v2655_v60  ;;  %v1132_v2 = vrot.slane %v3740_v15, 7  ;;  %v6055_v59 = vld [vmem:[#allocation35_spill] sm:$0xff]  ;;  %v6056_v21 = vld [vmem:[#allocation40_spill] sm:$0xff] }
 0x2e7   : > { %2039 = vperm.xlu1 %3373, %v4613_v29   ;;  %v1457_v57 = vpop.xlane.xlu0 %1456  ;;  %v2673_v35 = vsel %vm612_vm2, %v2672_v33, %v2671_v46  ;;  %v6061_v29 = vld [vmem:[#allocation42_spill] sm:$0xff] }
 0x2e8   : > { %v2316_v8 = vrot.slane %v1457_v57, %v4117_v42  ;;  %v2364_v27 = vrot.slane %v1457_v57, 7  ;;  %v2380_v37 = vrot.slane %v1457_v57, 5  ;;  %v2396_v24 = vrot.slane %v1457_v57, 6 }
 0x2e9   : > { %v1481_v61 = vsub.f32 %v1457_v57, %v6055_v59  ;;  %v4674_v38 = vsub.f32 %v1457_v57, %v6056_v21  ;;  %v2349_v19 = vsel %vm614_vm3, %v1457_v57, %v2348_v62  ;;  %v4700_v59 = vsel %vm610_vm1, %v1126_v50, %v3724_v6 }
 0x2ea   : > { %v2335_v11 = vsel %vm614_vm3, %v2316_v8, %v2334_v22  ;;  %v2365_v17 = vsel %vm614_vm3, %v2364_v27, %v2363_v53  ;;  %v2381_v28 = vsel %vm614_vm3, %v2380_v37, %v2379_v48  ;;  %v4681_v31 = vsel %vm614_vm3, %v2396_v24, %v2395_v54 }
 0x2eb   : > { %2426 = vperm.xlu1 %3373, %v1481_v61   ;;  %v2488_v44 = vsel %vm614_vm3, %v1481_v61, %v2487_v20  ;;  %v2503_v15 = vrot.slane %v1481_v61, 7  ;;  %v2519_v60 = vrot.slane %v1481_v61, 5  ;;  %v2535_v33 = vrot.slane %v1481_v61, 6  ;;  %v6058_v61 = vld [vmem:[#allocation48_spill] sm:$0xff] }
 0x2ec   : > { %v2627_v46 = vsel %vm614_vm3, %v4674_v38, %v2626_v49  ;;  %v2642_v62 = vrot.slane %v4674_v38, 7  ;;  %v2658_v22 = vrot.slane %v4674_v38, 5  ;;  %v2674_v53 = vrot.slane %v4674_v38, 6 }
 0x2ed   : > { %v1138_v48 = vrot.slane %v6029_v0, 7  ;;  %v2504_v54 = vsel %vm614_vm3, %v2503_v15, %v2502_v36  ;;  %v2520_v57 = vsel %vm614_vm3, %v2519_v60, %v2518_v41  ;;  %v2536_v20 = vsel %vm614_vm3, %v2535_v33, %v2534_v9  ;;  %v6057_v9 = vld [vmem:[#allocation43_spill] sm:$0xff] }
 0x2ee   : > { %v2643_v8 = vsel %vm614_vm3, %v2642_v62, %v2641_v12  ;;  %v2659_v27 = vsel %vm614_vm3, %v2658_v22, %v2657_v52  ;;  %v2675_v49 = vsel %vm614_vm3, %v2674_v53, %v2673_v35  ;;  %v1133_v36 = vsel %vm610_vm1, %v1132_v2, %v3742_v18 }
 0x2ef   : > { %v1460_v0 = vpop.xlane.xlu1 %1459  ;;  %v1134_v21 = vrot.slane %v6027_v55, 6  ;;  %v1139_v6 = vsel %vm610_vm1, %v1138_v48, %v6030_v5  ;;  %v1140_v50 = vrot.slane %v6032_v47, 6 }
 0x2f0   : > { %v1482_v12 = vsub.f32 %v1460_v0, %v6057_v9  ;;  %v4707_v52 = vsub.f32 %v1460_v0, %v6058_v61  ;;  %v2320_v35 = vrot.slane %v1460_v0, %v4117_v42  ;;  %v2350_v18 = vrot.slane %v1460_v0, 7 }
 0x2f1   : > { %v2366_v2 = vrot.slane %v1460_v0, 6  ;;  %v2382_v22 = vrot.slane %v1460_v0, 4  ;;  %v2398_v53 = vrot.slane %v1460_v0, 5 }
 0x2f2   : > { %6059 = vst [vmem:[#allocation10_spill] sm:$0xff] %v4707_v52  ;;  %2429 = vperm.xlu1 %3373, %v1482_v12   ;;  %v2489_v60 = vrot.slane %v1482_v12, 7  ;;  %v2505_v33 = vrot.slane %v1482_v12, 6  ;;  %v2336_v62 = vsel %vm1545_vm5, %v2320_v35, %v2335_v11  ;;  %v2521_v9 = vrot.slane %v1482_v12, 4 }
 0x2f3   : > { %v2537_v24 = vrot.slane %v1482_v12, 5  ;;  %v2628_v41 = vrot.slane %v4707_v52, 7  ;;  %v2644_v47 = vrot.slane %v4707_v52, 6  ;;  %v2660_v48 = vrot.slane %v4707_v52, 4 }
 0x2f4   : > { %v2490_v61 = vsel %vm1545_vm5, %v2489_v60, %v2488_v44  ;;  %v2506_v55 = vsel %vm1545_vm5, %v2505_v33, %v2504_v54  ;;  %v2522_v5 = vsel %vm1545_vm5, %v2521_v9, %v2520_v57  ;;  %v2676_v37 = vrot.slane %v4707_v52, 5  ;;  %v6060_v9 = vld [vmem:[#allocation36_spill] sm:$0xff] }
 0x2f5   : > { %v2351_v11 = vsel %vm1545_vm5, %v2350_v18, %v2349_v19  ;;  %v2367_v0 = vsel %vm1545_vm5, %v2366_v2, %v2365_v17  ;;  %v2538_v35 = vsel %vm1545_vm5, %v2537_v24, %v2536_v20  ;;  %v2629_v44 = vsel %vm1545_vm5, %v2628_v41, %v2627_v46 }
 0x2f6   : > { %v2383_v12 = vsel %vm1545_vm5, %v2382_v22, %v2381_v28  ;;  %v2645_v60 = vsel %vm1545_vm5, %v2644_v47, %v2643_v8  ;;  %v2661_v57 = vsel %vm1545_vm5, %v2660_v48, %v2659_v27  ;;  %v2677_v33 = vsel %vm1545_vm5, %v2676_v37, %v2675_v49 }
 0x2f7   : > { %v1463_v54 = vpop.xlane.xlu0 %1462  ;;  %v2399_v46 = vsel %vm1545_vm5, %v2398_v53, %v4681_v31 }
 0x2f8   : > { %v1483_v15 = vsub.f32 %v1463_v54, %v6060_v9  ;;  %v4733_v52 = vsub.f32 %v1463_v54, %v6061_v29  ;;  %v2324_v19 = vrot.slane %v1463_v54, %v4117_v42  ;;  %v2352_v17 = vrot.slane %v1463_v54, 6 }
 0x2f9   : > { %v2368_v20 = vrot.slane %v1463_v54, 5  ;;  %v2384_v24 = vrot.slane %v1463_v54, 3  ;;  %v2400_v28 = vrot.slane %v1463_v54, 4  ;;  %v1135_v54 = vsel %vm612_vm2, %v1134_v21, %v1133_v36  ;;  %v6074_v36 = vld [vmem:[#allocation13_spill] sm:$0xff] }
 0x2fa   : > { %2432 = vperm.xlu1 %3373, %v1483_v15   ;;  %v2337_v8 = vsel %vm1547_vm7, %v2324_v19, %v2336_v62  ;;  %v2353_v27 = vsel %vm1547_vm7, %v2352_v17, %v2351_v11  ;;  %v2491_v49 = vrot.slane %v1483_v15, 6  ;;  %v2507_v37 = vrot.slane %v1483_v15, 5 }
 0x2fb   : > { %v2369_v41 = vsel %vm1547_vm7, %v2368_v20, %v2367_v0  ;;  %v2385_v29 = vsel %vm1547_vm7, %v2384_v24, %v2383_v12  ;;  %v4743_v18 = vsel %vm1547_vm7, %v2400_v28, %v2399_v46  ;;  %v2523_v2 = vrot.slane %v1483_v15, 3  ;;  %v6066_v20 = vld [vmem:[#allocation49_spill] sm:$0xff] }
 0x2fc   : > { %v2492_v22 = vsel %vm1547_vm7, %v2491_v49, %v2490_v61  ;;  %v2508_v31 = vsel %vm1547_vm7, %v2507_v37, %v2506_v55  ;;  %v2539_v53 = vrot.slane %v1483_v15, 4  ;;  %v2630_v47 = vrot.slane %v4733_v52, 6 }
 0x2fd   : > { %v2524_v62 = vsel %vm1547_vm7, %v2523_v2, %v2522_v5  ;;  %v2646_v48 = vrot.slane %v4733_v52, 5  ;;  %v2662_v11 = vrot.slane %v4733_v52, 3  ;;  %v2678_v0 = vrot.slane %v4733_v52, 4 }
 0x2fe   : > { %v1142_v12 = vrot.slane %v6034_v26, 5  ;;  %v2540_v9 = vsel %vm1547_vm7, %v2539_v53, %v2538_v35  ;;  %v2631_v61 = vsel %vm1547_vm7, %v2630_v47, %v2629_v44  ;;  %v4757_v15 = vsel %vm612_vm2, %v1140_v50, %v1139_v6  ;;  %v6063_v6 = vld [vmem:[#allocation45_spill] sm:$0xff] }
 0x2ff   : > { %v1466_v55 = vpop.xlane.xlu1 %1465  ;;  %v4760_v5 = vsel %vm1547_vm7, %v2646_v48, %v2645_v60  ;;  %v4763_v19 = vsel %vm1547_vm7, %v2662_v11, %v2661_v57  ;;  %v4766_v17 = vsel %vm1547_vm7, %v2678_v0, %v2677_v33  ;;  %v6062_v21 = vrot.slane %v3786_v16, 7  ;;  %v6070_v11 = vld [vmem:[#allocation16_spill] sm:$0xff] }
 0x300   : > { %v1484_v50 = vsub.f32 %v1466_v55, %v6063_v6  ;;  %v6064_v44 = vrot.slane %v3722_v4, 6  ;;  %v6065_v57 = vrot.slane %v6031_v43, 5  ;;  %v4784_v24 = vsub.f32 %v1466_v55, %v6066_v20 }
 0x301   : > { %v4773_v35 = vsel %vm610_vm1, %v6062_v21, %v5981_v25  ;;  %v2328_v46 = vrot.slane %v1466_v55, %v4117_v42  ;;  %v2354_v16 = vrot.slane %v1466_v55, 5  ;;  %v2370_v25 = vrot.slane %v1466_v55, 4 }
 0x302   : > { %v1129_v60 = vsel %vm612_vm2, %v6064_v44, %v4700_v59  ;;  %v1137_v33 = vsel %vm614_vm3, %v6065_v57, %v1135_v54  ;;  %2435 = vperm.xlu0 %3372, %v1484_v50   ;;  %v2386_v28 = vrot.slane %v1466_v55, 2  ;;  %v2493_v49 = vrot.slane %v1484_v50, 5 }
 0x303   : > { %v2509_v37 = vrot.slane %v1484_v50, 4  ;;  %v4788_v4 = vpop.xlane.xlu1 %1556  ;;  %v6068_v59 = vrot.slane %v6026_v56, 5  ;;  %v4794_v53 = vsub.f32 %v4348_v10, %v1137_v33  ;;  %v2525_v47 = vrot.slane %v1484_v50, 2 }
 0x304   : > { %6067 = vst [vmem:[#allocation34_spill] sm:$0xff] %v4788_v4  ;;  %v4801_v0 = vsub.f32 %v4368_v58, %v6070_v11  ;;  %v2402_v54 = vrot.slane %v1466_v55, 3  ;;  %v2494_v21 = vsel %vm1549_vm6, %v2493_v49, %v2492_v22  ;;  %v2541_v44 = vrot.slane %v1484_v50, 3 }
 0x305   : > { %v1131_v43 = vsel %vm614_vm3, %v6068_v59, %v1129_v60  ;;  %6069 = vst [vmem:[#allocation18_spill] sm:$0xff] %v4794_v53  ;;  %v2510_v6 = vsel %vm1549_vm6, %v2509_v37, %v2508_v31  ;;  %v2526_v56 = vsel %vm1549_vm6, %v2525_v47, %v2524_v62  ;;  %v2632_v60 = vrot.slane %v4784_v24, 5  ;;  %v6072_v37 = vld [vmem:[#allocation37_spill] sm:$0xff] }
 0x306   : > { %v4797_v48 = vsub.f32 %v4350_v45, %v1131_v43  ;;  %6071 = vst [vmem:[#allocation22_spill] sm:$0xff] %v4801_v0  ;;  %v2338_v57 = vsel %vm1549_vm6, %v2328_v46, %v2337_v8  ;;  %v2355_v33 = vsel %vm1549_vm6, %v2354_v16, %v2353_v27  ;;  %v2371_v20 = vsel %vm1549_vm6, %v2370_v25, %v2369_v41  ;;  %v6073_v8 = vld [vmem:[#allocation44_spill] sm:$0xff] }
 0x307   : > { %v2387_v59 = vsel %vm1549_vm6, %v2386_v28, %v2385_v29  ;;  %v4812_v55 = vpop.permute.xlu1 %1634  ;;  %v1469_v22 = vpop.xlane.xlu0 %1468  ;;  %v2542_v31 = vsel %vm1549_vm6, %v2541_v44, %v2540_v9  ;;  %v2633_v62 = vsel %vm1549_vm6, %v2632_v60, %v2631_v61  ;;  %v2648_v50 = vrot.slane %v4784_v24, 4 }
 0x308   : > { %2163 = vperm.xlu0 %3372, %v4797_v48   ;;  %v2664_v49 = vrot.slane %v4784_v24, 2  ;;  %v1485_v43 = vsub.f32 %v1469_v22, %v6072_v37  ;;  %v4820_v46 = vsub.f32 %v1469_v22, %v6073_v8  ;;  %v2332_v27 = vrot.slane %v1469_v22, %v4117_v42 }
 0x309   : > { %v2680_v41 = vrot.slane %v4784_v24, 3  ;;  %v2356_v29 = vrot.slane %v1469_v22, 4  ;;  %v2372_v16 = vrot.slane %v1469_v22, 3  ;;  %v2388_v25 = vrot.slane %v1469_v22, 1 }
 0x30a   : > { %v2404_v28 = vrot.slane %v1469_v22, 2  ;;  %2438 = vperm.xlu1 %3373, %v1485_v43   ;;  %v4826_v9 = vsel %vm1551_vm8, %v2332_v27, %v2338_v57  ;;  %v2495_v61 = vrot.slane %v1485_v43, 4  ;;  %v2511_v47 = vrot.slane %v1485_v43, 3 }
 0x30b   : > { %v2527_v11 = vrot.slane %v1485_v43, 1  ;;  %v4828_v44 = vpop.permute.xlu1 %1637  ;;  %v4831_v60 = vsel %vm1551_vm8, %v2356_v29, %v2355_v33  ;;  %v4834_v37 = vsel %vm1551_vm8, %v2372_v16, %v2371_v20  ;;  %v4837_v8 = vsel %vm1551_vm8, %v2388_v25, %v2387_v59 }
 0x30c   : > { %1782 = vperm.xlu0 %3372, %v4801_v0   ;;  %v2403_v22 = vsel %vm1549_vm6, %v2402_v54, %v4743_v18  ;;  %v4843_v57 = vsub.f32 %v4370_v51, %v6074_v36  ;;  %v4849_v2 = vsel %vm1551_vm8, %v2495_v61, %v2494_v21  ;;  %v4852_v33 = vsel %vm1551_vm8, %v2511_v47, %v2510_v6 }
 0x30d   : > { %v4846_v27 = vsel %vm1551_vm8, %v2404_v28, %v2403_v22  ;;  %v4855_v20 = vsel %vm1551_vm8, %v2527_v11, %v2526_v56  ;;  %v2543_v59 = vrot.slane %v1485_v43, 2  ;;  %v2634_v29 = vrot.slane %v4820_v46, 4  ;;  %v6083_v11 = vld [vmem:[#allocation26_spill] sm:$0xff] }
 0x30e   : > { %6075 = vst [vmem:[#allocation21_spill] sm:$0xff] %v4843_v57  ;;  %6076 = vst [vmem:[#allocation25_spill] sm:$0xff] %v4846_v27  ;;  %v2649_v18 = vsel %vm1549_vm6, %v2648_v50, %v4760_v5  ;;  %2166 = vperm.xlu1 %3373, %v4794_v53   ;;  %v2650_v36 = vrot.slane %v4820_v46, 3  ;;  %v2665_v54 = vsel %vm1549_vm6, %v2664_v49, %v4763_v19  ;;  %v2666_v21 = vrot.slane %v4820_v46, 1  ;;  %v6131_v27 = vld [vmem:[#allocation65_spill] sm:$0xff] }
 0x30f   : > { %v2681_v6 = vsel %vm1549_vm6, %v2680_v41, %v4766_v17  ;;  %v4868_v56 = vpop.permute.xlu1 %1640  ;;  %v1143_v5 = vsel %vm614_vm3, %v1142_v12, %v4757_v15  ;;  %v4875_v50 = vsel %vm1551_vm8, %v2543_v59, %v2542_v31  ;;  %v4878_v43 = vsel %vm1551_vm8, %v2634_v29, %v2633_v62  ;;  %v6084_v59 = vld [vmem:[#allocation23_spill] sm:$0xff]  ;;  %v6086_v29 = vld [vmem:[#allocation24_spill] sm:$0xff] }
 0x310   : > { %1785 = vperm.xlu0 %3372, %v4843_v57   ;;  %6077 = vst [vmem:[#allocation39_spill] sm:$0xff] %v4875_v50  ;;  %v2682_v19 = vrot.slane %v4820_v46, 2  ;;  %v6078_v49 = vrot.slane %v5983_v30, 6  ;;  %v4886_v41 = vsub.f32 %v4352_v63, %v1143_v5  ;;  %v4889_v26 = vsel %vm1551_vm8, %v2650_v36, %v2649_v18  ;;  %v6132_v50 = vld [vmem:[#allocation5_spill] sm:$0xff] }
 0x311   : > { %v4892_v12 = vsel %vm1551_vm8, %v2666_v21, %v2665_v54  ;;  %v1150_v15 = vrot.slane %v6038_v3, 7  ;;  %v1156_v31 = vrot.slane %v6039_v7, 7  ;;  %v1152_v25 = vrot.slane %v6042_v1, 6  ;;  %v6081_v3 = vld [vmem:[#allocation12_spill] sm:$0xff] }
 0x312   : > { %v1147_v17 = vsel %vm612_vm2, %v6078_v49, %v4773_v35  ;;  %v4897_v62 = vsel %vm1551_vm8, %v2682_v19, %v2681_v6  ;;  %2169 = vperm.xlu1 %3373, %v4886_v41   ;;  %v6080_v35 = vrot.slane %v5986_v32, 5  ;;  %v1158_v28 = vrot.slane %v6043_v40, 6  ;;  %v6085_v1 = vld [vmem:[#allocation20_spill] sm:$0xff]  ;;  %v6087_v6 = vld [vmem:[#allocation30_spill] sm:$0xff]  ;;  %v6088_v19 = vld [vmem:[#allocation29_spill] sm:$0xff] }
 0x313   : > { %6079 = vst [vmem:[#allocation46_spill] sm:$0xff] %v4897_v62  ;;  %v4901_v30 = vpop.permute.xlu1 %1646  ;;  %v4910_v7 = vsub.f32 %v4372_v13, %v6081_v3  ;;  %v1162_v22 = vrot.slane %v6083_v11, 7  ;;  %v1157_v32 = vsel %vm610_vm1, %v1156_v31, %v6084_v59  ;;  %v1154_v40 = vrot.slane %v6085_v1, 5  ;;  %v6090_v31 = vld [vmem:[#allocation28_spill] sm:$0xff]  ;;  %v6092_v11 = vld [vmem:[#allocation31_spill] sm:$0xff] }
 0x314   : > { %2556 = vperm.xlu0 %3372, %v4618_v23   ;;  %v1149_v16 = vsel %vm614_vm3, %v6080_v35, %v1147_v17  ;;  %v6082_v23 = vld [vmem:[#allocation19_spill] sm:$0xff]  ;;  %v1160_v18 = vrot.slane %v6086_v29, 5  ;;  %v1159_v21 = vsel %vm612_vm2, %v1158_v28, %v1157_v32  ;;  %v1168_v5 = vrot.slane %v6087_v6, 7  ;;  %v6093_v32 = vld [vmem:[#allocation17_spill] sm:$0xff] }
 0x315   : > { %v4913_v61 = vsub.f32 %v4354_v34, %v1149_v16  ;;  %v1151_v47 = vsel %vm610_vm1, %v1150_v15, %v6082_v23  ;;  %v1164_v49 = vrot.slane %v6088_v19, 6  ;;  %v6089_v17 = vld [vmem:[#allocation27_spill] sm:$0xff]  ;;  %v1166_v35 = vrot.slane %v6090_v31, 5  ;;  %v6091_v16 = vld [vmem:[#allocation33_spill] sm:$0xff] }
 0x316   : > { %v1153_v54 = vsel %vm612_vm2, %v1152_v25, %v1151_v47  ;;  %v1163_v15 = vsel %vm610_vm1, %v1162_v22, %v6089_v17  ;;  %v1170_v3 = vrot.slane %v6091_v16, 6  ;;  %v1161_v25 = vsel %vm614_vm3, %v1160_v18, %v1159_v21  ;;  %v6098_v17 = vld [vmem:[#allocation54_spill] sm:$0xff] }
 0x317   : > { %2172 = vperm.xlu1 %3373, %v4913_v61   ;;  %v4924_v36 = vpop.permute.xlu1 %1652  ;;  %v1155_v28 = vsel %vm614_vm3, %v1154_v40, %v1153_v54  ;;  %v1165_v47 = vsel %vm612_vm2, %v1164_v49, %v1163_v15  ;;  %v1169_v59 = vsel %vm610_vm1, %v1168_v5, %v6092_v11  ;;  %v4942_v22 = vsub.f32 %v6093_v32, %v1161_v25  ;;  %v6096_v5 = vld [vmem:[#allocation55_spill] sm:$0xff] }
 0x318   : > { %1788 = vperm.xlu0 %3372, %v4910_v7   ;;  %v1171_v18 = vsel %vm612_vm2, %v1170_v3, %v1169_v59  ;;  %v1167_v54 = vsel %vm614_vm3, %v1166_v35, %v1165_v47  ;;  %v6097_v49 = vld [vmem:[#allocation15_spill] sm:$0xff] }
 0x319   : > { %v4955_v19 = vsub.f32 %v6096_v5, %v1167_v54  ;;  %v4959_v15 = vsub.f32 %v6098_v17, %v6097_v49 }
 0x31b   : > { %2559 = vperm.xlu1 %3373, %v4621_v39   ;;  %v1771_v23 = vpop.permute.xlu1 %1770  ;;  %v6095_v39 = vld [vmem:[#allocation32_spill] sm:$0xff]  ;;  %6099 = vst [vmem:[#allocation38_spill] sm:$0xff] %v4959_v15 }
 0x31c   : > { %2562 = vperm.xlu0 %3372, %v4644_v14   ;;  %v6094_v14 = vld [vmem:[#allocation14_spill] sm:$0xff]  ;;  %v1172_v29 = vrot.slane %v6095_v39, 5  ;;  %v1796_v21 = vrot.slane %v1771_v23, %v4117_v42  ;;  %v6100_v23 = vld [vmem:[#allocation56_spill] sm:$0xff] }
 0x31d   : > { %v4945_v1 = vsub.f32 %v6094_v14, %v1155_v28  ;;  %v6101_v39 = vld [vmem:[#allocation10_spill] sm:$0xff] }
 0x31e   : > { %v1173_v35 = vsel %vm614_vm3, %v1172_v29, %v1171_v18  ;;  %v1632_v29 = vpop.permute.xlu0 %1631 }
 0x31f   : > { %2175 = vperm.xlu1 %3373, %v4945_v1   ;;  %v1774_v40 = vpop.permute.xlu1 %1773  ;;  %v4967_v25 = vsub.f32 %v6100_v23, %v1173_v35  ;;  %v1657_v18 = vrot.slane %v1632_v29, %v4117_v42 }
 0x320   : > { %2178 = vperm.xlu0 %3372, %v4942_v22   ;;  %v1800_v6 = vrot.slane %v1774_v40, %v4117_v42 }
 0x322   : > { %v1825_v31 = vsel %vm610_vm1, %v1800_v6, %v1796_v21  ;;  %v1644_v54 = vpop.permute.xlu0 %1643  ;;  %v1665_v21 = vrot.slane %v4828_v44, %v4117_v42  ;;  %v1669_v6 = vrot.slane %v4868_v56, %v4117_v42  ;;  %v1685_v44 = vrot.slane %v4924_v36, %v4117_v42 }
 0x323   : > { %1791 = vperm.xlu1 %3373, %v4959_v15   ;;  %v1777_v16 = vpop.permute.xlu1 %1776 }
 0x324   : > { %2181 = vperm.xlu0 %3372, %v4955_v19   ;;  %v1804_v3 = vrot.slane %v1777_v16, %v4117_v42 }
 0x326   : > { %v1826_v28 = vsel %vm612_vm2, %v1804_v3, %v1825_v31  ;;  %v1650_v31 = vpop.permute.xlu0 %1649 }
 0x327   : > { %2565 = vperm.xlu1 %3373, %v4674_v38   ;;  %v1780_v47 = vpop.permute.xlu1 %1779  ;;  %v1661_v38 = vrot.slane %v4812_v55, %v4117_v42  ;;  %v1681_v16 = vrot.slane %v1650_v31, %v4117_v42  ;;  %v1923_v31 = vrot.slane %v4354_v34, %v4117_v42 }
 0x328   : > { %2184 = vperm.xlu0 %3372, %v4967_v25   ;;  %v1808_v11 = vrot.slane %v1780_v47, %v4117_v42 }
 0x329   : > { %v1686_v40 = vsel %vm610_vm1, %v1661_v38, %v1657_v18 }
 0x32a   : > { %v4974_v59 = vsel %vm614_vm3, %v1808_v11, %v1826_v28  ;;  %v2034_v18 = vpop.permute.xlu0 %2033 }
 0x32b   : > { %2568 = vperm.xlu1 %3373, %v6101_v39   ;;  %v2025_v56 = vpop.permute.xlu1 %2024 }
 0x32c   : > { %2574 = vperm.xlu0 %3372, %v4784_v24   ;;  %v1687_v24 = vsel %vm612_vm2, %v1665_v21, %v1686_v40  ;;  %v1911_v40 = vrot.slane %v4350_v45, %v4117_v42 }
 0x32d   : > { %v1688_v49 = vsel %vm614_vm3, %v1669_v6, %v1687_v24  ;;  %v1915_v24 = vrot.slane %v4348_v10, %v4117_v42  ;;  %v2050_v6 = vrot.slane %v2025_v56, %v4117_v42 }
 0x32f   : > { %2571 = vperm.xlu1 %3373, %v4733_v52   ;;  %v1673_v52 = vrot.slane %v1644_v54, %v4117_v42  ;;  %v2028_v11 = vpop.permute.xlu1 %2027  ;;  %v2043_v54 = vpop.permute.xlu0 %2042 }
 0x330   : > { %v2054_v36 = vrot.slane %v2028_v11, %v4117_v42 }
 0x331   : > { %v1689_v55 = vsel %vm1545_vm5, %v1673_v52, %v1688_v49 }
 0x332   : > { %v2079_v49 = vsel %vm610_vm1, %v2054_v36, %v2050_v6 }
 0x333   : > { %2577 = vperm.xlu1 %3373, %v4820_v46   ;;  %v1677_v46 = vrot.slane %v4901_v30, %v4117_v42  ;;  %v2031_v39 = vpop.permute.xlu1 %2030 }
 0x334   : > { %v2058_v21 = vrot.slane %v2031_v39, %v4117_v42  ;;  %v1931_v39 = vrot.slane %v6093_v32, %v4117_v42 }
 0x335   : > { %v1690_v35 = vsel %vm1547_vm7, %v1677_v46, %v1689_v55  ;;  %v1940_v46 = vsel %vm610_vm1, %v1915_v24, %v1911_v40 }
 0x336   : > { %v1691_v3 = vsel %vm1549_vm6, %v1681_v16, %v1690_v35  ;;  %v2080_v55 = vsel %vm612_vm2, %v2058_v21, %v2079_v49  ;;  %v2062_v35 = vrot.slane %v2034_v18, %v4117_v42  ;;  %v1927_v18 = vrot.slane %v6094_v14, %v4117_v42 }
 0x337   : > { %v1692_v28 = vsel %vm1551_vm8, %v1685_v44, %v1691_v3  ;;  %v1919_v44 = vrot.slane %v4352_v63, %v4117_v42  ;;  %v2046_v3 = vpop.permute.xlu0 %2045  ;;  %v1935_v21 = vrot.slane %v6096_v5, %v4117_v42  ;;  %v1939_v49 = vrot.slane %v6100_v23, %v4117_v42 }
 0x338   : > { %v1694_v47 = vsel %vm1554_vm9, %v1692_v28, 0.0  ;;  %v2078_v24 = vrot.slane %v2046_v3, %v4117_v42 }
 0x339   : > { %v1941_v56 = vsel %vm612_vm2, %v1919_v44, %v1940_v46 }
 0x33a   : > { %v1942_v40 = vsel %vm614_vm3, %v1923_v31, %v1941_v56 }
 0x33b   : > { %v1943_v31 = vsel %vm1545_vm5, %v1927_v18, %v1942_v40 }
 0x348   : > { %v2418_v30 = vpop.permute.xlu1 %2417 }
 0x34b   : > { %1695 = vadd.xlane.f32.xlu0 %v1694_v47  ;;  %v2081_v47 = vsel %vm614_vm3, %v2062_v35, %v2080_v55  ;;  %v1944_v55 = vsel %vm1547_vm7, %v1931_v39, %v1943_v31 }
 0x34c   : > { %v1945_v44 = vsel %vm1549_vm6, %v1935_v21, %v1944_v55 }
 0x34d   : > { %v1946_v35 = vsel %vm1551_vm8, %v1939_v49, %v1945_v44 }
 0x34e   : > { %v1948_v3 = vsel %vm1554_vm9, %v1946_v35, 0.0 }
 0x358   : > { %v2421_v29 = vpop.permute.xlu1 %2420 }
 0x359   : > { %v2447_v40 = vrot.slane %v2421_v29, %v4117_v42 }
 0x35c   : > { %v2037_v38 = vpop.permute.xlu1 %2036 }
 0x35d   : > { %v2066_v16 = vrot.slane %v2037_v38, %v4117_v42  ;;  %v2074_v38 = vrot.slane %v2043_v54, %v4117_v42 }
 0x35f   : > { %v2082_v36 = vsel %vm1545_vm5, %v2066_v16, %v2081_v47 }
 0x362   : > { %v2424_v52 = vpop.permute.xlu1 %2423 }
 0x363   : > { %v2451_v39 = vrot.slane %v2424_v52, %v4117_v42 }
 0x366   : > { %v2040_v28 = vpop.permute.xlu1 %2039 }
 0x367   : > { %v2070_v11 = vrot.slane %v2040_v28, %v4117_v42  ;;  %v2341_v28 = vsel %vm1554_vm9, %v4826_v9, 0.0 }
 0x369   : > { %v2083_v6 = vsel %vm1547_vm7, %v2070_v11, %v2082_v36  ;;  %v2443_v36 = vrot.slane %v2418_v30, %v4117_v42 }
 0x36a   : > { %v2084_v46 = vsel %vm1549_vm6, %v2074_v38, %v2083_v6  ;;  %v2427_v56 = vpop.permute.xlu1 %2426 }
 0x36b   : > { %v2085_v54 = vsel %vm1551_vm8, %v2078_v24, %v2084_v46  ;;  %v2455_v18 = vrot.slane %v2427_v56, %v4117_v42  ;;  %v2472_v6 = vsel %vm610_vm1, %v2447_v40, %v2443_v36 }
 0x36c   : > { %v2087_v16 = vsel %vm1554_vm9, %v2085_v54, 0.0  ;;  %v2473_v49 = vsel %vm612_vm2, %v2451_v39, %v2472_v6 }
 0x36d   : > { %2088 = vadd.xlane.f32.xlu0 %v2087_v16  ;;  %v2474_v29 = vsel %vm614_vm3, %v2455_v18, %v2473_v49 }
 0x371   : > { %1949 = vadd.xlane.f32.xlu0 %v1948_v3  ;;  %v2430_v47 = vpop.permute.xlu1 %2429 }
 0x372   : > { %v2459_v21 = vrot.slane %v2430_v47, %v4117_v42 }
 0x374   : > { %v2475_v52 = vsel %vm1545_vm5, %v2459_v21, %v2474_v29 }
 0x375   : > { %2342 = vadd.xlane.f32.xlu0 %v2341_v28 }
 0x379   : > { %v2433_v38 = vpop.permute.xlu1 %2432 }
 0x37a   : > { %v2463_v9 = vrot.slane %v2433_v38, %v4117_v42 }
 0x37c   : > { %v2476_v30 = vsel %vm1547_vm7, %v2463_v9, %v2475_v52 }
 0x381   : > { %v2436_v11 = vpop.permute.xlu0 %2435 }
 0x382   : > { %v2467_v46 = vrot.slane %v2436_v11, %v4117_v42 }
 0x384   : > { %v2477_v16 = vsel %vm1549_vm6, %v2467_v46, %v2476_v30 }
 0x387   : > { %v2164_v24 = vpop.permute.xlu0 %2163 }
 0x388   : > { %v2189_v49 = vrot.slane %v2164_v24, %v4117_v42 }
 0x389   : > { %v2439_v31 = vpop.permute.xlu1 %2438 }
 0x38a   : > { %v2471_v55 = vrot.slane %v2439_v31, %v4117_v42 }
 0x38b   : > { %v1783_v54 = vpop.permute.xlu0 %1782 }
 0x38c   : > { %v2478_v44 = vsel %vm1551_vm8, %v2471_v55, %v2477_v16  ;;  %v1812_v18 = vrot.slane %v1783_v54, %v4117_v42 }
 0x38d   : > { %v2167_v35 = vpop.permute.xlu1 %2166  ;;  %v2480_v28 = vsel %vm1554_vm9, %v2478_v44, 0.0 }
 0x38e   : > { %2481 = vadd.xlane.f32.xlu1 %v2480_v28  ;;  %v2193_v36 = vrot.slane %v2167_v35, %v4117_v42  ;;  %v1828_v55 = vsel %vm1545_vm5, %v1812_v18, %v4974_v59 }
 0x38f   : > { %v1786_v3 = vpop.permute.xlu0 %1785 }
 0x390   : > { %v1816_v46 = vrot.slane %v1786_v3, %v4117_v42  ;;  %v2218_v30 = vsel %vm610_vm1, %v2193_v36, %v2189_v49 }
 0x391   : > { %v2170_v56 = vpop.permute.xlu1 %2169 }
 0x392   : > { %v2197_v21 = vrot.slane %v2170_v56, %v4117_v42  ;;  %v1829_v35 = vsel %vm1547_vm7, %v1816_v46, %v1828_v55 }
 0x393   : > { %v2557_v47 = vpop.permute.xlu0 %2556 }
 0x394   : > { %v2219_v54 = vsel %vm612_vm2, %v2197_v21, %v2218_v30 }
 0x396   : > { %v2173_v11 = vpop.permute.xlu1 %2172 }
 0x397   : > { %v1789_v40 = vpop.permute.xlu0 %1788  ;;  %v2201_v29 = vrot.slane %v2173_v11, %v4117_v42 }
 0x398   : > { %v1820_v52 = vrot.slane %v1789_v40, %v4117_v42 }
 0x399   : > { %v2220_v24 = vsel %vm614_vm3, %v2201_v29, %v2219_v54  ;;  %v2582_v29 = vrot.slane %v2557_v47, %v4117_v42 }
 0x39a   : > { %v2560_v39 = vpop.permute.xlu1 %2559  ;;  %v1830_v40 = vsel %vm1549_vm6, %v1820_v52, %v1829_v35 }
 0x39b   : > { %v2563_v38 = vpop.permute.xlu0 %2562 }
 0x39c   : > { %v2590_v52 = vrot.slane %v2563_v38, %v4117_v42 }
 0x39e   : > { %v2176_v6 = vpop.permute.xlu1 %2175 }
 0x39f   : > { %v2179_v9 = vpop.permute.xlu0 %2178  ;;  %v2205_v31 = vrot.slane %v2176_v6, %v4117_v42  ;;  %v2586_v6 = vrot.slane %v2560_v39, %v4117_v42 }
 0x3a0   : > { %v2209_v3 = vrot.slane %v2179_v9, %v4117_v42 }
 0x3a1   : > { %v2221_v56 = vsel %vm1545_vm5, %v2205_v31, %v2220_v24  ;;  %v2611_v54 = vsel %vm610_vm1, %v2586_v6, %v2582_v29  ;;  %v6104_v29 = vld [vmem:[#allocation52_spill] sm:$0xff] }
 0x3a2   : > { %v1792_v16 = vpop.permute.xlu1 %1791  ;;  %v2222_v49 = vsel %vm1547_vm7, %v2209_v3, %v2221_v56 }
 0x3a3   : > { %v2182_v44 = vpop.permute.xlu0 %2181  ;;  %v1824_v28 = vrot.slane %v1792_v16, %v4117_v42 }
 0x3a4   : > { %v2213_v11 = vrot.slane %v2182_v44, %v4117_v42  ;;  %v2612_v44 = vsel %vm612_vm2, %v2590_v52, %v2611_v54  ;;  %v6106_v54 = vld [vmem:[#allocation60_spill] sm:$0xff] }
 0x3a5   : > { %v1831_v59 = vsel %vm1551_vm8, %v1824_v28, %v1830_v40 }
 0x3a6   : > { %v2566_v36 = vpop.permute.xlu1 %2565  ;;  %v1833_v21 = vsel %vm1554_vm9, %v1831_v59, 0.0  ;;  %v2223_v46 = vsel %vm1549_vm6, %v2213_v11, %v2222_v49 }
 0x3a7   : > { %v2185_v18 = vpop.permute.xlu0 %2184  ;;  %1834 = vadd.xlane.f32.xlu1 %v1833_v21  ;;  %v2594_v39 = vrot.slane %v2566_v36, %v4117_v42  ;;  %v6102_v21 = vld [vmem:[#allocation50_spill] sm:$0xff] }
 0x3a8   : > { %v2217_v9 = vrot.slane %v2185_v18, %v4117_v42  ;;  %v1559_v6 = vrot.slane %v6102_v21, 2  ;;  %v1575_v49 = vrot.slane %v6102_v21, 1 }
 0x3a9   : > { %v2613_v24 = vsel %vm614_vm3, %v2594_v39, %v2612_v44  ;;  %v1697_v39 = vrot.slane %v6106_v54, 3 }
 0x3aa   : > { %v2224_v31 = vsel %vm1551_vm8, %v2217_v9, %v2223_v46  ;;  %v2569_v30 = vpop.permute.xlu1 %2568  ;;  %v6103_v9 = vld [vmem:[#allocation57_spill] sm:$0xff] }
 0x3ab   : > { %v2226_v55 = vsel %vm1554_vm9, %v2224_v31, 0.0  ;;  %v2598_v16 = vrot.slane %v2569_v30, %v4117_v42  ;;  %v2575_v47 = vpop.permute.xlu0 %2574  ;;  %v1698_v46 = vrot.slane %v6103_v9, 2  ;;  %v1561_v31 = vrot.slane %v6104_v29, 1  ;;  %v6105_v30 = vld [vmem:[#allocation51_spill] sm:$0xff] }
 0x3ac   : > { %2227 = vadd.xlane.f32.xlu0 %v2226_v55  ;;  %v2606_v56 = vrot.slane %v2575_v47, %v4117_v42  ;;  %v1714_v52 = vrot.slane %v6103_v9, 1  ;;  %v1558_v55 = vrot.slane %v6105_v30, 3 }
 0x3ad   : > { %v2614_v38 = vsel %vm1545_vm5, %v2598_v16, %v2613_v24  ;;  %v6107_v16 = vld [vmem:[#allocation58_spill] sm:$0xff]  ;;  %v1699_v47 = vsel %vm610_vm1, %v1698_v46, %v1697_v39  ;;  %v6111_v39 = vld [vmem:[#allocation53_spill] sm:$0xff] }
 0x3ae   : > { %v2572_v35 = vpop.permute.xlu1 %2571  ;;  %v1700_v44 = vrot.slane %v6107_v16, 1  ;;  %v1560_v24 = vsel %vm610_vm1, %v1559_v6, %v1558_v55  ;;  %v6110_v55 = vld [vmem:[#allocation59_spill] sm:$0xff] }
 0x3af   : > { %v2602_v3 = vrot.slane %v2572_v35, %v4117_v42  ;;  %v1713_v35 = vrot.slane %v6106_v54, 2  ;;  %v1717_v46 = vrot.slane %v6110_v55, 7 }
 0x3b1   : > { %v2615_v28 = vsel %vm1547_vm7, %v2602_v3, %v2614_v38  ;;  %v1562_v38 = vsel %vm612_vm2, %v1561_v31, %v1560_v24  ;;  %v1564_v31 = vrot.slane %v4368_v58, 7 }
 0x3b2   : > { %v2578_v11 = vpop.permute.xlu1 %2577  ;;  %v2616_v59 = vsel %vm1549_vm6, %v2606_v56, %v2615_v28  ;;  %v6108_v28 = vld [vmem:[#allocation62_spill] sm:$0xff] }
 0x3b3   : > { %v2610_v40 = vrot.slane %v2578_v11, %v4117_v42  ;;  %v1574_v42 = vrot.slane %v6105_v30, 2  ;;  %v1703_v56 = vrot.slane %v6108_v28, 7  ;;  %v1715_v11 = vsel %vm610_vm1, %v1714_v52, %v1713_v35 }
 0x3b4   : > { %v1716_v6 = vsel %vm612_vm2, %v6107_v16, %v1715_v11  ;;  %v1719_v52 = vrot.slane %v6108_v28, 6  ;;  %v1566_v35 = vrot.slane %v4370_v51, 6  ;;  %v1563_v11 = vsel %vm614_vm3, %v6111_v39, %v1562_v38 }
 0x3b5   : > { %v2617_v36 = vsel %vm1551_vm8, %v2610_v40, %v2616_v59  ;;  %v1576_v3 = vsel %vm610_vm1, %v1575_v49, %v1574_v42  ;;  %v1701_v59 = vsel %vm612_vm2, %v1700_v44, %v1699_v47  ;;  %v1578_v49 = vrot.slane %v6111_v39, 7  ;;  %v6112_v42 = vld [vmem:[#allocation64_spill] sm:$0xff]  ;;  %v6113_v47 = vld [vmem:[#allocation63_spill] sm:$0xff] }
 0x3b6   : > { %v2619_v18 = vsel %vm1554_vm9, %v2617_v36, 0.0  ;;  %v1577_v40 = vsel %vm612_vm2, %v6104_v29, %v1576_v3  ;;  %v6109_v36 = vld [vmem:[#allocation61_spill] sm:$0xff]  ;;  %v1707_v24 = vrot.slane %v6112_v42, 5  ;;  %v1702_v44 = vsel %vm614_vm3, %v6110_v55, %v1701_v59 }
 0x3b7   : > { %2620 = vadd.xlane.f32.xlu1 %v2619_v18  ;;  %v1705_v18 = vrot.slane %v6109_v36, 6  ;;  %v1709_v3 = vrot.slane %v6113_v47, 4  ;;  %v1721_v54 = vrot.slane %v6109_v36, 5  ;;  %v1568_v16 = vrot.slane %v4372_v13, 5 }
 0x3b8   : > { %v1704_v30 = vsel %vm1545_vm5, %v1703_v56, %v1702_v44  ;;  %v1723_v9 = vrot.slane %v6112_v42, 4  ;;  %v1570_v28 = vrot.slane %v6098_v17, 4  ;;  %v1718_v21 = vsel %vm614_vm3, %v1717_v46, %v1716_v6 }
 0x3b9   : > { %v1706_v29 = vsel %vm1547_vm7, %v1705_v18, %v1704_v30  ;;  %v1725_v59 = vrot.slane %v6113_v47, 3  ;;  %v1565_v55 = vsel %vm1545_vm5, %v1564_v31, %v1563_v11  ;;  %v1720_v38 = vsel %vm1545_vm5, %v1719_v52, %v1718_v21 }
 0x3ba   : > { %v1708_v36 = vsel %vm1549_vm6, %v1707_v24, %v1706_v29  ;;  %v1580_v39 = vrot.slane %v4368_v58, 6  ;;  %v1567_v56 = vsel %vm1547_vm7, %v1566_v35, %v1565_v55  ;;  %v1722_v42 = vsel %vm1547_vm7, %v1721_v54, %v1720_v38  ;;  %v6116_v35 = vld [vmem:[#allocation8_spill] sm:$0xff]  ;;  %v6117_v38 = vld [vmem:[#allocation9_spill] sm:$0xff] }
 0x3bb   : > { %v1710_v44 = vsel %vm1551_vm8, %v1709_v3, %v1708_v36  ;;  %v1582_v30 = vrot.slane %v4370_v51, 5  ;;  %v1569_v18 = vsel %vm1549_vm6, %v1568_v16, %v1567_v56  ;;  %v1724_v6 = vsel %vm1549_vm6, %v1723_v9, %v1722_v42 }
 0x3bc   : > { %v1584_v21 = vrot.slane %v4372_v13, 4  ;;  %v1571_v46 = vsel %vm1551_vm8, %v1570_v28, %v1569_v18  ;;  %v1726_v55 = vsel %vm1551_vm8, %v1725_v59, %v1724_v6  ;;  %v1579_v36 = vsel %vm614_vm3, %v1578_v49, %v1577_v40  ;;  %v6115_v40 = vld [vmem:[#allocation7_spill] sm:$0xff]  ;;  %v6118_v18 = vld [vmem:[#allocation66_spill] sm:$0xff] }
 0x3bd   : > { %v1586_v54 = vrot.slane %v6098_v17, 3  ;;  %v5163_v31 = vsub.f32 %v4788_v4, %v1571_v46  ;;  %v1581_v9 = vsel %vm1545_vm5, %v1580_v39, %v1579_v36  ;;  %v2090_v49 = vrot.slane %v6115_v40, 3  ;;  %v6119_v46 = vld [vmem:[#allocation11_spill] sm:$0xff]  ;;  %v6120_v36 = vld [vmem:[#allocation6_spill] sm:$0xff] }
 0x3be   : > { %v1583_v42 = vsel %vm1547_vm7, %v1582_v30, %v1581_v9  ;;  %v2091_v3 = vrot.slane %v6116_v35, 2  ;;  %v2106_v59 = vrot.slane %v6115_v40, 2  ;;  %v2093_v39 = vrot.slane %v6117_v38, 1 }
 0x3bf   : > { %v1585_v24 = vsel %vm1549_vm6, %v1584_v21, %v1583_v42  ;;  %v2107_v56 = vrot.slane %v6116_v35, 1  ;;  %v2110_v6 = vrot.slane %v6118_v18, 7 }
 0x3c0   : > { %v1587_v28 = vsel %vm1551_vm8, %v1586_v54, %v1585_v24  ;;  %v2092_v11 = vsel %vm610_vm1, %v2091_v3, %v2090_v49  ;;  %v2096_v54 = vrot.slane %v6120_v36, 7  ;;  %v6122_v24 = vld [vmem:[#allocation70_spill] sm:$0xff]  ;;  %v2114_v49 = vrot.slane %v6119_v46, 5 }
 0x3c1   : > { %v1589_v52 = vsub.f32 %v5163_v31, %v1587_v28  ;;  %v2108_v30 = vsel %vm610_vm1, %v2107_v56, %v2106_v59  ;;  %v2102_v28 = vrot.slane %v6122_v24, 4  ;;  %v2118_v56 = vrot.slane %v6122_v24, 3 }
 0x3c2   : > { %v2109_v42 = vsel %vm612_vm2, %v6117_v38, %v2108_v30 }
 0x3d8   : > { %v5149_v62 = vpop.xlane.xlu0 %1695 }
 0x3d9   : > { %6114 = vst [vmem:[#allocation41_spill] sm:$0xff] %v5149_v62  ;;  %v5155_v29 = vsub.f32 %v5149_v62, %v1710_v44  ;;  %v2094_v44 = vsel %vm612_vm2, %v2093_v39, %v2092_v11  ;;  %v2112_v11 = vrot.slane %v6120_v36, 6 }
 0x3da   : > { %v2095_v21 = vsel %vm614_vm3, %v6118_v18, %v2094_v44 }
 0x3db   : > { %v1728_v16 = vsub.f32 %v5155_v29, %v1726_v55  ;;  %v2098_v55 = vrot.slane %v6119_v46, 6  ;;  %v2097_v3 = vsel %vm1545_vm5, %v2096_v54, %v2095_v21 }
 0x3dd   : > { %2697 = vperm.xlu0 %3372, %v1728_v16   ;;  %v6121_v16 = vld [vmem:[#allocation68_spill] sm:$0xff]  ;;  %v2099_v39 = vsel %vm1547_vm7, %v2098_v55, %v2097_v3 }
 0x3de   : > { %v2100_v9 = vrot.slane %v6121_v16, 5  ;;  %v2116_v59 = vrot.slane %v6121_v16, 4 }
 0x3e0   : > { %v2101_v44 = vsel %vm1549_vm6, %v2100_v9, %v2099_v39  ;;  %v1967_v39 = vrot.slane %v4350_v45, 2 }
 0x3e1   : > { %2733 = vperm.xlu0 %3372, %v1589_v52   ;;  %v2111_v52 = vsel %vm614_vm3, %v2110_v6, %v2109_v42  ;;  %v2103_v62 = vsel %vm1551_vm8, %v2102_v28, %v2101_v44 }
 0x3e2   : > { %v2113_v30 = vsel %vm1545_vm5, %v2112_v11, %v2111_v52  ;;  %v1952_v11 = vrot.slane %v4348_v10, 2 }
 0x3e3   : > { %v2115_v6 = vsel %vm1547_vm7, %v2114_v49, %v2113_v30  ;;  %v1959_v30 = vrot.slane %v6093_v32, 6  ;;  %v1975_v49 = vrot.slane %v6093_v32, 5 }
 0x3e4   : > { %v2117_v21 = vsel %vm1549_vm6, %v2116_v59, %v2115_v6 }
 0x3e5   : > { %v2119_v4 = vsel %vm1551_vm8, %v2118_v56, %v2117_v21  ;;  %v1968_v56 = vrot.slane %v4348_v10, 1  ;;  %v1957_v21 = vrot.slane %v6094_v14, 7 }
 0x3e7   : > { %v1969_v6 = vsel %vm610_vm1, %v1968_v56, %v1967_v39 }
 0x3fa   : > { %v5199_v42 = vpop.xlane.xlu0 %2088 }
 0x3fb   : > { %6123 = vst [vmem:[#allocation47_spill] sm:$0xff] %v5199_v42  ;;  %v5203_v54 = vsub.f32 %v5199_v42, %v2103_v62 }
 0x3fd   : > { %v2121_v55 = vsub.f32 %v5203_v54, %v2119_v4  ;;  %v1951_v4 = vrot.slane %v4350_v45, 3 }
 0x3fe   : > { %v5207_v3 = vpop.xlane.xlu0 %1949 }
 0x3ff   : > { %6124 = vst [vmem:[#allocation35_spill] sm:$0xff] %v5207_v3  ;;  %2709 = vperm.xlu1 %3373, %v2121_v55   ;;  %v1953_v59 = vsel %vm610_vm1, %v1952_v11, %v1951_v4  ;;  %v1961_v55 = vrot.slane %v6096_v5, 5  ;;  %v1970_v11 = vsel %vm612_vm2, %v4352_v63, %v1969_v6 }
 0x402   : > { %v5209_v9 = vpop.xlane.xlu0 %2342 }
 0x403   : > { %6125 = vst [vmem:[#allocation40_spill] sm:$0xff] %v5209_v9  ;;  %v5213_v28 = vsub.f32 %v5209_v9, %v4831_v60  ;;  %v5217_v52 = vsub.f32 %v5209_v9, %v4837_v8  ;;  %v1954_v60 = vrot.slane %v4352_v63, 1  ;;  %v1977_v9 = vrot.slane %v6096_v5, 4 }
 0x404   : > { %v1846_v5 = vrot.slane %v4910_v7, 5 }
 0x405   : > { %6126 = vst [vmem:[#allocation43_spill] sm:$0xff] %v5217_v52  ;;  %v2375_v62 = vsub.f32 %v5213_v28, %v4834_v37  ;;  %v1955_v8 = vsel %vm612_vm2, %v1954_v60, %v1953_v59  ;;  %v1971_v37 = vrot.slane %v4354_v34, 7  ;;  %v1844_v52 = vrot.slane %v4843_v57, 6 }
 0x406   : > { %v1956_v44 = vsel %vm614_vm3, %v4354_v34, %v1955_v8  ;;  %v1973_v8 = vrot.slane %v6094_v14, 6 }
 0x407   : > { %2757 = vperm.xlu0 %3372, %v2375_v62   ;;  %v1963_v62 = vrot.slane %v6100_v23, 4  ;;  %v1958_v4 = vsel %vm1545_vm5, %v1957_v21, %v1956_v44  ;;  %v1972_v60 = vsel %vm614_vm3, %v1971_v37, %v1970_v11 }
 0x408   : > { %v1960_v59 = vsel %vm1547_vm7, %v1959_v30, %v1958_v4  ;;  %v1979_v30 = vrot.slane %v6100_v23, 3  ;;  %v1974_v21 = vsel %vm1545_vm5, %v1973_v8, %v1972_v60  ;;  %v2229_v60 = vrot.slane %v4797_v48, 3  ;;  %v6129_v8 = vld [vmem:[#allocation67_spill] sm:$0xff] }
 0x409   : > { %v1962_v56 = vsel %vm1549_vm6, %v1961_v55, %v1960_v59  ;;  %v1976_v11 = vsel %vm1547_vm7, %v1975_v49, %v1974_v21  ;;  %v1836_v49 = vrot.slane %v6131_v27, 3  ;;  %v2246_v21 = vrot.slane %v4794_v53, 1 }
 0x40a   : > { %v1964_v37 = vsel %vm1551_vm8, %v1963_v62, %v1962_v56  ;;  %v1837_v56 = vrot.slane %v6129_v8, 2 }
 0x40b   : > { %v5261_v4 = vsub.f32 %v5207_v3, %v1964_v37  ;;  %v6130_v37 = vld [vmem:[#allocation69_spill] sm:$0xff]  ;;  %v1856_v3 = vrot.slane %v6132_v50, 7 }
 0x41b   : > { %v5245_v39 = vpop.xlane.xlu1 %2481 }
 0x41c   : > { %6127 = vst [vmem:[#allocation48_spill] sm:$0xff] %v5245_v39  ;;  %v5251_v44 = vsub.f32 %v5245_v39, %v4849_v2  ;;  %v5255_v6 = vsub.f32 %v5245_v39, %v4855_v20  ;;  %v1978_v20 = vsel %vm1549_vm6, %v1977_v9, %v1976_v11  ;;  %v1839_v39 = vrot.slane %v6130_v37, 1 }
 0x41d   : > { %v1980_v62 = vsel %vm1551_vm8, %v1979_v30, %v1978_v20  ;;  %v2230_v2 = vrot.slane %v4794_v53, 2  ;;  %v2232_v9 = vrot.slane %v4886_v41, 1  ;;  %v1852_v30 = vrot.slane %v6131_v27, 2 }
 0x41e   : > { %6128 = vst [vmem:[#allocation36_spill] sm:$0xff] %v5255_v6  ;;  %v2514_v55 = vsub.f32 %v5251_v44, %v4852_v33  ;;  %v1982_v59 = vsub.f32 %v5261_v4, %v1980_v62  ;;  %v1853_v33 = vrot.slane %v6129_v8, 1  ;;  %v2235_v11 = vrot.slane %v4945_v1, 7 }
 0x41f   : > { %v2245_v20 = vrot.slane %v4797_v48, 2  ;;  %v1838_v62 = vsel %vm610_vm1, %v1837_v56, %v1836_v49  ;;  %v2251_v6 = vrot.slane %v4945_v1, 6  ;;  %v1848_v8 = vrot.slane %v4959_v15, 4 }
 0x420   : > { %2721 = vperm.xlu1 %3373, %v2514_v55   ;;  %v2231_v55 = vsel %vm610_vm1, %v2230_v2, %v2229_v60  ;;  %v1840_v23 = vsel %vm612_vm2, %v1839_v39, %v1838_v62  ;;  %v1854_v27 = vsel %vm610_vm1, %v1853_v33, %v1852_v30  ;;  %v1858_v2 = vrot.slane %v4801_v0, 6 }
 0x421   : > { %v1841_v60 = vsel %vm614_vm3, %v6132_v50, %v1840_v23  ;;  %v1855_v56 = vsel %vm612_vm2, %v6130_v37, %v1854_v27  ;;  %v2233_v49 = vsel %vm612_vm2, %v2232_v9, %v2231_v55  ;;  %v1860_v39 = vrot.slane %v4843_v57, 5 }
 0x422   : > { %v2247_v62 = vsel %vm610_vm1, %v2246_v21, %v2245_v20  ;;  %v2249_v33 = vrot.slane %v4913_v61, 7  ;;  %v1862_v23 = vrot.slane %v4910_v7, 4  ;;  %v2237_v50 = vrot.slane %v4942_v22, 6 }
 0x423   : > { %v1864_v55 = vrot.slane %v4959_v15, 3  ;;  %v2234_v57 = vsel %vm614_vm3, %v4913_v61, %v2233_v49  ;;  %v2239_v20 = vrot.slane %v4955_v19, 5 }
 0x424   : > { %2745 = vperm.xlu1 %3373, %v1982_v59   ;;  %v1842_v59 = vrot.slane %v4801_v0, 7  ;;  %v1857_v0 = vsel %vm614_vm3, %v1856_v3, %v1855_v56  ;;  %v2248_v3 = vsel %vm612_vm2, %v4886_v41, %v2247_v62  ;;  %v2255_v62 = vrot.slane %v4955_v19, 4 }
 0x425   : > { %v1859_v9 = vsel %vm1545_vm5, %v1858_v2, %v1857_v0  ;;  %v2241_v0 = vrot.slane %v4967_v25, 4  ;;  %v2250_v2 = vsel %vm614_vm3, %v2249_v33, %v2248_v3 }
 0x426   : > { %v1843_v30 = vsel %vm1545_vm5, %v1842_v59, %v1841_v60  ;;  %v2253_v59 = vrot.slane %v4942_v22, 5  ;;  %v2252_v15 = vsel %vm1545_vm5, %v2251_v6, %v2250_v2 }
 0x427   : > { %v1845_v27 = vsel %vm1547_vm7, %v1844_v52, %v1843_v30  ;;  %v1861_v52 = vsel %vm1547_vm7, %v1860_v39, %v1859_v9  ;;  %v2236_v30 = vsel %vm1545_vm5, %v2235_v11, %v2234_v57  ;;  %v2257_v39 = vrot.slane %v4967_v25, 3 }
 0x428   : > { %v1847_v21 = vsel %vm1549_vm6, %v1846_v5, %v1845_v27  ;;  %v1863_v49 = vsel %vm1549_vm6, %v1862_v23, %v1861_v52  ;;  %v2254_v23 = vsel %vm1547_vm7, %v2253_v59, %v2252_v15  ;;  %v2126_v52 = vrot.slane %v6118_v18, 5 }
 0x429   : > { %v1849_v60 = vsel %vm1551_vm8, %v1848_v8, %v1847_v21  ;;  %v1865_v27 = vsel %vm1551_vm8, %v1864_v55, %v1863_v49  ;;  %v2238_v8 = vsel %vm1547_vm7, %v2237_v50, %v2236_v30  ;;  %v2256_v57 = vsel %vm1549_vm6, %v2255_v62, %v2254_v23 }
 0x42a   : > { %v2240_v21 = vsel %vm1549_vm6, %v2239_v20, %v2238_v8  ;;  %v2258_v50 = vsel %vm1551_vm8, %v2257_v39, %v2256_v57  ;;  %v2122_v20 = vrot.slane %v6116_v35, 7  ;;  %v1983_v49 = vrot.slane %v4348_v10, 7 }
 0x42b   : > { %v2242_v33 = vsel %vm1551_vm8, %v2241_v0, %v2240_v21  ;;  %v2124_v30 = vrot.slane %v6117_v38, 6  ;;  %v2140_v62 = vrot.slane %v6117_v38, 7  ;;  %v2128_v38 = vrot.slane %v6120_v36, 4  ;;  %v6144_v0 = vld [vmem:[#allocation62_spill] sm:$0xff] }
 0x42c   : > { %v1984_v39 = vsel %vm610_vm1, %v1983_v49, %v4350_v45 }
 0x434   : > { %v5317_v56 = vpop.xlane.xlu1 %1834 }
 0x435   : > { %v1851_v5 = vsub.f32 %v5317_v56, %v1849_v60  ;;  %v2123_v60 = vsel %vm610_vm1, %v2122_v20, %v6115_v40 }
 0x437   : > { %v1867_v9 = vsub.f32 %v1851_v5, %v1865_v27  ;;  %v2261_v27 = vrot.slane %v4794_v53, 7  ;;  %v1735_v53 = vrot.slane %v6144_v0, 4 }
 0x439   : > { %v5332_v3 = vpop.xlane.xlu0 %2227  ;;  %2769 = vperm.xlu1 %3373, %v1867_v9   ;;  %v6141_v9 = vld [vmem:[#allocation58_spill] sm:$0xff] }
 0x43a   : > { %6133 = vst [vmem:[#allocation42_spill] sm:$0xff] %v5332_v3  ;;  %v5336_v11 = vsub.f32 %v5332_v3, %v2242_v33  ;;  %v2134_v33 = vrot.slane %v6122_v24, 1  ;;  %v1731_v8 = vrot.slane %v6141_v9, 6 }
 0x43c   : > { %v2260_v55 = vsub.f32 %v5336_v11, %v2258_v50 }
 0x43e   : > { %2781 = vperm.xlu0 %3372, %v2260_v55   ;;  %v2130_v55 = vrot.slane %v6119_v46, 3 }
 0x442   : > { %2805 = vperm.xlu0 %3372, %v5155_v29  }
 0x444   : > { %v5341_v6 = vpop.xlane.xlu1 %2620 }
 0x445   : > { %6134 = vst [vmem:[#allocation45_spill] sm:$0xff] %v5341_v6  ;;  %v2637_v15 = vsub.f32 %v5341_v6, %v4878_v43  ;;  %v5348_v59 = vsub.f32 %v5341_v6, %v4892_v12  ;;  %v1985_v43 = vrot.slane %v4352_v63, 6  ;;  %v2138_v12 = vrot.slane %v6115_v40, 1 }
 0x446   : > { %2829 = vperm.xlu0 %3372, %v5251_v44   ;;  %v2142_v44 = vrot.slane %v6118_v18, 6  ;;  %v1600_v18 = vrot.slane %v4372_v13, 2 }
 0x447   : > { %v2653_v29 = vsub.f32 %v2637_v15, %v4889_v26  ;;  %v2125_v26 = vsel %vm612_vm2, %v2124_v30, %v2123_v60  ;;  %v2139_v20 = vsel %vm610_vm1, %v6116_v35, %v2138_v12  ;;  %v1986_v30 = vsel %vm612_vm2, %v1985_v43, %v1984_v39  ;;  %v6139_v12 = vld [vmem:[#allocation57_spill] sm:$0xff]  ;;  %v6140_v43 = vld [vmem:[#allocation51_spill] sm:$0xff] }
 0x448   : > { %v2127_v21 = vsel %vm614_vm3, %v2126_v52, %v2125_v26  ;;  %v2132_v52 = vrot.slane %v6121_v16, 2  ;;  %v6138_v26 = vld [vmem:[#allocation53_spill] sm:$0xff]  ;;  %v1596_v35 = vrot.slane %v4368_v58, 4  ;;  %v1729_v60 = vrot.slane %v6139_v12, 7 }
 0x449   : > { %2793 = vperm.xlu1 %3373, %v2653_v29   ;;  %v6137_v29 = vld [vmem:[#allocation52_spill] sm:$0xff]  ;;  %v1594_v2 = vrot.slane %v6138_v26, 5  ;;  %v2129_v40 = vsel %vm1545_vm5, %v2128_v38, %v2127_v21  ;;  %v2141_v57 = vsel %vm612_vm2, %v2140_v62, %v2139_v20  ;;  %v1987_v21 = vrot.slane %v4354_v34, 5  ;;  %v6142_v20 = vld [vmem:[#allocation59_spill] sm:$0xff] }
 0x44a   : > { %2853 = vperm.xlu0 %3372, %v5261_v4   ;;  %v6136_v4 = vld [vmem:[#allocation50_spill] sm:$0xff]  ;;  %v1592_v49 = vrot.slane %v6137_v29, 6  ;;  %v2131_v39 = vsel %vm1547_vm7, %v2130_v55, %v2129_v40  ;;  %v1733_v23 = vrot.slane %v6142_v20, 5 }
 0x44b   : > { %v1590_v50 = vrot.slane %v6136_v4, 7  ;;  %v2133_v6 = vsel %vm1549_vm6, %v2132_v52, %v2131_v39  ;;  %v2262_v39 = vsel %vm610_vm1, %v2261_v27, %v4797_v48  ;;  %v1741_v27 = vrot.slane %v6113_v47, 1 }
 0x44c   : > { %v2135_v40 = vsel %vm1551_vm8, %v2134_v33, %v2133_v6 }
 0x44d   : > { %2817 = vperm.xlu1 %3373, %v5203_v54   ;;  %v1591_v54 = vsel %vm610_vm1, %v1590_v50, %v6140_v43  ;;  %v1602_v50 = vrot.slane %v6098_v17, 1  ;;  %v5412_v52 = vsub.f32 %v5199_v42, %v2135_v40  ;;  %v6147_v42 = vld [vmem:[#allocation34_spill] sm:$0xff] }
 0x44e   : > { %2877 = vperm.xlu0 %3372, %v1851_v5   ;;  %v1598_v5 = vrot.slane %v4370_v51, 3  ;;  %v1593_v38 = vsel %vm612_vm2, %v1592_v49, %v1591_v54  ;;  %v6143_v49 = vld [vmem:[#allocation60_spill] sm:$0xff] }
 0x44f   : > { %v1595_v62 = vsel %vm614_vm3, %v1594_v2, %v1593_v38  ;;  %v1730_v54 = vsel %vm610_vm1, %v1729_v60, %v6143_v49  ;;  %v2265_v38 = vrot.slane %v4913_v61, 5 }
 0x450   : > { %v1597_v55 = vsel %vm1545_vm5, %v1596_v35, %v1595_v62  ;;  %v1732_v33 = vsel %vm612_vm2, %v1731_v8, %v1730_v54  ;;  %v6146_v35 = vld [vmem:[#allocation64_spill] sm:$0xff]  ;;  %v1745_v62 = vrot.slane %v6143_v49, 1  ;;  %v1747_v54 = vrot.slane %v6141_v9, 7 }
 0x451   : > { %2841 = vperm.xlu1 %3373, %v5163_v31   ;;  %v1599_v31 = vsel %vm1547_vm7, %v1598_v5, %v1597_v55  ;;  %v1739_v60 = vrot.slane %v6146_v35, 2  ;;  %v1734_v40 = vsel %vm614_vm3, %v1733_v23, %v1732_v33  ;;  %v1988_v55 = vsel %vm614_vm3, %v1987_v21, %v1986_v30 }
 0x452   : > { %2901 = vperm.xlu0 %3372, %v2637_v15   ;;  %v6145_v15 = vld [vmem:[#allocation61_spill] sm:$0xff]  ;;  %v1601_v6 = vsel %vm1549_vm6, %v1600_v18, %v1599_v31  ;;  %v1736_v8 = vsel %vm1545_vm5, %v1735_v53, %v1734_v40  ;;  %v6148_v49 = vrot.slane %v4886_v41, 6  ;;  %v1746_v21 = vsel %vm610_vm1, %v6139_v12, %v1745_v62 }
 0x453   : > { %v1737_v2 = vrot.slane %v6145_v15, 3  ;;  %v1603_v5 = vsel %vm1551_vm8, %v1602_v50, %v1601_v6  ;;  %v2143_v50 = vsel %vm614_vm3, %v2142_v44, %v2141_v57  ;;  %v2269_v6 = vrot.slane %v4942_v22, 3 }
 0x454   : > { %v5430_v18 = vsub.f32 %v6147_v42, %v1603_v5  ;;  %v1991_v53 = vrot.slane %v6093_v32, 3  ;;  %v2271_v9 = vrot.slane %v4955_v19, 2  ;;  %v1749_v44 = vrot.slane %v6142_v20, 6  ;;  %v6158_v42 = vld [vmem:[#allocation22_spill] sm:$0xff] }
 0x455   : > { %2865 = vperm.xlu1 %3373, %v5213_v28   ;;  %v2264_v28 = vsel %vm612_vm2, %v6148_v49, %v2262_v39  ;;  %v1738_v31 = vsel %vm1547_vm7, %v1737_v2, %v1736_v8  ;;  %v6149_v57 = vrot.slane %v6094_v14, 4  ;;  %v1748_v12 = vsel %vm612_vm2, %v1747_v54, %v1746_v21  ;;  %v6155_v21 = vld [vmem:[#allocation43_spill] sm:$0xff] }
 0x456   : > { %2988 = vperm.xlu0 %3372, %v5412_v52   ;;  %v2266_v23 = vsel %vm614_vm3, %v2265_v38, %v2264_v28  ;;  %v1740_v30 = vsel %vm1549_vm6, %v1739_v60, %v1738_v31  ;;  %v2273_v38 = vrot.slane %v4967_v25, 1  ;;  %v1751_v33 = vrot.slane %v6144_v0, 5  ;;  %v6150_v60 = vld [vmem:[#allocation41_spill] sm:$0xff]  ;;  %v6153_v28 = vld [vmem:[#allocation55_spill] sm:$0xff] }
 0x457   : > { %v1742_v2 = vsel %vm1551_vm8, %v1741_v27, %v1740_v30  ;;  %v1990_v39 = vsel %vm1545_vm5, %v6149_v57, %v1988_v55  ;;  %v1753_v40 = vrot.slane %v6145_v15, 4  ;;  %v6152_v27 = vld [vmem:[#allocation67_spill] sm:$0xff]  ;;  %v1870_v8 = vrot.slane %v6130_v37, 6  ;;  %v6154_v31 = vld [vmem:[#allocation5_spill] sm:$0xff] }
 0x458   : > { %v1744_v62 = vsub.f32 %v6150_v60, %v1742_v2  ;;  %v1868_v20 = vrot.slane %v6152_v27, 7  ;;  %v1755_v49 = vrot.slane %v6146_v35, 3  ;;  %v1993_v54 = vrot.slane %v6153_v28, 2  ;;  %v6156_v2 = vld [vmem:[#allocation56_spill] sm:$0xff] }
 0x459   : > { %2889 = vperm.xlu1 %3373, %v5336_v11   ;;  %v6151_v11 = vrot.slane %v4945_v1, 4  ;;  %v1872_v0 = vrot.slane %v6154_v31, 5  ;;  %v1757_v15 = vrot.slane %v6113_v47, 2  ;;  %v1995_v57 = vrot.slane %v6156_v2, 1 }
 0x45a   : > { %3012 = vperm.xlu0 %3372, %v5430_v18   ;;  %v6157_v35 = vrot.slane %v4350_v45, 1  ;;  %v1992_v47 = vsel %vm1547_vm7, %v1991_v53, %v1990_v39 }
 0x45b   : > { %v2268_v5 = vsel %vm1545_vm5, %v6151_v11, %v2266_v23  ;;  %v1750_v23 = vsel %vm614_vm3, %v1749_v44, %v1748_v12  ;;  %v6159_v12 = vld [vmem:[#allocation65_spill] sm:$0xff]  ;;  %v1994_v45 = vsel %vm1549_vm6, %v1993_v54, %v1992_v47  ;;  %v1606_v47 = vrot.slane %v6140_v43, 1 }
 0x45c   : > { %v2270_v55 = vsel %vm1547_vm7, %v2269_v6, %v2268_v5  ;;  %v1752_v6 = vsel %vm1545_vm5, %v1751_v33, %v1750_v23  ;;  %v2000_v5 = vsel %vm610_vm1, %v4348_v10, %v6157_v35  ;;  %v1869_v60 = vsel %vm610_vm1, %v1868_v20, %v6159_v12  ;;  %v6161_v35 = vld [vmem:[#allocation36_spill] sm:$0xff]  ;;  %v6162_v20 = vld [vmem:[#allocation38_spill] sm:$0xff] }
 0x45d   : > { %v2272_v30 = vsel %vm1549_vm6, %v2271_v9, %v2270_v55  ;;  %2976 = vperm.xlu1 %3373, %v1744_v62   ;;  %v1874_v9 = vrot.slane %v6158_v42, 4  ;;  %v1754_v44 = vsel %vm1547_vm7, %v1753_v40, %v1752_v6  ;;  %v1871_v10 = vsel %vm612_vm2, %v1870_v8, %v1869_v60  ;;  %v6164_v60 = vld [vmem:[#allocation35_spill] sm:$0xff] }
 0x45e   : > { %3036 = vperm.xlu0 %3372, %v6155_v21   ;;  %v2274_v11 = vsel %vm1551_vm8, %v2273_v38, %v2272_v30  ;;  %v6160_v38 = vld [vmem:[#allocation21_spill] sm:$0xff]  ;;  %v1756_v33 = vsel %vm1549_vm6, %v1755_v49, %v1754_v44  ;;  %v1878_v23 = vrot.slane %v4910_v7, 2  ;;  %v1996_v53 = vsel %vm1551_vm8, %v1995_v57, %v1994_v45 }
 0x45f   : > { %v5480_v55 = vsub.f32 %v5332_v3, %v2274_v11  ;;  %v1876_v30 = vrot.slane %v6160_v38, 3  ;;  %v1758_v40 = vsel %vm1551_vm8, %v1757_v15, %v1756_v33  ;;  %v1873_v39 = vsel %vm614_vm3, %v1872_v0, %v1871_v10 }
 0x460   : > { %v1880_v11 = vrot.slane %v6162_v20, 1  ;;  %v1760_v6 = vsub.f32 %v1744_v62, %v1758_v40  ;;  %v6163_v49 = vrot.slane %v4352_v63, 7  ;;  %v1998_v8 = vsub.f32 %v6164_v60, %v1996_v53 }
 0x461   : > { %3000 = vperm.xlu1 %3373, %v6161_v35   ;;  %v1875_v44 = vsel %vm1545_vm5, %v1874_v9, %v1873_v39  ;;  %v6165_v3 = vrot.slane %v4354_v34, 6  ;;  %v2007_v57 = vrot.slane %v6093_v32, 4  ;;  %v6166_v62 = vrot.slane %v6120_v36, 5 }
 0x462   : > { %3060 = vperm.xlu0 %3372, %v5480_v55   ;;  %v2002_v54 = vsel %vm612_vm2, %v6163_v49, %v2000_v5  ;;  %v1877_v0 = vsel %vm1547_vm7, %v1876_v30, %v1875_v44  ;;  %v2009_v5 = vrot.slane %v6153_v28, 3  ;;  %v1886_v9 = vrot.slane %v6130_v37, 7 }
 0x463   : > { %v2004_v15 = vsel %vm614_vm3, %v6165_v3, %v2002_v54  ;;  %v2145_v63 = vsel %vm1545_vm5, %v6166_v62, %v2143_v50  ;;  %v1879_v33 = vsel %vm1549_vm6, %v1878_v23, %v1877_v0  ;;  %v2011_v34 = vrot.slane %v6156_v2, 2  ;;  %v6171_v0 = vld [vmem:[#allocation18_spill] sm:$0xff] }
 0x464   : > { %v1881_v3 = vsel %vm1551_vm8, %v1880_v11, %v1879_v33  ;;  %v1884_v32 = vrot.slane %v6159_v12, 1  ;;  %v1888_v43 = vrot.slane %v6154_v31, 6  ;;  %v1608_v36 = vrot.slane %v6137_v29, 7 }
 0x465   : > { %3024 = vperm.xlu1 %3373, %v1998_v8   ;;  %v6167_v50 = vrot.slane %v6094_v14, 5  ;;  %v1890_v30 = vrot.slane %v6158_v42, 5  ;;  %v1883_v37 = vsub.f32 %v5317_v56, %v1881_v3  ;;  %v1610_v45 = vrot.slane %v6138_v26, 6  ;;  %v6168_v42 = vld [vmem:[#allocation39_spill] sm:$0xff] }
 0x466   : > { %3084 = vperm.xlu0 %3372, %v1760_v6   ;;  %v1885_v10 = vsel %vm610_vm1, %v6152_v27, %v1884_v32  ;;  %v1892_v12 = vrot.slane %v6160_v38, 4  ;;  %v2148_v31 = vrot.slane %v6121_v16, 3  ;;  %v1894_v23 = vrot.slane %v4910_v7, 3 }
 0x467   : > { %v2006_v28 = vsel %vm1545_vm5, %v6167_v50, %v2004_v15  ;;  %v1887_v14 = vsel %vm612_vm2, %v1886_v9, %v1885_v10  ;;  %v6169_v40 = vsub.f32 %v6161_v35, %v6168_v42  ;;  %v2150_v26 = vrot.slane %v6122_v24, 2  ;;  %v3280_v42 = vld [vmem:[%s5755_s1 + $0x3] ss:$0 sm:$0xff] }
 0x468   : > { %v2008_v2 = vsel %vm1547_vm7, %v2007_v57, %v2006_v28  ;;  %v1889_v27 = vsel %vm614_vm3, %v1888_v43, %v1887_v14  ;;  %v1896_v38 = vrot.slane %v6162_v20, 2  ;;  %v1607_v16 = vsel %vm610_vm1, %v6136_v4, %v1606_v47 }
 0x469   : > { %v2010_v29 = vsel %vm1549_vm6, %v2009_v5, %v2008_v2  ;;  %3048 = vperm.xlu1 %3373, %v1883_v37   ;;  %v1891_v11 = vsel %vm1545_vm5, %v1890_v30, %v1889_v27  ;;  %v1612_v7 = vrot.slane %v4368_v58, 5  ;;  %v6170_v6 = vrot.slane %v6119_v46, 4  ;;  %v6174_v30 = vld [vmem:[#allocation25_spill] sm:$0xff] }
 0x46a   : > { %3108 = vperm.xlu0 %3372, %v6169_v40   ;;  %v2012_v53 = vsel %vm1551_vm8, %v2011_v34, %v2010_v29  ;;  %v1893_v24 = vsel %vm1547_vm7, %v1892_v12, %v1891_v11  ;;  %v2277_v49 = vrot.slane %v4797_v48, 1  ;;  %v1614_v54 = vrot.slane %v4370_v51, 4 }
 0x46b   : > { %v2014_v39 = vsub.f32 %v1998_v8, %v2012_v53  ;;  %v2147_v35 = vsel %vm1547_vm7, %v6170_v6, %v2145_v63  ;;  %v1895_v44 = vsel %vm1549_vm6, %v1894_v23, %v1893_v24  ;;  %v1609_v4 = vsel %vm612_vm2, %v1608_v36, %v1607_v16  ;;  %v3281_v53 = vld [vmem:[%s5755_s1 + $0x4] ss:$0 sm:$0xff]  ;;  %v3283_v6 = vld [vmem:[%s5755_s1 + $0x6] ss:$0 sm:$0xff] }
 0x46c   : > { %v2149_v20 = vsel %vm1549_vm6, %v2148_v31, %v2147_v35  ;;  %v1616_v58 = vrot.slane %v4372_v13, 3  ;;  %v1897_v8 = vsel %vm1551_vm8, %v1896_v38, %v1895_v44  ;;  %v1611_v47 = vsel %vm614_vm3, %v1610_v45, %v1609_v4  ;;  %v3278_v45 = vld [vmem:[%s5755_s1 + $0x1] ss:$0 sm:$0xff] }
 0x46d   : > { %3072 = vperm.xlu1 %3373, %v5348_v59   ;;  %v2151_v46 = vsel %vm1551_vm8, %v2150_v26, %v2149_v20  ;;  %v1618_v48 = vrot.slane %v6098_v17, 2  ;;  %v1899_v15 = vsub.f32 %v1883_v37, %v1897_v8  ;;  %v1613_v57 = vsel %vm1545_vm5, %v1612_v7, %v1611_v47  ;;  %v3282_v7 = vld [vmem:[%s5755_s1 + $0x5] ss:$0 sm:$0xff]  ;;  %v3285_v8 = vld [vmem:[%s5755_s1 + $0x8] ss:$0 sm:$0xff] }
 0x46e   : > { %3132 = vperm.xlu0 %3372, %v2014_v39   ;;  %v2153_v51 = vsub.f32 %v5412_v52, %v2151_v46  ;;  %v2278_v62 = vsel %vm610_vm1, %v6171_v0, %v2277_v49  ;;  %v2281_v63 = vrot.slane %v4913_v61, 6  ;;  %v1615_v13 = vsel %vm1547_vm7, %v1614_v54, %v1613_v57  ;;  %v3284_v54 = vld [vmem:[%s5755_s1 + $0x7] ss:$0 sm:$0xff]  ;;  %v3287_v0 = vld [vmem:[%s5755_s1 + $0xa] ss:$0 sm:$0xff] }
 0x46f   : > { %v2279_v5 = vrot.slane %v4886_v41, 7  ;;  %v1617_v33 = vsel %vm1549_vm6, %v1616_v58, %v1615_v13  ;;  %v2285_v3 = vrot.slane %v4942_v22, 4  ;;  %v2283_v61 = vrot.slane %v4945_v1, 5  ;;  %v6172_v41 = vld [vmem:[#allocation46_spill] sm:$0xff] }
 0x470   : > { %v1619_v17 = vsel %vm1551_vm8, %v1618_v48, %v1617_v33  ;;  %v2287_v32 = vrot.slane %v4955_v19, 3  ;;  %v6173_v43 = vsub.f32 %v5348_v59, %v6172_v41  ;;  %v2289_v36 = vrot.slane %v4967_v25, 2  ;;  %v3277_v59 = vld [vmem:[%s5755_s1] ss:$0 sm:$0xff]  ;;  %v2698_v25 = vpop.permute.xlu0 %2697  ;;  %v3286_v48 = vld [vmem:[%s5755_s1 + $0x9] ss:$0 sm:$0xff] }
 0x471   : > { %3096 = vperm.xlu1 %3373, %v2153_v51   ;;  %v2280_v52 = vsel %vm612_vm2, %v2279_v5, %v2278_v62  ;;  %v1621_v9 = vsub.f32 %v5430_v18, %v1619_v17  ;;  %v6175_v22 = vsub.f32 %v6155_v21, %v6174_v30  ;;  %v2704_v2 = vmul.f32 %v3277_v59, %v2698_v25  ;;  %v3276_v21 = vld [vmem:[%s5756_s2] ss:$0 sm:$0xff]  ;;  %v3288_v13 = vld [vmem:[%s5755_s1 + $0xb] ss:$0 sm:$0xff]  ;;  %v3292_v30 = vld [vmem:[%s5755_s1 + $0xf] ss:$0 sm:$0xff] }
 0x472   : > { %3156 = vperm.xlu0 %3372, %v1899_v15   ;;  %v2282_v34 = vsel %vm614_vm3, %v2281_v63, %v2280_v52  ;;  %v3293_v59 = vld [vmem:[%s5755_s1 + $0x10] ss:$0 sm:$0xff] }
 0x473   : > { %v2284_v50 = vsel %vm1545_vm5, %v2283_v61, %v2282_v34  ;;  %v2705_v29 = vadd.f32 %v3276_v21, %v2704_v2  ;;  %v3290_v61 = vld [vmem:[%s5755_s1 + $0xd] ss:$0 sm:$0xff] }
 0x474   : > { %v2286_v28 = vsel %vm1547_vm7, %v2285_v3, %v2284_v50  ;;  %v2734_v31 = vpop.permute.xlu0 %2733  ;;  %v3291_v50 = vld [vmem:[%s5755_s1 + $0xe] ss:$0 sm:$0xff] }
 0x475   : > { %3120 = vperm.xlu1 %3373, %v1621_v9   ;;  %v2288_v18 = vsel %vm1549_vm6, %v2287_v32, %v2286_v28  ;;  %v2740_v38 = vmul.f32 %v3280_v42, %v2734_v31  ;;  %v3289_v9 = vld [vmem:[%s5755_s1 + $0xc] ss:$0 sm:$0xff]  ;;  %v6176_v42 = vld [vmem:[#allocation41_spill] sm:$0xff] }
 0x476   : > { %3180 = vperm.xlu0 %3372, %v6173_v43   ;;  %v2290_v1 = vsel %vm1551_vm8, %v2289_v36, %v2288_v18 }
 0x477   : > { %v2292_v19 = vsub.f32 %v5480_v55, %v2290_v1  ;;  %v3279_v55 = vld [vmem:[%s5755_s1 + $0x2] ss:$0 sm:$0xff] }
 0x479   : > { %3144 = vperm.xlu1 %3373, %v6175_v22  }
 0x47d   : > { %3168 = vperm.xlu1 %3373, %v2292_v19  }
 0x47e   : > { %v2710_v37 = vpop.permute.xlu1 %2709 }
 0x47f   : > { %v2716_v12 = vmul.f32 %v3278_v45, %v2710_v37  ;;  %v3294_v45 = vld [vmem:[%s5755_s1 + $0x11] ss:$0 sm:$0xff] }
 0x481   : > { %v2717_v23 = vadd.f32 %v2716_v12, %v2705_v29  ;;  %v3295_v12 = vld [vmem:[%s5755_s1 + $0x12] ss:$0 sm:$0xff] }
 0x486   : > { %v2758_v40 = vpop.permute.xlu0 %2757 }
 0x487   : > { %v2764_v20 = vmul.f32 %v3282_v7, %v2758_v40  ;;  %v2915_v40 = vmul.f32 %v3295_v12, %v6176_v42  ;;  %v6178_v7 = vld [vmem:[#allocation48_spill] sm:$0xff] }
 0x49f   : > { %v2722_v10 = vpop.permute.xlu1 %2721 }
 0x4a0   : > { %v2728_v14 = vmul.f32 %v3279_v55, %v2722_v10 }
 0x4a2   : > { %v2729_v26 = vadd.f32 %v2728_v14, %v2717_v23  ;;  %v3296_v14 = vld [vmem:[%s5755_s1 + $0x13] ss:$0 sm:$0xff] }
 0x4a3   : > { %v2746_v27 = vpop.permute.xlu1 %2745 }
 0x4a4   : > { %v2741_v39 = vadd.f32 %v2740_v38, %v2729_v26  ;;  %v2752_v11 = vmul.f32 %v3281_v53, %v2746_v27  ;;  %v3297_v53 = vld [vmem:[%s5755_s1 + $0x14] ss:$0 sm:$0xff] }
 0x4a5   : > { %v6177_v38 = vld [vmem:[#allocation47_spill] sm:$0xff] }
 0x4a6   : > { %v2753_v49 = vadd.f32 %v2752_v11, %v2741_v39  ;;  %v3298_v11 = vld [vmem:[%s5755_s1 + $0x15] ss:$0 sm:$0xff] }
 0x4a8   : > { %v2765_v4 = vadd.f32 %v2764_v20, %v2753_v49 }
 0x4b8   : > { %v2770_v35 = vpop.permute.xlu1 %2769 }
 0x4b9   : > { %v2776_v44 = vmul.f32 %v3283_v6, %v2770_v35  ;;  %v2929_v6 = vmul.f32 %v3297_v53, %v6178_v7 }
 0x4bb   : > { %v2777_v47 = vadd.f32 %v2776_v44, %v2765_v4  ;;  %v3300_v4 = vld [vmem:[%s5755_s1 + $0x17] ss:$0 sm:$0xff] }
 0x4bd   : > { %v2782_v16 = vpop.permute.xlu0 %2781 }
 0x4be   : > { %v2788_v58 = vmul.f32 %v3284_v54, %v2782_v16  ;;  %v2922_v16 = vmul.f32 %v3296_v14, %v6177_v38  ;;  %v6179_v54 = vld [vmem:[#allocation34_spill] sm:$0xff] }
 0x4bf   : > { %v2936_v20 = vmul.f32 %v3298_v11, %v6179_v54 }
 0x4c0   : > { %v2789_v15 = vadd.f32 %v2788_v58, %v2777_v47  ;;  %v3301_v47 = vld [vmem:[%s5755_s1 + $0x18] ss:$0 sm:$0xff] }
 0x4c1   : > { %v2806_v24 = vpop.permute.xlu0 %2805 }
 0x4c2   : > { %v2812_v62 = vmul.f32 %v3286_v48, %v2806_v24  ;;  %v3299_v24 = vld [vmem:[%s5755_s1 + $0x16] ss:$0 sm:$0xff]  ;;  %v6180_v48 = vld [vmem:[#allocation40_spill] sm:$0xff] }
 0x4c5   : > { %v2830_v46 = vpop.permute.xlu0 %2829 }
 0x4c6   : > { %v2836_v34 = vmul.f32 %v3288_v13, %v2830_v46  ;;  %v2943_v46 = vmul.f32 %v3299_v24, %v6164_v60  ;;  %v3303_v60 = vld [vmem:[%s5755_s1 + $0x1a] ss:$0 sm:$0xff] }
 0x4c8   : > { %v2794_v51 = vpop.permute.xlu1 %2793 }
 0x4c9   : > { %v2800_v57 = vmul.f32 %v3285_v8, %v2794_v51  ;;  %v2854_v5 = vpop.permute.xlu0 %2853  ;;  %v2950_v51 = vmul.f32 %v3300_v4, %v6180_v48 }
 0x4ca   : > { %v2860_v28 = vmul.f32 %v3290_v61, %v2854_v5  ;;  %v6181_v5 = vld [vmem:[#allocation42_spill] sm:$0xff] }
 0x4cb   : > { %v2801_v63 = vadd.f32 %v2800_v57, %v2789_v15  ;;  %v3302_v57 = vld [vmem:[%s5755_s1 + $0x19] ss:$0 sm:$0xff] }
 0x4cc   : > { %v2818_v33 = vpop.permute.xlu1 %2817 }
 0x4cd   : > { %v2813_v17 = vadd.f32 %v2812_v62, %v2801_v63  ;;  %v2824_v52 = vmul.f32 %v3287_v0, %v2818_v33  ;;  %v2878_v36 = vpop.permute.xlu0 %2877  ;;  %v2957_v62 = vmul.f32 %v3301_v47, %v5317_v56  ;;  %v2964_v33 = vmul.f32 %v3302_v57, %v6181_v5  ;;  %v3305_v56 = vld [vmem:[%s5755_s1 + $0x1c] ss:$0 sm:$0xff] }
 0x4ce   : > { %v2884_v25 = vmul.f32 %v3292_v30, %v2878_v36 }
 0x4cf   : > { %v2825_v3 = vadd.f32 %v2824_v52, %v2813_v17  ;;  %v3304_v52 = vld [vmem:[%s5755_s1 + $0x1b] ss:$0 sm:$0xff] }
 0x4d0   : > { %v2842_v32 = vpop.permute.xlu1 %2841 }
 0x4d1   : > { %v2837_v41 = vadd.f32 %v2836_v34, %v2825_v3  ;;  %v2848_v43 = vmul.f32 %v3289_v9, %v2842_v32  ;;  %v2902_v2 = vpop.permute.xlu0 %2901  ;;  %v6182_v9 = vld [vmem:[#allocation45_spill] sm:$0xff] }
 0x4d2   : > { %v2908_v31 = vmul.f32 %v3294_v45, %v2902_v2  ;;  %v2971_v34 = vmul.f32 %v3303_v60, %v6182_v9  ;;  %v3320_v60 = vld [vmem:[%s5755_s1 + $0x2b] ss:$0 sm:$0xff] }
 0x4d3   : > { %v2849_v18 = vadd.f32 %v2848_v43, %v2837_v41  ;;  %v3306_v43 = vld [vmem:[%s5755_s1 + $0x1d] ss:$0 sm:$0xff] }
 0x4d4   : > { %v2866_v22 = vpop.permute.xlu1 %2865 }
 0x4d5   : > { %v2861_v1 = vadd.f32 %v2860_v28, %v2849_v18  ;;  %v2872_v19 = vmul.f32 %v3291_v50, %v2866_v22  ;;  %v2989_v27 = vpop.permute.xlu0 %2988  ;;  %v3307_v18 = vld [vmem:[%s5755_s1 + $0x1e] ss:$0 sm:$0xff] }
 0x4d6   : > { %v2995_v50 = vmul.f32 %v3305_v56, %v2989_v27  ;;  %v3313_v27 = vld [vmem:[%s5755_s1 + $0x24] ss:$0 sm:$0xff] }
 0x4d7   : > { %v2873_v37 = vadd.f32 %v2872_v19, %v2861_v1  ;;  %v3308_v1 = vld [vmem:[%s5755_s1 + $0x1f] ss:$0 sm:$0xff] }
 0x4d8   : > { %v2890_v21 = vpop.permute.xlu1 %2889 }
 0x4d9   : > { %v2885_v55 = vadd.f32 %v2884_v25, %v2873_v37  ;;  %v2896_v10 = vmul.f32 %v3293_v59, %v2890_v21  ;;  %v3013_v58 = vpop.permute.xlu0 %3012  ;;  %v3309_v37 = vld [vmem:[%s5755_s1 + $0x20] ss:$0 sm:$0xff] }
 0x4da   : > { %v3019_v59 = vmul.f32 %v3307_v18, %v3013_v58  ;;  %v3317_v58 = vld [vmem:[%s5755_s1 + $0x28] ss:$0 sm:$0xff] }
 0x4db   : > { %v2897_v29 = vadd.f32 %v2896_v10, %v2885_v55  ;;  %v3310_v55 = vld [vmem:[%s5755_s1 + $0x21] ss:$0 sm:$0xff] }
 0x4dc   : > { %v2977_v23 = vpop.permute.xlu1 %2976 }
 0x4dd   : > { %v2909_v26 = vadd.f32 %v2908_v31, %v2897_v29  ;;  %v3037_v13 = vpop.permute.xlu0 %3036  ;;  %v2983_v41 = vmul.f32 %v3304_v52, %v2977_v23  ;;  %v3311_v31 = vld [vmem:[%s5755_s1 + $0x22] ss:$0 sm:$0xff] }
 0x4de   : > { %v3043_v10 = vmul.f32 %v3309_v37, %v3037_v13 }
 0x4df   : > { %v2916_v39 = vadd.f32 %v2915_v40, %v2909_v26  ;;  %v3312_v40 = vld [vmem:[%s5755_s1 + $0x23] ss:$0 sm:$0xff] }
 0x4e0   : > { %v3001_v49 = vpop.permute.xlu1 %3000 }
 0x4e1   : > { %v2923_v35 = vadd.f32 %v2922_v16, %v2916_v39  ;;  %v3061_v36 = vpop.permute.xlu0 %3060  ;;  %v3007_v22 = vmul.f32 %v3306_v43, %v3001_v49  ;;  %v3314_v39 = vld [vmem:[%s5755_s1 + $0x25] ss:$0 sm:$0xff] }
 0x4e2   : > { %v3067_v26 = vmul.f32 %v3311_v31, %v3061_v36 }
 0x4e3   : > { %v2930_v44 = vadd.f32 %v2929_v6, %v2923_v35  ;;  %v3315_v35 = vld [vmem:[%s5755_s1 + $0x26] ss:$0 sm:$0xff] }
 0x4e4   : > { %v3025_v0 = vpop.permute.xlu1 %3024 }
 0x4e5   : > { %v2937_v8 = vadd.f32 %v2936_v20, %v2930_v44  ;;  %v3085_v45 = vpop.permute.xlu0 %3084  ;;  %v3031_v21 = vmul.f32 %v3308_v1, %v3025_v0  ;;  %v3316_v20 = vld [vmem:[%s5755_s1 + $0x27] ss:$0 sm:$0xff]  ;;  %v3319_v0 = vld [vmem:[%s5755_s1 + $0x2a] ss:$0 sm:$0xff] }
 0x4e6   : > { %v3091_v7 = vmul.f32 %v3313_v27, %v3085_v45 }
 0x4e7   : > { %v2944_v15 = vadd.f32 %v2943_v46, %v2937_v8 }
 0x4e8   : > { %v3049_v61 = vpop.permute.xlu1 %3048 }
 0x4e9   : > { %v2951_v63 = vadd.f32 %v2950_v51, %v2944_v15  ;;  %v3055_v23 = vmul.f32 %v3310_v55, %v3049_v61  ;;  %v3109_v42 = vpop.permute.xlu0 %3108  ;;  %v3318_v51 = vld [vmem:[%s5755_s1 + $0x29] ss:$0 sm:$0xff] }
 0x4ea   : > { %v3115_v44 = vmul.f32 %v3315_v35, %v3109_v42 }
 0x4eb   : > { %v2958_v17 = vadd.f32 %v2957_v62, %v2951_v63 }
 0x4ec   : > { %v3073_v19 = vpop.permute.xlu1 %3072 }
 0x4ed   : > { %v2965_v3 = vadd.f32 %v2964_v33, %v2958_v17  ;;  %v3079_v16 = vmul.f32 %v3312_v40, %v3073_v19  ;;  %v3133_v24 = vpop.permute.xlu0 %3132  ;;  %v3321_v17 = vld [vmem:[%s5755_s1 + $0x2c] ss:$0 sm:$0xff] }
 0x4ee   : > { %v3139_v15 = vmul.f32 %v3317_v58, %v3133_v24 }
 0x4ef   : > { %v2972_v32 = vadd.f32 %v2971_v34, %v2965_v3 }
 0x4f0   : > { %v3097_v29 = vpop.permute.xlu1 %3096 }
 0x4f1   : > { %v2984_v28 = vadd.f32 %v2983_v41, %v2972_v32  ;;  %v3103_v54 = vmul.f32 %v3314_v39, %v3097_v29  ;;  %v3157_v48 = vpop.permute.xlu0 %3156 }
 0x4f2   : > { %v3163_v5 = vmul.f32 %v3319_v0, %v3157_v48 }
 0x4f3   : > { %v2996_v30 = vadd.f32 %v2995_v50, %v2984_v28 }
 0x4f4   : > { %v3121_v11 = vpop.permute.xlu1 %3120 }
 0x4f5   : > { %v3008_v25 = vadd.f32 %v3007_v22, %v2996_v30  ;;  %v3127_v47 = vmul.f32 %v3316_v20, %v3121_v11  ;;  %v3181_v52 = vpop.permute.xlu0 %3180 }
 0x4f6   : > { %v3187_v3 = vmul.f32 %v3321_v17, %v3181_v52 }
 0x4f7   : > { %v3020_v2 = vadd.f32 %v3019_v59, %v3008_v25 }
 0x4f8   : > { %v3145_v46 = vpop.permute.xlu1 %3144 }
 0x4f9   : > { %v3032_v12 = vadd.f32 %v3031_v21, %v3020_v2  ;;  %v3151_v63 = vmul.f32 %v3318_v51, %v3145_v46 }
 0x4fb   : > { %v3044_v14 = vadd.f32 %v3043_v10, %v3032_v12 }
 0x4fc   : > { %v3169_v13 = vpop.permute.xlu1 %3168 }
 0x4fd   : > { %v3056_v53 = vadd.f32 %v3055_v23, %v3044_v14  ;;  %v3175_v34 = vmul.f32 %v3320_v60, %v3169_v13 }
 0x4ff   : > { %v3068_v38 = vadd.f32 %v3067_v26, %v3056_v53 }
 0x501   : > { %v3080_v6 = vadd.f32 %v3079_v16, %v3068_v38 }
 0x503   : > { %v3092_v49 = vadd.f32 %v3091_v7, %v3080_v6 }
 0x505   : > { %v3104_v4 = vadd.f32 %v3103_v54, %v3092_v49 }
 0x507   : > { %v3116_v8 = vadd.f32 %v3115_v44, %v3104_v4 }
 0x509   : > { %v3128_v57 = vadd.f32 %v3127_v47, %v3116_v8 }
 0x50b   : > { %v3140_v62 = vadd.f32 %v3139_v15, %v3128_v57 }
 0x50d   : > { %v3152_v33 = vadd.f32 %v3151_v63, %v3140_v62 }
 0x50f   : > { %v3164_v9 = vadd.f32 %v3163_v5, %v3152_v33 }
 0x511   : > { %v3176_v56 = vadd.f32 %v3175_v34, %v3164_v9 }
 0x513   : > { %v3188_v61 = vadd.f32 %v3187_v3, %v3176_v56 }
 0x515   : > { %v3189_v32 = vsel %vm1554_vm9, %v3188_v61, -inf }
 0x516   : > { %3190 = vmax.xlane.f32.xlu1 %v3189_v32 }
 0x5a3   : > { %v3191_v41 = vpop.xlane.xlu1 %3190 }
 0x5a4   : > { %v3192_v43 = vsub.f32 %v3188_v61, %v3191_v41 }
 0x5a6   : > { %v3193_v36 = vmul.f32 1.442695, %v3192_v43 }
 0x5a8   : > { %3374 = vpow2.f32 %v3193_v36 }
 0x5b2   : > { %v3375_v50 = vpop.eup %3374 }
 0x5b3   : > { %v3195_v28 = vsel %vm1554_vm9, %v3375_v50, 0.0 }
 0x5b4   : > { %3196 = vadd.xlane.f32.xlu0 %v3195_v28 }
 0x641   : > { %v3197_v18 = vpop.xlane.xlu0 %3196 }
 0x642   : > { %3376 = vrcp.f32 %v3197_v18 }
 0x64c   : > { %v3377_v30 = vpop.eup %3376 }
 0x64d   : > { %v3199_v22 = vmul.f32 %v3377_v30, %v3375_v50 }
 0x64f   : > { %3200 = vst.msk [vmem:[%s190_s7] sm:$0xff] %vm1554_vm9, %v3199_v22 }
 0x650 PF: > { %p13_p8 = scmp.ge.s32.totalorder %s3492_s17, 4   ;;  %s6183_s12 = smov %s3434_s13 }
 0x651   : > { %s6184_s13 = smov %s3438_s14  ;;  %s6185_s14 = smov %s3502_s20 }
 0x652   : > { %s6186_s15 = smov %s3492_s17  ;;  %15 = sbr.rel (!%p13_p8) target bundleno = 3 (0x3), region = 72 }
 0x659   :  { %3220 = vsyncpa [#allocation3], 1 }
 0x65a   :  { %3222 = vsyncpa [#allocation3 + $0x1], 1 }

</bundles_post_ra>
